<compile_context>
chip_gen: v5e
topology: v5e:2x2
jax: 0.10.0
libtpu: 0.0.40
codegen_flags: <defaults>
</compile_context>

<pallas_src>
import jax
import jax.numpy as jnp
from jax.experimental import pallas as pl
from jax.experimental.pallas import tpu as pltpu

# ---- model config (faithful to the PyTorch module's hard-coded bottleneck) ----
B = 2                  # batch
IMG = 16               # small spatial; IN_DIM = IMG*IMG (torch module uses 28*28)
IN_DIM = IMG * IMG     # 256 (K-aligned to 128 lanes)
EMB_DIM = 768          # encoder output dim == bottleneck dim (64 * 12)
N_HEADS = 64           # num_memory_codebooks (hard-coded in the torch module)
CODEBOOK = 8           # num_memories (codebook size per head)
DIM_MEM = 12           # dim_memory / heads_dim
OUT_DIM = 10           # decoder output dim
HPAD = 128             # heads padded 64 -> 128 so each code's slice is one 128-lane block
N_COLS = CODEBOOK * HPAD   # 1024


# ------------------------- fused forward kernel -------------------------
def _mlp_fused_kernel(x_ref, w_enc_ref, b_enc_ref, emb_bd_ref, emb_sq_ref,
                      val_dec_ref, b_dec_ref, o_ref, codes_ref):
    # 1) encoder Linear + ReLU (bf16 weights, f32 accumulate, f32 bias/ReLU)
    h = jnp.dot(x_ref[...].astype(jnp.bfloat16), w_enc_ref[...],
                preferred_element_type=jnp.float32)
    h = jnp.maximum(h + b_enc_ref[...], 0.0)                          # (TB, 768)

    # 2) VQ distances in argmin-equivalent form |e|^2 - 2*x.e (|x|^2 is constant
    #    per head so it drops out of the argmin). Column layout: j = c*128 + head;
    #    heads 64..127 are zero padding. emb_bd is bf16; emb_sq was built from the
    #    same bf16-rounded codebook, so both terms see identical e.
    xe = jnp.dot(h.astype(jnp.bfloat16), emb_bd_ref[...],
                 preferred_element_type=jnp.float32)                  # (TB, 1024)
    dist = emb_sq_ref[...] - 2.0 * xe

    # 3) per-head argmin over the 8 code slices (128-lane aligned), first-index
    #    tie-break like torch's argmax of -cdist. Pure VPU, no XLU.
    minv = dist[:, 0:HPAD]                                            # (TB, 128)
    idx = jnp.zeros(minv.shape, jnp.int32)
    for c in range(1, CODEBOOK):
        d_c = dist[:, c * HPAD:(c + 1) * HPAD]
        better = d_c < minv
        minv = jnp.where(better, d_c, minv)
        idx = jnp.where(better, c, idx)
    codes_ref[...] = idx                                              # (TB, 128)

    # 4+5) fused value-gather + decoder: full one-hot (TB, 1024) built from 8
    #    lane-aligned compares + one lane concat, then a SINGLE matmul against
    #    val_dec = values @ w_dec (padded heads hit all-zero rows -> contribute 0).
    onehot = jnp.concatenate(
        [(idx == c).astype(jnp.float32) for c in range(CODEBOOK)], axis=1)
    o_ref[...] = jnp.dot(onehot, val_dec_ref[...],
                         preferred_element_type=jnp.float32) + b_dec_ref[...]


# ---------------- one-time weight preprocessing (wrapper side) ----------------
def prepare_vq_operands(key_embed, values, w_dec):
    """Build the fused-kernel operands (weights only, built once).

    Column/row layout uses j = code*HPAD + head so each code's 64 heads occupy
    one 128-lane-aligned slice (heads 64..127 are zero padding).

    Returns:
      emb_bd  (768, 1024) bf16 : block-diagonal codebook,  emb_bd[h*D+d, c*HPAD+g]
                                 = key_embed_bf16[h,c,d] * (g==h)
      emb_sq  (1, 1024)   f32  : |key_embed_bf16[g,c]|^2 at column c*HPAD+g
      val_dec (1024, 10)  f32  : decoder folded into values,
                                 val_dec[c*HPAD+g, :] = values[g,c,:] @ w_dec[g*D:(g+1)*D, :]
    """
    H, C, D = key_embed.shape
    # round the codebook to bf16 ONCE so emb_bd and emb_sq are consistent
    e_b = key_embed.astype(jnp.bfloat16).astype(jnp.float32)
    eye_h = jnp.eye(H, dtype=jnp.float32)

    e4 = jnp.einsum('hcd,hg->hdcg', e_b, eye_h)                       # (H, D, C, H)
    e4 = jnp.pad(e4, ((0, 0), (0, 0), (0, 0), (0, HPAD - H)))
    emb_bd = e4.reshape(H * D, C * HPAD).astype(jnp.bfloat16)         # (768, 1024) bf16

    e2 = jnp.sum(e_b * e_b, axis=-1).T                                # (C, H)
    emb_sq = jnp.pad(e2, ((0, 0), (0, HPAD - H))).reshape(1, C * HPAD)  # f32

    # decoder folded into the value table (exact: both stages are linear)
    w_dec_h = w_dec.reshape(H, D, -1)                                 # (64, 12, 10)
    vd = jnp.einsum('hcd,hdo->cho', values, w_dec_h,
                    precision=jax.lax.Precision.HIGHEST)              # (C, H, 10)
    vd = jnp.pad(vd, ((0, 0), (0, HPAD - H), (0, 0)))
    val_dec = vd.reshape(C * HPAD, -1)                                # (1024, 10) f32
    return emb_bd, emb_sq, val_dec


# ------------------------------ forward pass ------------------------------
def mlp_forward(x_nchw, params, key_optim=False):
    """Returns (logits (B,10), codes (B,N_HEADS) int32 — torch's internal emb_ind)."""
    if key_optim:
        # TODO(synk): key_optim=True path (EMA lerp update of key_embed) is a
        # training-time buffer update; the torch forward returns None there.
        return None
    b = x_nchw.shape[0]
    # 'b c h w -> b (h w) c' + squeeze(-1) with c == 1 is a free row-major
    # reshape -- no transpose op in front of the kernel.
    x2d = x_nchw.reshape(b, -1)
    # batch tiling: one tile at tiny batch; tiles of 128 rows (sublane-aligned)
    # if batch grows, so the "parallel" grid axis actually shards across cores.
    tb = b if b <= 128 else 128
    logits, codes = pl.pallas_call(
        _mlp_fused_kernel,
        out_shape=(
            jax.ShapeDtypeStruct((b, OUT_DIM), jnp.float32),
            jax.ShapeDtypeStruct((b, HPAD), jnp.int32),
        ),
        grid=(pl.cdiv(b, tb),),
        in_specs=[
            pl.BlockSpec((tb, IN_DIM), lambda i: (i, 0)),             # x (batch-tiled)
            pl.BlockSpec((IN_DIM, EMB_DIM), lambda i: (0, 0)),        # w_enc bf16 (resident)
            pl.BlockSpec((1, EMB_DIM), lambda i: (0, 0)),             # b_enc
            pl.BlockSpec((EMB_DIM, N_COLS), lambda i: (0, 0)),        # emb_bd bf16
            pl.BlockSpec((1, N_COLS), lambda i: (0, 0)),              # emb_sq
            pl.BlockSpec((N_COLS, OUT_DIM), lambda i: (0, 0)),        # val_dec (values @ w_dec)
            pl.BlockSpec((1, OUT_DIM), lambda i: (0, 0)),             # b_dec
        ],
        out_specs=[
            pl.BlockSpec((tb, OUT_DIM), lambda i: (i, 0)),
            pl.BlockSpec((tb, HPAD), lambda i: (i, 0)),
        ],
        compiler_params=pltpu.CompilerParams(
            dimension_semantics=("parallel",)),
    )(x2d, params['w_enc_bf16'], params['b_enc'][None, :], params['emb_bd'],
      params['emb_sq'], params['val_dec'], params['b_dec'][None, :])
    return logits, codes[:, :N_HEADS]


# --------------------- pure-JAX reference (validation) ---------------------
def mlp_reference(x_nchw, params):
    """Straightforward f32 reference of the torch forward (diff^2 VQ distance)."""
    b = x_nchw.shape[0]
    x = x_nchw.reshape(b, -1)
    h = jnp.maximum(jnp.dot(x, params['w_enc'],
                            precision=jax.lax.Precision.HIGHEST)
                    + params['b_enc'], 0.0)                           # (B, 768)
    xh = jnp.transpose(h.reshape(b, N_HEADS, DIM_MEM), (1, 0, 2))     # (H, B, D)
    diff = xh[:, :, None, :] - params['key_embed'][:, None, :, :]     # (H, B, C, D)
    dist2 = jnp.sum(diff * diff, axis=-1)                             # (H, B, C)
    idx = jnp.argmin(dist2, axis=-1)                                  # (H, B)
    mem = params['values'][jnp.arange(N_HEADS)[:, None], idx, :]      # (H, B, D)
    flat = jnp.transpose(mem, (1, 0, 2)).reshape(b, N_HEADS * DIM_MEM)
    logits = jnp.dot(flat, params['w_dec'],
                     precision=jax.lax.Precision.HIGHEST) + params['b_dec']
    return logits, idx.T                                              # codes: (B, H)


# ------------------------------------ main ------------------------------------
if __name__ == "__main__":
    key = jax.random.PRNGKey(0)
    ks = jax.random.split(key, 7)

    params = {
        'w_enc': 0.05 * jax.random.normal(ks[0], (IN_DIM, EMB_DIM), jnp.float32),
        'b_enc': 0.05 * jax.random.normal(ks[1], (EMB_DIM,), jnp.float32),
        # key_embed (kaiming_uniform in torch) -- deterministic synthetic init
        'key_embed': jax.random.normal(ks[2], (N_HEADS, CODEBOOK, DIM_MEM), jnp.float32),
        # values (torch.randn)
        'values': jax.random.normal(ks[3], (N_HEADS, CODEBOOK, DIM_MEM), jnp.float32),
        'w_dec': 0.05 * jax.random.normal(ks[4], (EMB_DIM, OUT_DIM), jnp.float32),
        'b_dec': 0.05 * jax.random.normal(ks[5], (OUT_DIM,), jnp.float32),
    }
    # one-time weight preprocessing for the fused kernel (decoder folded in)
    emb_bd, emb_sq, val_dec = prepare_vq_operands(params['key_embed'],
                                                  params['values'],
                                                  params['w_dec'])
    params['emb_bd'] = emb_bd
    params['emb_sq'] = emb_sq
    params['val_dec'] = val_dec
    params['w_enc_bf16'] = params['w_enc'].astype(jnp.bfloat16)

    x = jax.random.normal(ks[6], (B, 1, IMG, IMG), jnp.float32)

    logits, codes = mlp_forward(x, params, key_optim=False)
    logits = jax.block_until_ready(logits)

    assert logits.shape == (B, OUT_DIM), logits.shape
    assert bool(jnp.all(jnp.isfinite(logits))), "non-finite output"

    # --- validate against the pure-JAX f32 reference of the torch forward ---
    ref_logits, ref_codes = mlp_reference(x, params)
    # Code selection must match the diff^2 f32 argmin (allow a small fraction of
    # benign near-tie flips from the |e|^2 - 2 x.e rewrite + bf16 weight rounding).
    match = float(jnp.mean((codes == ref_codes).astype(jnp.float32)))
    assert match >= 0.95, f"VQ code selection mismatch fraction {1.0 - match:.3f}"
    # Gather + (folded) decoder checked against the kernel's own code selection
    # (exact up to matmul rounding, independent of any near-tie flip).
    mem_sel = params['values'][jnp.arange(N_HEADS)[None, :], codes, :]  # (B, H, D)
    sel_ref = jnp.dot(mem_sel.reshape(B, EMB_DIM), params['w_dec'],
                      precision=jax.lax.Precision.HIGHEST) + params['b_dec']
    err = float(jnp.max(jnp.abs(logits - sel_ref)))
    assert err < 5e-2, f"logits mismatch vs reference: max abs err {err:.3e}"
    if match == 1.0:
        err_e2e = float(jnp.max(jnp.abs(logits - ref_logits)))
        assert err_e2e < 5e-2, f"end-to-end mismatch: max abs err {err_e2e:.3e}"

    print("KERNEL_OK")
</pallas_src>

<mosaic_0001>
module attributes {stable_mosaic.version = 11 : i64} {
  func.func @_mlp_fused_kernel(%arg0: i32, %arg1: memref<2x256xf32, #tpu.memory_space<vmem>>, %arg2: memref<256x768xbf16, #tpu.memory_space<vmem>>, %arg3: memref<1x768xf32, #tpu.memory_space<vmem>>, %arg4: memref<768x1024xbf16, #tpu.memory_space<vmem>>, %arg5: memref<1x1024xf32, #tpu.memory_space<vmem>>, %arg6: memref<1024x10xf32, #tpu.memory_space<vmem>>, %arg7: memref<1x10xf32, #tpu.memory_space<vmem>>, %arg8: memref<2x10xf32, #tpu.memory_space<vmem>>, %arg9: memref<2x128xi32, #tpu.memory_space<vmem>>) attributes {dimension_semantics = [#tpu.dimension_semantics<parallel>], iteration_bounds = array<i64: 1>, scalar_prefetch = 0 : i64, scratch_operands = 0 : i64, tpu.core_type = #tpu.core_type<tc>, window_params = [{transform_indices = @transform_0, window_bounds = array<i64: 2, 256>}, {pipeline_mode = #tpu.pipeline_mode<synchronous>, transform_indices = @transform_1, window_bounds = array<i64: 256, 768>}, {pipeline_mode = #tpu.pipeline_mode<synchronous>, transform_indices = @transform_2, window_bounds = array<i64: 1, 768>}, {pipeline_mode = #tpu.pipeline_mode<synchronous>, transform_indices = @transform_3, window_bounds = array<i64: 768, 1024>}, {pipeline_mode = #tpu.pipeline_mode<synchronous>, transform_indices = @transform_4, window_bounds = array<i64: 1, 1024>}, {pipeline_mode = #tpu.pipeline_mode<synchronous>, transform_indices = @transform_5, window_bounds = array<i64: 1024, 10>}, {pipeline_mode = #tpu.pipeline_mode<synchronous>, transform_indices = @transform_6, window_bounds = array<i64: 1, 10>}, {transform_indices = @transform_7, window_bounds = array<i64: 2, 10>}, {transform_indices = @transform_8, window_bounds = array<i64: 2, 128>}]} {
    %c0 = arith.constant 0 : index
    %c0_0 = arith.constant 0 : index
    %0 = vector.load %arg1[%c0, %c0_0] : memref<2x256xf32, #tpu.memory_space<vmem>>, vector<2x256xf32>
    %1 = arith.truncf %0 : vector<2x256xf32> to vector<2x256xbf16>
    %c0_1 = arith.constant 0 : index
    %c0_2 = arith.constant 0 : index
    %2 = vector.load %arg2[%c0_1, %c0_2] : memref<256x768xbf16, #tpu.memory_space<vmem>>, vector<256x768xbf16>
    %cst = arith.constant dense<0.000000e+00> : vector<2x768xf32>
    %3 = tpu.matmul %1, %2, %cst {dimension_numbers = #tpu.dot_dimension_numbers<[1], [0], [0], [1], [0, 0, 1, 1], [], []>} : vector<2x256xbf16>, vector<256x768xbf16>, vector<2x768xf32> -> vector<2x768xf32>
    %c0_3 = arith.constant 0 : index
    %c0_4 = arith.constant 0 : index
    %4 = vector.load %arg3[%c0_3, %c0_4] : memref<1x768xf32, #tpu.memory_space<vmem>>, vector<1x768xf32>
    %5 = vector.broadcast %4 : vector<1x768xf32> to vector<2x768xf32>
    %6 = arith.addf %3, %5 : vector<2x768xf32>
    %cst_5 = arith.constant 0.000000e+00 : f32
    %7 = vector.broadcast %cst_5 : f32 to vector<2x768xf32>
    %8 = arith.maximumf %6, %7 : vector<2x768xf32>
    %9 = arith.truncf %8 : vector<2x768xf32> to vector<2x768xbf16>
    %c0_6 = arith.constant 0 : index
    %c0_7 = arith.constant 0 : index
    %10 = vector.load %arg4[%c0_6, %c0_7] : memref<768x1024xbf16, #tpu.memory_space<vmem>>, vector<768x1024xbf16>
    %cst_8 = arith.constant dense<0.000000e+00> : vector<2x1024xf32>
    %11 = tpu.matmul %9, %10, %cst_8 {dimension_numbers = #tpu.dot_dimension_numbers<[1], [0], [0], [1], [0, 0, 1, 1], [], []>} : vector<2x768xbf16>, vector<768x1024xbf16>, vector<2x1024xf32> -> vector<2x1024xf32>
    %c0_9 = arith.constant 0 : index
    %c0_10 = arith.constant 0 : index
    %12 = vector.load %arg5[%c0_9, %c0_10] : memref<1x1024xf32, #tpu.memory_space<vmem>>, vector<1x1024xf32>
    %cst_11 = arith.constant 2.000000e+00 : f32
    %13 = vector.broadcast %cst_11 : f32 to vector<2x1024xf32>
    %14 = arith.mulf %13, %11 : vector<2x1024xf32>
    %15 = vector.broadcast %12 : vector<1x1024xf32> to vector<2x1024xf32>
    %16 = arith.subf %15, %14 : vector<2x1024xf32>
    %17 = vector.extract_strided_slice %16 {offsets = [0, 0], sizes = [2, 128], strides = [1, 1]} : vector<2x1024xf32> to vector<2x128xf32>
    %c0_i32 = arith.constant 0 : i32
    %18 = vector.broadcast %c0_i32 : i32 to vector<2x128xi32>
    %19 = vector.extract_strided_slice %16 {offsets = [0, 128], sizes = [2, 128], strides = [1, 1]} : vector<2x1024xf32> to vector<2x128xf32>
    %20 = arith.cmpf olt, %19, %17 : vector<2x128xf32>
    %21 = arith.select %20, %19, %17 : vector<2x128xi1>, vector<2x128xf32>
    %c1_i32 = arith.constant 1 : i32
    %22 = vector.broadcast %c1_i32 : i32 to vector<2x128xi32>
    %23 = arith.select %20, %22, %18 : vector<2x128xi1>, vector<2x128xi32>
    %24 = vector.extract_strided_slice %16 {offsets = [0, 256], sizes = [2, 128], strides = [1, 1]} : vector<2x1024xf32> to vector<2x128xf32>
    %25 = arith.cmpf olt, %24, %21 : vector<2x128xf32>
    %26 = arith.select %25, %24, %21 : vector<2x128xi1>, vector<2x128xf32>
    %c2_i32 = arith.constant 2 : i32
    %27 = vector.broadcast %c2_i32 : i32 to vector<2x128xi32>
    %28 = arith.select %25, %27, %23 : vector<2x128xi1>, vector<2x128xi32>
    %29 = vector.extract_strided_slice %16 {offsets = [0, 384], sizes = [2, 128], strides = [1, 1]} : vector<2x1024xf32> to vector<2x128xf32>
    %30 = arith.cmpf olt, %29, %26 : vector<2x128xf32>
    %31 = arith.select %30, %29, %26 : vector<2x128xi1>, vector<2x128xf32>
    %c3_i32 = arith.constant 3 : i32
    %32 = vector.broadcast %c3_i32 : i32 to vector<2x128xi32>
    %33 = arith.select %30, %32, %28 : vector<2x128xi1>, vector<2x128xi32>
    %34 = vector.extract_strided_slice %16 {offsets = [0, 512], sizes = [2, 128], strides = [1, 1]} : vector<2x1024xf32> to vector<2x128xf32>
    %35 = arith.cmpf olt, %34, %31 : vector<2x128xf32>
    %36 = arith.select %35, %34, %31 : vector<2x128xi1>, vector<2x128xf32>
    %c4_i32 = arith.constant 4 : i32
    %37 = vector.broadcast %c4_i32 : i32 to vector<2x128xi32>
    %38 = arith.select %35, %37, %33 : vector<2x128xi1>, vector<2x128xi32>
    %39 = vector.extract_strided_slice %16 {offsets = [0, 640], sizes = [2, 128], strides = [1, 1]} : vector<2x1024xf32> to vector<2x128xf32>
    %40 = arith.cmpf olt, %39, %36 : vector<2x128xf32>
    %41 = arith.select %40, %39, %36 : vector<2x128xi1>, vector<2x128xf32>
    %c5_i32 = arith.constant 5 : i32
    %42 = vector.broadcast %c5_i32 : i32 to vector<2x128xi32>
    %43 = arith.select %40, %42, %38 : vector<2x128xi1>, vector<2x128xi32>
    %44 = vector.extract_strided_slice %16 {offsets = [0, 768], sizes = [2, 128], strides = [1, 1]} : vector<2x1024xf32> to vector<2x128xf32>
    %45 = arith.cmpf olt, %44, %41 : vector<2x128xf32>
    %46 = arith.select %45, %44, %41 : vector<2x128xi1>, vector<2x128xf32>
    %c6_i32 = arith.constant 6 : i32
    %47 = vector.broadcast %c6_i32 : i32 to vector<2x128xi32>
    %48 = arith.select %45, %47, %43 : vector<2x128xi1>, vector<2x128xi32>
    %49 = vector.extract_strided_slice %16 {offsets = [0, 896], sizes = [2, 128], strides = [1, 1]} : vector<2x1024xf32> to vector<2x128xf32>
    %50 = arith.cmpf olt, %49, %46 : vector<2x128xf32>
    %c7_i32 = arith.constant 7 : i32
    %51 = vector.broadcast %c7_i32 : i32 to vector<2x128xi32>
    %52 = arith.select %50, %51, %48 : vector<2x128xi1>, vector<2x128xi32>
    %c0_12 = arith.constant 0 : index
    %c0_13 = arith.constant 0 : index
    %53 = vector.load %arg9[%c0_12, %c0_13] : memref<2x128xi32, #tpu.memory_space<vmem>>, vector<2x128xi32>
    tpu.vector_store %arg9[%c0_12, %c0_13], %52 {strides = array<i32>} : memref<2x128xi32, #tpu.memory_space<vmem>>, vector<2x128xi32>,
    %c0_i32_14 = arith.constant 0 : i32
    %54 = vector.broadcast %c0_i32_14 : i32 to vector<2x128xi32>
    %55 = arith.cmpi eq, %52, %54 : vector<2x128xi32>
    %56 = arith.extui %55 : vector<2x128xi1> to vector<2x128xi32>
    %57 = arith.sitofp %56 : vector<2x128xi32> to vector<2x128xf32>
    %c1_i32_15 = arith.constant 1 : i32
    %58 = vector.broadcast %c1_i32_15 : i32 to vector<2x128xi32>
    %59 = arith.cmpi eq, %52, %58 : vector<2x128xi32>
    %60 = arith.extui %59 : vector<2x128xi1> to vector<2x128xi32>
    %61 = arith.sitofp %60 : vector<2x128xi32> to vector<2x128xf32>
    %c2_i32_16 = arith.constant 2 : i32
    %62 = vector.broadcast %c2_i32_16 : i32 to vector<2x128xi32>
    %63 = arith.cmpi eq, %52, %62 : vector<2x128xi32>
    %64 = arith.extui %63 : vector<2x128xi1> to vector<2x128xi32>
    %65 = arith.sitofp %64 : vector<2x128xi32> to vector<2x128xf32>
    %c3_i32_17 = arith.constant 3 : i32
    %66 = vector.broadcast %c3_i32_17 : i32 to vector<2x128xi32>
    %67 = arith.cmpi eq, %52, %66 : vector<2x128xi32>
    %68 = arith.extui %67 : vector<2x128xi1> to vector<2x128xi32>
    %69 = arith.sitofp %68 : vector<2x128xi32> to vector<2x128xf32>
    %c4_i32_18 = arith.constant 4 : i32
    %70 = vector.broadcast %c4_i32_18 : i32 to vector<2x128xi32>
    %71 = arith.cmpi eq, %52, %70 : vector<2x128xi32>
    %72 = arith.extui %71 : vector<2x128xi1> to vector<2x128xi32>
    %73 = arith.sitofp %72 : vector<2x128xi32> to vector<2x128xf32>
    %c5_i32_19 = arith.constant 5 : i32
    %74 = vector.broadcast %c5_i32_19 : i32 to vector<2x128xi32>
    %75 = arith.cmpi eq, %52, %74 : vector<2x128xi32>
    %76 = arith.extui %75 : vector<2x128xi1> to vector<2x128xi32>
    %77 = arith.sitofp %76 : vector<2x128xi32> to vector<2x128xf32>
    %c6_i32_20 = arith.constant 6 : i32
    %78 = vector.broadcast %c6_i32_20 : i32 to vector<2x128xi32>
    %79 = arith.cmpi eq, %52, %78 : vector<2x128xi32>
    %80 = arith.extui %79 : vector<2x128xi1> to vector<2x128xi32>
    %81 = arith.sitofp %80 : vector<2x128xi32> to vector<2x128xf32>
    %c7_i32_21 = arith.constant 7 : i32
    %82 = vector.broadcast %c7_i32_21 : i32 to vector<2x128xi32>
    %83 = arith.cmpi eq, %52, %82 : vector<2x128xi32>
    %84 = arith.extui %83 : vector<2x128xi1> to vector<2x128xi32>
    %85 = arith.sitofp %84 : vector<2x128xi32> to vector<2x128xf32>
    %86 = tpu.concatenate %57, %61, %65, %69, %73, %77, %81, %85 in 1 : vector<2x128xf32>, vector<2x128xf32>, vector<2x128xf32>, vector<2x128xf32>, vector<2x128xf32>, vector<2x128xf32>, vector<2x128xf32>, vector<2x128xf32> -> vector<2x1024xf32>
    %c0_22 = arith.constant 0 : index
    %c0_23 = arith.constant 0 : index
    %87 = vector.load %arg6[%c0_22, %c0_23] : memref<1024x10xf32, #tpu.memory_space<vmem>>, vector<1024x10xf32>
    %cst_24 = arith.constant dense<0.000000e+00> : vector<2x10xf32>
    %88 = tpu.matmul %86, %87, %cst_24 {dimension_numbers = #tpu.dot_dimension_numbers<[1], [0], [0], [1], [0, 0, 1, 1], [], []>} : vector<2x1024xf32>, vector<1024x10xf32>, vector<2x10xf32> -> vector<2x10xf32>
    %c0_25 = arith.constant 0 : index
    %c0_26 = arith.constant 0 : index
    %89 = vector.load %arg7[%c0_25, %c0_26] : memref<1x10xf32, #tpu.memory_space<vmem>>, vector<1x10xf32>
    %90 = vector.broadcast %89 : vector<1x10xf32> to vector<2x10xf32>
    %91 = arith.addf %88, %90 : vector<2x10xf32>
    %c0_27 = arith.constant 0 : index
    %c0_28 = arith.constant 0 : index
    %92 = vector.load %arg8[%c0_27, %c0_28] : memref<2x10xf32, #tpu.memory_space<vmem>>, vector<2x10xf32>
    tpu.vector_store %arg8[%c0_27, %c0_28], %91 {strides = array<i32>} : memref<2x10xf32, #tpu.memory_space<vmem>>, vector<2x10xf32>,
    return
  }
  func.func @transform_0(%arg0: i32) -> (i32, i32) {
    %c0_i32 = arith.constant 0 : i32
    %c0_i32_0 = arith.constant 0 : i32
    return %arg0, %c0_i32 : i32, i32
  }
  func.func @transform_1(%arg0: i32) -> (i32, i32) {
    %c0_i32 = arith.constant 0 : i32
    %c0_i32_0 = arith.constant 0 : i32
    %c0_i32_1 = arith.constant 0 : i32
    return %c0_i32, %c0_i32_0 : i32, i32
  }
  func.func @transform_2(%arg0: i32) -> (i32, i32) {
    %c0_i32 = arith.constant 0 : i32
    %c0_i32_0 = arith.constant 0 : i32
    %c0_i32_1 = arith.constant 0 : i32
    return %c0_i32, %c0_i32_0 : i32, i32
  }
  func.func @transform_3(%arg0: i32) -> (i32, i32) {
    %c0_i32 = arith.constant 0 : i32
    %c0_i32_0 = arith.constant 0 : i32
    %c0_i32_1 = arith.constant 0 : i32
    return %c0_i32, %c0_i32_0 : i32, i32
  }
  func.func @transform_4(%arg0: i32) -> (i32, i32) {
    %c0_i32 = arith.constant 0 : i32
    %c0_i32_0 = arith.constant 0 : i32
    %c0_i32_1 = arith.constant 0 : i32
    return %c0_i32, %c0_i32_0 : i32, i32
  }
  func.func @transform_5(%arg0: i32) -> (i32, i32) {
    %c0_i32 = arith.constant 0 : i32
    %c0_i32_0 = arith.constant 0 : i32
    %c0_i32_1 = arith.constant 0 : i32
    return %c0_i32, %c0_i32_0 : i32, i32
  }
  func.func @transform_6(%arg0: i32) -> (i32, i32) {
    %c0_i32 = arith.constant 0 : i32
    %c0_i32_0 = arith.constant 0 : i32
    %c0_i32_1 = arith.constant 0 : i32
    return %c0_i32, %c0_i32_0 : i32, i32
  }
  func.func @transform_7(%arg0: i32) -> (i32, i32) {
    %c0_i32 = arith.constant 0 : i32
    %c0_i32_0 = arith.constant 0 : i32
    return %arg0, %c0_i32 : i32, i32
  }
  func.func @transform_8(%arg0: i32) -> (i32, i32) {
    %c0_i32 = arith.constant 0 : i32
    %c0_i32_0 = arith.constant 0 : i32
    return %arg0, %c0_i32 : i32, i32
  }
}

</mosaic_0001>

<bundles_post_ra>
// kernel: tpu_custom_call.1
= control target key start
LH: loop header
LB: loop body
LE: loop exit
PB: predicated region body
PF: predicated region fallthrough
CT: control target
= control target key end

     0   :  { %14 = vsyncpa [#allocation3], 0  ;;  %s7523_s0 = inlined_call_operand.hbm [shape: f32[2,256], index: 0, kind: input, shape index: {}]   ;;  %s7524_s1 = inlined_call_operand.hbm [shape: bf16[256,768], index: 1, kind: input, shape index: {}]   ;;  %s7525_s2 = inlined_call_operand.hbm [shape: f32[1,768], index: 2, kind: input, shape index: {}]   ;;  %s7526_s3 = inlined_call_operand.hbm [shape: bf16[768,1024], index: 3, kind: input, shape index: {}]   ;;  %s7527_s4 = inlined_call_operand.hbm [shape: f32[1,1024], index: 4, kind: input, shape index: {}]   ;;  %s7528_s5 = inlined_call_operand.vmem [shape: f32[1024,10], index: 5, kind: input, shape index: {}]   ;;  %s7529_s6 = inlined_call_operand.hbm [shape: f32[1,10], index: 6, kind: input, shape index: {}]   ;;  %s7530_s7 = inlined_call_operand.hbm [shape: f32[2,10], index: 7, kind: output, shape index: {0}]   ;;  %s7531_s8 = inlined_call_operand.hbm [shape: s32[2,128], index: 8, kind: output, shape index: {1}]  }
   0x1   :  { %15 = vsyncpa [#allocation6], 0 }
   0x2   :  { %16 = vsyncpa [#allocation9], 0 }
   0x3   :  { %17 = vsyncpa [#allocation12], 0 }
   0x4   :  { %18 = vsyncpa [#allocation4], 0  ;;  %s35_s29 = sshll.u32 %s7524_s1, 4  ;;  %s36_s29 = int_to_ptr.hbm [resolvable:$true] %s35_s29 }
   0x5   :  { %19 = vsyncpa [#allocation15], 0  ;;  %s6856_s30 = smov [#allocation5]   ;;  %s59_s12 = sshll.u32 %s7526_s3, 4  ;;  %s60_s12 = int_to_ptr.hbm [resolvable:$true] %s59_s12 }
   0x6   :  { %s37_s9 = sshll.u32 %s6856_s30, 4  ;;  %s6857_s13 = smov 384   ;;  %s38_s9 = int_to_ptr.vmem [resolvable:$true] %s37_s9 }
   0x7   :  { %s6858_s14 = smov 24   ;;  %s6859_s15 = smov [#allocation8]  }
   0x8   :  { %43 = dma.hbm_to_vmem [thread:$0]  %s36_s29, 12288, %s38_s9, [#allocation6], %s6857_s13, %s6857_s13, %s6858_s14  }
   0x9   :  { %s61_s16 = sshll.u32 %s6859_s15, 4  ;;  %s6860_s17 = smov 512   ;;  %s62_s16 = int_to_ptr.vmem [resolvable:$true] %s61_s16 }
   0xa   :  { %s6861_s18 = smov 32   ;;  %s25_s20 = sshll.u32 %s7523_s0, 4  ;;  %s26_s20 = int_to_ptr.hbm [resolvable:$true] %s25_s20 }
   0xb   :  { %67 = dma.hbm_to_vmem [thread:$0]  %s60_s12, 49152, %s62_s16, [#allocation9], %s6860_s17, %s6860_s17, %s6861_s18  }
   0xc   :  { %s6862_s21 = smov [#allocation2]   ;;  %s49_s24 = sshll.u32 %s7525_s2, 4  ;;  %s50_s24 = int_to_ptr.hbm [resolvable:$true] %s49_s24 }
   0xd   :  { %s27_s22 = sshll.u32 %s6862_s21, 4  ;;  %s6863_s25 = smov [#allocation7]   ;;  %s28_s22 = int_to_ptr.vmem [resolvable:$true] %s27_s22 }
   0xe   :  { %30 = dma.hbm_to_vmem [thread:$0]  %s26_s20, 64, %s28_s22, [#allocation3]  }
   0xf   :  { %s51_s26 = sshll.u32 %s6863_s25, 4  ;;  %s73_s29 = sshll.u32 %s7527_s4, 4  ;;  %s52_s26 = int_to_ptr.vmem [resolvable:$true] %s51_s26  ;;  %s74_s29 = int_to_ptr.hbm [resolvable:$true] %s73_s29 }
  0x10   :  { %54 = dma.hbm_to_vmem [thread:$0]  %s50_s24, 96, %s52_s26, [#allocation6]  }
  0x11   :  { %s86_s9 = sshll.u32 %s7529_s6, 4  ;;  %s6864_s10 = smov [#allocation10]   ;;  %s87_s9 = int_to_ptr.hbm [resolvable:$true] %s86_s9 }
  0x12   :  { %s75_s11 = sshll.u32 %s6864_s10, 4  ;;  %s6865_s2 = smov [#allocation11]   ;;  %s76_s11 = int_to_ptr.vmem [resolvable:$true] %s75_s11 }
  0x13   :  { %78 = dma.hbm_to_vmem [thread:$0]  %s74_s29, 128, %s76_s11, [#allocation9]  }
  0x14   :  { %s88_s12 = sshll.u32 %s6865_s2, 4  ;;  %s89_s12 = int_to_ptr.vmem [resolvable:$true] %s88_s12 }
  0x15   :  { %91 = dma.hbm_to_vmem [thread:$0]  %s87_s9, 16, %s89_s12, [#allocation12]  }
  0x16   :  { %6844 = dma.done.wait [#allocation3], 64  }
  0x17   :  { %6845 = vsyncadd [#allocation3], 4294967232 }
  0x18   :  { %6846 = dma.done.wait [#allocation6], 12384  }
  0x19   :  { %6847 = vsyncadd [#allocation6], 4294954912 }
  0x1a   :  { %6848 = dma.done.wait [#allocation9], 49280  }
  0x1b   :  { %6849 = vsyncadd [#allocation9], 4294918016 }
  0x1c   :  { %6850 = dma.done.wait [#allocation12], 16  }
  0x1d   :  { %6851 = vsyncadd [#allocation12], 4294967280  ;;  %v4390_v0 = vld [vmem:[#allocation5 + $0x150] sm:$0xf]  ;;  %v6201_v1 = vld [vmem:[#allocation5 + $0x164] sm:$0xf0] }
  0x1e   :  { %v4582_v2 = vld [vmem:[#allocation5 + $0x2d0] sm:$0xf]  ;;  %v4391_v3 = vor.u32 %v6201_v1, %v4390_v0  ;;  %v6249_v4 = vld [vmem:[#allocation5 + $0x2e4] sm:$0xf0]  ;;  %v6198_v5 = vld [vmem:[#allocation5 + $0x154] sm:$0xf] }
  0x1f   :  { %v4392_v6 = vld [vmem:[#allocation5 + $0x168] sm:$0xf0]  ;;  %v4583_v7 = vor.u32 %v6249_v4, %v4582_v2  ;;  %v6246_v9 = vld [vmem:[#allocation5 + $0x2d4] sm:$0xf]  ;;  %v4366_v11 = vld [vmem:[#allocation5 + $0x120] sm:$0xf] }
  0x20   :  { %v4395_v8 = vor.u32 %v6198_v5, %v4392_v6  ;;  %v4584_v10 = vld [vmem:[#allocation5 + $0x2e8] sm:$0xf0]  ;;  %715 = vmatpush.bf16.msra.mxu0 %v4391_v3  ;;  %v6195_v13 = vld [vmem:[#allocation5 + $0x134] sm:$0xf0]  ;;  %v4558_v14 = vld [vmem:[#allocation5 + $0x2a0] sm:$0xf] }
  0x21   :  { %v4587_v12 = vor.u32 %v6246_v9, %v4584_v10  ;;  %v6243_v15 = vld [vmem:[#allocation5 + $0x2b4] sm:$0xf0]  ;;  %728 = vmatpush.bf16.msra.mxu1 %v4583_v7  ;;  %v4367_v16 = vor.u32 %v6195_v13, %v4366_v11  ;;  %v6192_v18 = vld [vmem:[#allocation5 + $0x124] sm:$0xf]  ;;  %v4368_v19 = vld [vmem:[#allocation5 + $0x138] sm:$0xf0] }
  0x22   :  { %741 = vmatpush.bf16.msra.mxu2 %v4395_v8  ;;  %v4559_v17 = vor.u32 %v6243_v15, %v4558_v14  ;;  %v6240_v20 = vld [vmem:[#allocation5 + $0x2a4] sm:$0xf]  ;;  %v4371_v21 = vor.u32 %v6192_v18, %v4368_v19  ;;  %v4560_v22 = vld [vmem:[#allocation5 + $0x2b8] sm:$0xf0]  ;;  %v4342_v23 = vld [vmem:[#allocation5 + $0xf0] sm:$0xf] }
  0x23   :  { %754 = vmatpush.bf16.msra.mxu3 %v4587_v12  ;;  %v6189_v24 = vld [vmem:[#allocation5 + $0x104] sm:$0xf0]  ;;  %v4563_v25 = vor.u32 %v6240_v20, %v4560_v22  ;;  %v4534_v26 = vld [vmem:[#allocation5 + $0x270] sm:$0xf]  ;;  %v6186_v28 = vld [vmem:[#allocation5 + $0xf4] sm:$0xf] }
  0x24   :  { %v6237_v27 = vld [vmem:[#allocation5 + $0x284] sm:$0xf0]  ;;  %716 = vmatpush.bf16.msra.mxu0 %v4367_v16  ;;  %v4343_v29 = vor.u32 %v6189_v24, %v4342_v23  ;;  %v4344_v30 = vld [vmem:[#allocation5 + $0x108] sm:$0xf0]  ;;  %v6234_v31 = vld [vmem:[#allocation5 + $0x274] sm:$0xf] }
  0x25   :  { %v4536_v32 = vld [vmem:[#allocation5 + $0x288] sm:$0xf0]  ;;  %729 = vmatpush.bf16.msra.mxu1 %v4559_v17  ;;  %v4535_v33 = vor.u32 %v6237_v27, %v4534_v26  ;;  %v4347_v34 = vor.u32 %v6186_v28, %v4344_v30  ;;  %v4318_v35 = vld [vmem:[#allocation5 + $0xc0] sm:$0xf]  ;;  %v6183_v36 = vld [vmem:[#allocation5 + $0xd4] sm:$0xf0] }
  0x26   :  { %742 = vmatpush.bf16.msra.mxu2 %v4371_v21  ;;  %v4510_v37 = vld [vmem:[#allocation5 + $0x240] sm:$0xf]  ;;  %v4539_v38 = vor.u32 %v6234_v31, %v4536_v32  ;;  %v6231_v39 = vld [vmem:[#allocation5 + $0x254] sm:$0xf0]  ;;  %v6180_v40 = vld [vmem:[#allocation5 + $0xc4] sm:$0xf]  ;;  %v4319_v44 = vor.u32 %v6183_v36, %v4318_v35 }
  0x27   :  { %755 = vmatpush.bf16.msra.mxu3 %v4563_v25  ;;  %v4320_v41 = vld [vmem:[#allocation5 + $0xd8] sm:$0xf0]  ;;  %v6228_v42 = vld [vmem:[#allocation5 + $0x244] sm:$0xf]  ;;  %v4511_v45 = vor.u32 %v6231_v39, %v4510_v37  ;;  %v4294_v47 = vld [vmem:[#allocation5 + $0x90] sm:$0xf] }
  0x28   :  { %v4512_v43 = vld [vmem:[#allocation5 + $0x258] sm:$0xf0]  ;;  %717 = vmatpush.bf16.msra.mxu0 %v4343_v29  ;;  %v4323_v46 = vor.u32 %v6180_v40, %v4320_v41  ;;  %v6177_v48 = vld [vmem:[#allocation5 + $0xa4] sm:$0xf0]  ;;  %v4486_v49 = vld [vmem:[#allocation5 + $0x210] sm:$0xf] }
  0x29   :  { %730 = vmatpush.bf16.msra.mxu1 %v4535_v33  ;;  %v4515_v50 = vor.u32 %v6228_v42, %v4512_v43  ;;  %v6225_v51 = vld [vmem:[#allocation5 + $0x224] sm:$0xf0]  ;;  %v6174_v52 = vld [vmem:[#allocation5 + $0x94] sm:$0xf]  ;;  %v4296_v53 = vld [vmem:[#allocation5 + $0xa8] sm:$0xf0]  ;;  %v4295_v56 = vor.u32 %v6177_v48, %v4294_v47 }
  0x2a   :  { %743 = vmatpush.bf16.msra.mxu2 %v4347_v34  ;;  %v6222_v54 = vld [vmem:[#allocation5 + $0x214] sm:$0xf]  ;;  %v4488_v55 = vld [vmem:[#allocation5 + $0x228] sm:$0xf0]  ;;  %v4487_v57 = vor.u32 %v6225_v51, %v4486_v49  ;;  %v4299_v58 = vor.u32 %v6174_v52, %v4296_v53  ;;  %v4270_v59 = vld [vmem:[#allocation5 + $0x60] sm:$0xf] }
  0x2b   :  { %756 = vmatpush.bf16.msra.mxu3 %v4539_v38  ;;  %v6171_v60 = vld [vmem:[#allocation5 + $0x74] sm:$0xf0]  ;;  %v4462_v61 = vld [vmem:[#allocation5 + $0x1e0] sm:$0xf]  ;;  %v4491_v62 = vor.u32 %v6222_v54, %v4488_v55  ;;  %v6168_v0 = vld [vmem:[#allocation5 + $0x64] sm:$0xf] }
  0x2c   :  { %718 = vmatpush.bf16.msra.mxu0 %v4319_v44  ;;  %v6219_v63 = vld [vmem:[#allocation5 + $0x1f4] sm:$0xf0]  ;;  %v4272_v1 = vld [vmem:[#allocation5 + $0x78] sm:$0xf0]  ;;  %v6216_v2 = vld [vmem:[#allocation5 + $0x1e4] sm:$0xf]  ;;  %v4271_v4 = vor.u32 %v6171_v60, %v4270_v59 }
  0x2d   :  { %731 = vmatpush.bf16.msra.mxu1 %v4511_v45  ;;  %v4464_v3 = vld [vmem:[#allocation5 + $0x1f8] sm:$0xf0]  ;;  %v4463_v5 = vor.u32 %v6219_v63, %v4462_v61  ;;  %v4275_v6 = vor.u32 %v6168_v0, %v4272_v1  ;;  %v4246_v7 = vld [vmem:[#allocation5 + $0x30] sm:$0xf]  ;;  %v6165_v8 = vld [vmem:[#allocation5 + $0x44] sm:$0xf0] }
  0x2e   :  { %744 = vmatpush.bf16.msra.mxu2 %v4323_v46  ;;  %v4438_v9 = vld [vmem:[#allocation5 + $0x1b0] sm:$0xf]  ;;  %v4467_v10 = vor.u32 %v6216_v2, %v4464_v3  ;;  %v6213_v11 = vld [vmem:[#allocation5 + $0x1c4] sm:$0xf0]  ;;  %v6162_v12 = vld [vmem:[#allocation5 + $0x34] sm:$0xf]  ;;  %v4247_v17 = vor.u32 %v6165_v8, %v4246_v7 }
  0x2f   :  { %757 = vmatpush.bf16.msra.mxu3 %v4515_v50  ;;  %v4248_v13 = vld [vmem:[#allocation5 + $0x48] sm:$0xf0]  ;;  %v6210_v14 = vld [vmem:[#allocation5 + $0x1b4] sm:$0xf]  ;;  %v4222_v16 = vld [vmem:[#allocation5] sm:$0xf]  ;;  %v4439_v21 = vor.u32 %v6213_v11, %v4438_v9 }
  0x30   :  { %719 = vmatpush.bf16.msra.mxu0 %v4295_v56  ;;  %v4440_v15 = vld [vmem:[#allocation5 + $0x1c8] sm:$0xf0]  ;;  %v6159_v18 = vld [vmem:[#allocation5 + $0x14] sm:$0xf0]  ;;  %v4414_v19 = vld [vmem:[#allocation5 + $0x180] sm:$0xf]  ;;  %v4251_v22 = vor.u32 %v6162_v12, %v4248_v13 }
  0x31   :  { %732 = vmatpush.bf16.msra.mxu1 %v4487_v57  ;;  %v6207_v20 = vld [vmem:[#allocation5 + $0x194] sm:$0xf0]  ;;  %v6156_v23 = vld [vmem:[#allocation5 + $0x4] sm:$0xf]  ;;  %v4224_v24 = vld [vmem:[#allocation5 + $0x18] sm:$0xf0]  ;;  %v4443_v26 = vor.u32 %v6210_v14, %v4440_v15  ;;  %v4223_v33 = vor.u32 %v6159_v18, %v4222_v16 }
  0x32   :  { %745 = vmatpush.bf16.msra.mxu2 %v4299_v58  ;;  %v6204_v25 = vld [vmem:[#allocation5 + $0x184] sm:$0xf]  ;;  %v4416_v27 = vld [vmem:[#allocation5 + $0x198] sm:$0xf0]  ;;  %v4398_v28 = vld [vmem:[#allocation5 + $0x158] sm:$0xf]  ;;  %v4415_v36 = vor.u32 %v6207_v20, %v4414_v19  ;;  %v4227_v37 = vor.u32 %v6156_v23, %v4224_v24 }
  0x33   :  { %758 = vmatpush.bf16.msra.mxu3 %v4491_v62  ;;  %v6202_v29 = vld [vmem:[#allocation5 + $0x16c] sm:$0xf0]  ;;  %v4590_v30 = vld [vmem:[#allocation5 + $0x2d8] sm:$0xf]  ;;  %v116_v32 = vld [vmem:[#allocation2] sm:$0xf]  ;;  %v4419_v40 = vor.u32 %v6204_v25, %v4416_v27 }
  0x34   :  { %720 = vmatpush.bf16.msra.mxu0 %v4271_v4  ;;  %v6250_v31 = vld [vmem:[#allocation5 + $0x2ec] sm:$0xf0]  ;;  %v6199_v34 = vld [vmem:[#allocation5 + $0x15c] sm:$0xf]  ;;  %v4400_v35 = vld [vmem:[#allocation5 + $0x170] sm:$0xf0]  ;;  %v4399_v41 = vor.u32 %v6202_v29, %v4398_v28 }
  0x35   :  { %733 = vmatpush.bf16.msra.mxu1 %v4463_v5  ;;  %118 = vst [vmem:[#allocation1] ss:$4 sm:$0xff] %v116_v32  ;;  %v6247_v38 = vld [vmem:[#allocation5 + $0x2dc] sm:$0xf]  ;;  %v4592_v39 = vld [vmem:[#allocation5 + $0x2f0] sm:$0xf0]  ;;  %v4591_v42 = vor.u32 %v6250_v31, %v4590_v30  ;;  %v4403_v43 = vor.u32 %v6199_v34, %v4400_v35 }
  0x36   :  { %746 = vmatpush.bf16.msra.mxu2 %v4275_v6  ;;  %v4374_v44 = vld [vmem:[#allocation5 + $0x128] sm:$0xf]  ;;  %v6196_v45 = vld [vmem:[#allocation5 + $0x13c] sm:$0xf0]  ;;  %v4595_v47 = vor.u32 %v6247_v38, %v4592_v39  ;;  %v6193_v49 = vld [vmem:[#allocation5 + $0x12c] sm:$0xf] }
  0x37   :  { %759 = vmatpush.bf16.msra.mxu3 %v4467_v10  ;;  %v4566_v46 = vld [vmem:[#allocation5 + $0x2a8] sm:$0xf]  ;;  %v6244_v48 = vld [vmem:[#allocation5 + $0x2bc] sm:$0xf0]  ;;  %v4376_v50 = vld [vmem:[#allocation5 + $0x140] sm:$0xf0]  ;;  %v4375_v53 = vor.u32 %v6196_v45, %v4374_v44 }
  0x38   :  { %721 = vmatpush.bf16.msra.mxu0 %v4247_v17  ;;  %v6241_v51 = vld [vmem:[#allocation5 + $0x2ac] sm:$0xf]  ;;  %v4568_v52 = vld [vmem:[#allocation5 + $0x2c0] sm:$0xf0]  ;;  %v4350_v54 = vld [vmem:[#allocation5 + $0xf8] sm:$0xf]  ;;  %v4567_v57 = vor.u32 %v6244_v48, %v4566_v46  ;;  %v4379_v58 = vor.u32 %v6193_v49, %v4376_v50 }
  0x39   :  { %734 = vmatpush.bf16.msra.mxu1 %v4439_v21  ;;  %v6190_v55 = vld [vmem:[#allocation5 + $0x10c] sm:$0xf0]  ;;  %v4542_v56 = vld [vmem:[#allocation5 + $0x278] sm:$0xf]  ;;  %v4571_v61 = vor.u32 %v6241_v51, %v4568_v52  ;;  %v6187_v0 = vld [vmem:[#allocation5 + $0xfc] sm:$0xf] }
  0x3a   :  { %747 = vmatpush.bf16.msra.mxu2 %v4251_v22  ;;  %v6238_v63 = vld [vmem:[#allocation5 + $0x28c] sm:$0xf0]  ;;  %v4352_v1 = vld [vmem:[#allocation5 + $0x110] sm:$0xf0]  ;;  %v6235_v2 = vld [vmem:[#allocation5 + $0x27c] sm:$0xf]  ;;  %v4351_v5 = vor.u32 %v6190_v55, %v4350_v54 }
  0x3b   :  { %760 = vmatpush.bf16.msra.mxu3 %v4443_v26  ;;  %v4544_v3 = vld [vmem:[#allocation5 + $0x290] sm:$0xf0]  ;;  %v4543_v6 = vor.u32 %v6238_v63, %v4542_v56  ;;  %v4355_v7 = vor.u32 %v6187_v0, %v4352_v1  ;;  %v4326_v8 = vld [vmem:[#allocation5 + $0xc8] sm:$0xf]  ;;  %v6184_v9 = vld [vmem:[#allocation5 + $0xdc] sm:$0xf0] }
  0x3c   :  { %722 = vmatpush.bf16.msra.mxu0 %v4223_v33  ;;  %v119_v59 = vld.sshfl [vmem:[#allocation1] sm:$0xff pattern:$0x73625140]  ;;  %v120_v60 = vld.sshfl [vmem:[#allocation1 + $0x8] sm:$0xff pattern:$0x73625140]  ;;  %v4547_v11 = vor.u32 %v6235_v2, %v4544_v3  ;;  %v4327_v17 = vor.u32 %v6184_v9, %v4326_v8 }
  0x3d   :  { %735 = vmatpush.bf16.msra.mxu1 %v4415_v36  ;;  %v6933_v62 = vpack.c.bf16 %v119_v59, %v119_v59  ;;  %v6935_v4 = vpack.c.bf16 %v120_v60, %v120_v60  ;;  %v4518_v10 = vld [vmem:[#allocation5 + $0x248] sm:$0xf]  ;;  %v6232_v12 = vld [vmem:[#allocation5 + $0x25c] sm:$0xf0]  ;;  %v6181_v13 = vld [vmem:[#allocation5 + $0xcc] sm:$0xf] }
  0x3e   :  { %748 = vmatpush.bf16.msra.mxu2 %v4227_v37  ;;  %v4328_v14 = vld [vmem:[#allocation5 + $0xe0] sm:$0xf0]  ;;  %v6229_v15 = vld [vmem:[#allocation5 + $0x24c] sm:$0xf]  ;;  %v4519_v18 = vor.u32 %v6232_v12, %v4518_v10  ;;  %v4302_v20 = vld [vmem:[#allocation5 + $0x98] sm:$0xf] }
  0x3f   :  { %761 = vmatpush.bf16.msra.mxu3 %v4419_v40  ;;  %723 = vmatmul.bf16.vlgmr.msra.gmra.mxu0 %v6933_v62  ;;  %v4520_v16 = vld [vmem:[#allocation5 + $0x260] sm:$0xf0]  ;;  %v4331_v19 = vor.u32 %v6181_v13, %v4328_v14  ;;  %v6178_v21 = vld [vmem:[#allocation5 + $0xac] sm:$0xf0]  ;;  %v4494_v22 = vld [vmem:[#allocation5 + $0x218] sm:$0xf] }
  0x40   :  { %767 = vmatpush.bf16.msrb.mxu0 %v4399_v41  ;;  %736 = vmatmul.bf16.vlgmr.msra.gmra.mxu1 %v6935_v4  ;;  %v4523_v23 = vor.u32 %v6229_v15, %v4520_v16  ;;  %v6226_v24 = vld [vmem:[#allocation5 + $0x22c] sm:$0xf0]  ;;  %v6175_v25 = vld [vmem:[#allocation5 + $0x9c] sm:$0xf]  ;;  %v4304_v26 = vld [vmem:[#allocation5 + $0xb0] sm:$0xf0]  ;;  %v4303_v29 = vor.u32 %v6178_v21, %v4302_v20 }
  0x41   :  { %780 = vmatpush.bf16.msrb.mxu1 %v4591_v42  ;;  %749 = vmatmul.bf16.vlgmr.msra.gmra.mxu2 %v6933_v62  ;;  %v6223_v27 = vld [vmem:[#allocation5 + $0x21c] sm:$0xf]  ;;  %v4496_v28 = vld [vmem:[#allocation5 + $0x230] sm:$0xf0]  ;;  %v4495_v30 = vor.u32 %v6226_v24, %v4494_v22  ;;  %v4307_v31 = vor.u32 %v6175_v25, %v4304_v26  ;;  %v4278_v32 = vld [vmem:[#allocation5 + $0x68] sm:$0xf] }
  0x42   :  { %793 = vmatpush.bf16.msrb.mxu2 %v4403_v43  ;;  %762 = vmatmul.bf16.vlgmr.msra.gmra.mxu3 %v6935_v4  ;;  %v6172_v33 = vld [vmem:[#allocation5 + $0x7c] sm:$0xf0]  ;;  %v4470_v34 = vld [vmem:[#allocation5 + $0x1e8] sm:$0xf]  ;;  %v4499_v35 = vor.u32 %v6223_v27, %v4496_v28  ;;  %v6169_v37 = vld [vmem:[#allocation5 + $0x6c] sm:$0xf] }
  0x43   :  { %806 = vmatpush.bf16.msrb.mxu3 %v4595_v47  ;;  %v6220_v36 = vld [vmem:[#allocation5 + $0x1fc] sm:$0xf0]  ;;  %v4280_v38 = vld [vmem:[#allocation5 + $0x80] sm:$0xf0]  ;;  %v6217_v39 = vld [vmem:[#allocation5 + $0x1ec] sm:$0xf]  ;;  %v4279_v41 = vor.u32 %v6172_v33, %v4278_v32 }
  0x44   :  { %768 = vmatpush.bf16.msrb.mxu0 %v4375_v53  ;;  %v4472_v40 = vld [vmem:[#allocation5 + $0x200] sm:$0xf0]  ;;  %v4471_v42 = vor.u32 %v6220_v36, %v4470_v34  ;;  %v4283_v43 = vor.u32 %v6169_v37, %v4280_v38  ;;  %v4254_v44 = vld [vmem:[#allocation5 + $0x38] sm:$0xf]  ;;  %v6166_v45 = vld [vmem:[#allocation5 + $0x4c] sm:$0xf0] }
  0x45   :  { %781 = vmatpush.bf16.msrb.mxu1 %v4567_v57  ;;  %v4446_v46 = vld [vmem:[#allocation5 + $0x1b8] sm:$0xf]  ;;  %v4475_v47 = vor.u32 %v6217_v39, %v4472_v40  ;;  %v6214_v48 = vld [vmem:[#allocation5 + $0x1cc] sm:$0xf0]  ;;  %v6163_v49 = vld [vmem:[#allocation5 + $0x3c] sm:$0xf]  ;;  %v4255_v53 = vor.u32 %v6166_v45, %v4254_v44 }
  0x46   :  { %794 = vmatpush.bf16.msrb.mxu2 %v4379_v58  ;;  %v4256_v50 = vld [vmem:[#allocation5 + $0x50] sm:$0xf0]  ;;  %v6211_v51 = vld [vmem:[#allocation5 + $0x1bc] sm:$0xf]  ;;  %v4230_v54 = vld [vmem:[#allocation5 + $0x8] sm:$0xf]  ;;  %v4447_v56 = vor.u32 %v6214_v48, %v4446_v46 }
  0x47   :  { %807 = vmatpush.bf16.msrb.mxu3 %v4571_v61  ;;  %v4448_v52 = vld [vmem:[#allocation5 + $0x1d0] sm:$0xf0]  ;;  %v6160_v55 = vld [vmem:[#allocation5 + $0x1c] sm:$0xf0]  ;;  %v4259_v57 = vor.u32 %v6163_v49, %v4256_v50  ;;  %v4422_v58 = vld [vmem:[#allocation5 + $0x188] sm:$0xf] }
  0x48   :  { %769 = vmatpush.bf16.msrb.mxu0 %v4351_v5  ;;  %v6208_v59 = vld [vmem:[#allocation5 + $0x19c] sm:$0xf0]  ;;  %v6157_v60 = vld [vmem:[#allocation5 + $0xc] sm:$0xf]  ;;  %v4451_v61 = vor.u32 %v6211_v51, %v4448_v52  ;;  %v4232_v63 = vld [vmem:[#allocation5 + $0x20] sm:$0xf0] }
  0x49   :  { %782 = vmatpush.bf16.msrb.mxu1 %v4543_v6  ;;  %v6205_v0 = vld [vmem:[#allocation5 + $0x18c] sm:$0xf]  ;;  %v4424_v1 = vld [vmem:[#allocation5 + $0x1a0] sm:$0xf0]  ;;  %v4406_v2 = vld [vmem:[#allocation5 + $0x160] sm:$0xf]  ;;  %v4231_v6 = vor.u32 %v6160_v55, %v4230_v54  ;;  %v4423_v10 = vor.u32 %v6208_v59, %v4422_v58 }
  0x4a   :  { %795 = vmatpush.bf16.msrb.mxu2 %v4355_v7  ;;  %v6203_v3 = vld [vmem:[#allocation5 + $0x174] sm:$0xf0]  ;;  %v4598_v5 = vld [vmem:[#allocation5 + $0x2e0] sm:$0xf]  ;;  %v6200_v8 = vld [vmem:[#allocation5 + $0x164] sm:$0xf]  ;;  %v4427_v14 = vor.u32 %v6205_v0, %v4424_v1 }
  0x4b   :  { %808 = vmatpush.bf16.msrb.mxu3 %v4547_v11  ;;  %v6251_v7 = vld [vmem:[#allocation5 + $0x2f4] sm:$0xf0]  ;;  %v4408_v9 = vld [vmem:[#allocation5 + $0x178] sm:$0xf0]  ;;  %v4235_v11 = vor.u32 %v6157_v60, %v4232_v63  ;;  %v6248_v12 = vld [vmem:[#allocation5 + $0x2e4] sm:$0xf]  ;;  %v4407_v15 = vor.u32 %v6203_v3, %v4406_v2 }
  0x4c   :  { %770 = vmatpush.bf16.msrb.mxu0 %v4327_v17  ;;  %v4600_v13 = vld [vmem:[#allocation5 + $0x2f8] sm:$0xf0]  ;;  %v4599_v16 = vor.u32 %v6251_v7, %v4598_v5  ;;  %v4411_v17 = vor.u32 %v6200_v8, %v4408_v9  ;;  %v4574_v20 = vld [vmem:[#allocation5 + $0x2b0] sm:$0xf]  ;;  %v6245_v22 = vld [vmem:[#allocation5 + $0x2c4] sm:$0xf0] }
  0x4d   :  { %783 = vmatpush.bf16.msrb.mxu1 %v4519_v18  ;;  %v4382_v18 = vld [vmem:[#allocation5 + $0x130] sm:$0xf]  ;;  %v4603_v21 = vor.u32 %v6248_v12, %v4600_v13  ;;  %v4384_v24 = vld [vmem:[#allocation5 + $0x148] sm:$0xf0]  ;;  %v6242_v25 = vld [vmem:[#allocation5 + $0x2b4] sm:$0xf]  ;;  %v4575_v28 = vor.u32 %v6245_v22, %v4574_v20 }
  0x4e   :  { %796 = vmatpush.bf16.msrb.mxu2 %v4331_v19  ;;  %v6197_v19 = vld [vmem:[#allocation5 + $0x144] sm:$0xf0]  ;;  %v4576_v26 = vld [vmem:[#allocation5 + $0x2c8] sm:$0xf0]  ;;  %v4550_v32 = vld [vmem:[#allocation5 + $0x280] sm:$0xf] }
  0x4f   :  { %809 = vmatpush.bf16.msrb.mxu3 %v4523_v23  ;;  %v6194_v23 = vld [vmem:[#allocation5 + $0x134] sm:$0xf]  ;;  %v4383_v27 = vor.u32 %v6197_v19, %v4382_v18  ;;  %v4579_v33 = vor.u32 %v6242_v25, %v4576_v26  ;;  %v6239_v34 = vld [vmem:[#allocation5 + $0x294] sm:$0xf0]  ;;  %v4360_v36 = vld [vmem:[#allocation5 + $0x118] sm:$0xf0] }
  0x50   :  { %771 = vmatpush.bf16.msrb.mxu0 %v4303_v29  ;;  %v4387_v29 = vor.u32 %v6194_v23, %v4384_v24  ;;  %v6236_v37 = vld [vmem:[#allocation5 + $0x284] sm:$0xf]  ;;  %v4552_v38 = vld [vmem:[#allocation5 + $0x298] sm:$0xf0]  ;;  %v4551_v40 = vor.u32 %v6239_v34, %v4550_v32  ;;  %v4526_v44 = vld [vmem:[#allocation5 + $0x250] sm:$0xf] }
  0x51   :  { %784 = vmatpush.bf16.msrb.mxu1 %v4495_v30  ;;  %v4358_v30 = vld [vmem:[#allocation5 + $0x100] sm:$0xf]  ;;  %v4555_v45 = vor.u32 %v6236_v37, %v4552_v38  ;;  %v6233_v46 = vld [vmem:[#allocation5 + $0x264] sm:$0xf0]  ;;  %v4336_v48 = vld [vmem:[#allocation5 + $0xe8] sm:$0xf0] }
  0x52   :  { %797 = vmatpush.bf16.msrb.mxu2 %v4307_v31  ;;  %v6191_v31 = vld [vmem:[#allocation5 + $0x114] sm:$0xf0]  ;;  %v6230_v49 = vld [vmem:[#allocation5 + $0x254] sm:$0xf]  ;;  %v4528_v50 = vld [vmem:[#allocation5 + $0x268] sm:$0xf0] }
  0x53   :  { %810 = vmatpush.bf16.msrb.mxu3 %v4499_v35  ;;  %v6188_v35 = vld [vmem:[#allocation5 + $0x104] sm:$0xf]  ;;  %v4359_v39 = vor.u32 %v6191_v31, %v4358_v30  ;;  %v4310_v52 = vld [vmem:[#allocation5 + $0xa0] sm:$0xf]  ;;  %v6179_v55 = vld [vmem:[#allocation5 + $0xb4] sm:$0xf0]  ;;  %v4531_v58 = vor.u32 %v6230_v49, %v4528_v50 }
  0x54   :  { %772 = vmatpush.bf16.msrb.mxu0 %v4279_v41  ;;  %v4363_v41 = vor.u32 %v6188_v35, %v4360_v36  ;;  %v6176_v59 = vld [vmem:[#allocation5 + $0xa4] sm:$0xf]  ;;  %v4312_v60 = vld [vmem:[#allocation5 + $0xb8] sm:$0xf0]  ;;  %v4311_v0 = vor.u32 %v6179_v55, %v4310_v52  ;;  %v4286_v3 = vld [vmem:[#allocation5 + $0x70] sm:$0xf] }
  0x55   :  { %785 = vmatpush.bf16.msrb.mxu1 %v4471_v42  ;;  %v4334_v42 = vld [vmem:[#allocation5 + $0xd0] sm:$0xf]  ;;  %v4504_v63 = vld [vmem:[#allocation5 + $0x238] sm:$0xf0]  ;;  %v4315_v2 = vor.u32 %v6176_v59, %v4312_v60  ;;  %v6173_v5 = vld [vmem:[#allocation5 + $0x84] sm:$0xf0] }
  0x56   :  { %798 = vmatpush.bf16.msrb.mxu2 %v4283_v43  ;;  %v6185_v43 = vld [vmem:[#allocation5 + $0xe4] sm:$0xf0]  ;;  %v6170_v9 = vld [vmem:[#allocation5 + $0x74] sm:$0xf]  ;;  %v4480_v12 = vld [vmem:[#allocation5 + $0x208] sm:$0xf0]  ;;  %v4287_v13 = vor.u32 %v6173_v5, %v4286_v3 }
  0x57   :  { %811 = vmatpush.bf16.msrb.mxu3 %v4475_v47  ;;  %v6182_v47 = vld [vmem:[#allocation5 + $0xd4] sm:$0xf]  ;;  %v4335_v51 = vor.u32 %v6185_v43, %v4334_v42  ;;  %v6221_v8 = vld [vmem:[#allocation5 + $0x204] sm:$0xf0]  ;;  %v4454_v18 = vld [vmem:[#allocation5 + $0x1c0] sm:$0xf] }
  0x58   :  { %773 = vmatpush.bf16.msrb.mxu0 %v4255_v53  ;;  %v4527_v53 = vor.u32 %v6233_v46, %v4526_v44  ;;  %v4339_v54 = vor.u32 %v6182_v47, %v4336_v48  ;;  %v6215_v20 = vld [vmem:[#allocation5 + $0x1d4] sm:$0xf0]  ;;  %v4264_v22 = vld [vmem:[#allocation5 + $0x58] sm:$0xf0]  ;;  %v6212_v23 = vld [vmem:[#allocation5 + $0x1c4] sm:$0xf] }
  0x59   :  { %786 = vmatpush.bf16.msrb.mxu1 %v4447_v56  ;;  %v4502_v56 = vld [vmem:[#allocation5 + $0x220] sm:$0xf]  ;;  %v4456_v24 = vld [vmem:[#allocation5 + $0x1d8] sm:$0xf0]  ;;  %v4238_v26 = vld [vmem:[#allocation5 + $0x10] sm:$0xf] }
  0x5a   :  { %799 = vmatpush.bf16.msrb.mxu2 %v4259_v57  ;;  %v6227_v57 = vld [vmem:[#allocation5 + $0x234] sm:$0xf0]  ;;  %v4430_v30 = vld [vmem:[#allocation5 + $0x190] sm:$0xf]  ;;  %v6209_v31 = vld [vmem:[#allocation5 + $0x1a4] sm:$0xf0]  ;;  %v4459_v32 = vor.u32 %v6212_v23, %v4456_v24 }
  0x5b   :  { %812 = vmatpush.bf16.msrb.mxu3 %v4451_v61  ;;  %v6224_v61 = vld [vmem:[#allocation5 + $0x224] sm:$0xf]  ;;  %v4503_v1 = vor.u32 %v6227_v57, %v4502_v56  ;;  %v4240_v34 = vld [vmem:[#allocation5 + $0x28] sm:$0xf0]  ;;  %v6206_v35 = vld [vmem:[#allocation5 + $0x194] sm:$0xf]  ;;  %v4431_v42 = vor.u32 %v6209_v31, %v4430_v30 }
  0x5c   :  { %774 = vmatpush.bf16.msrb.mxu0 %v4231_v6  ;;  %v4478_v6 = vld [vmem:[#allocation5 + $0x1f0] sm:$0xf]  ;;  %v4507_v7 = vor.u32 %v6224_v61, %v4504_v63  ;;  %v4432_v36 = vld [vmem:[#allocation5 + $0x1a8] sm:$0xf0]  ;;  %v4830_v37 = vld [vmem:[#allocation8 + $0x1c0] sm:$0xf] }
  0x5d   :  { %787 = vmatpush.bf16.msrb.mxu1 %v4423_v10  ;;  %v4288_v10 = vld [vmem:[#allocation5 + $0x88] sm:$0xf0]  ;;  %v6312_v38 = vld [vmem:[#allocation8 + $0x1dc] sm:$0xf0]  ;;  %v4435_v44 = vor.u32 %v6206_v35, %v4432_v36  ;;  %s4202_s18 = sshll.u32 %s7531_s8, 4  ;;  %s6869_s1 = smov [#allocation13]   ;;  %s4203_s18 = int_to_ptr.hbm [resolvable:$true] %s4202_s18 }
  0x5e   :  { %800 = vmatpush.bf16.msrb.mxu2 %v4235_v11  ;;  %v6218_v11 = vld [vmem:[#allocation5 + $0x1f4] sm:$0xf]  ;;  %v4798_v46 = vld [vmem:[#allocation8 + $0x180] sm:$0xf]  ;;  %s4189_s19 = sshll.u32 %s6869_s1, 4  ;;  %s4191_s21 = sshll.u32 %s7530_s7, 4  ;;  %s4190_s19 = int_to_ptr.vmem [resolvable:$true] %s4189_s19  ;;  %s4192_s21 = int_to_ptr.hbm [resolvable:$true] %s4191_s21 }
  0x5f   :  { %813 = vmatpush.bf16.msrb.mxu3 %v4427_v14  ;;  %775 = vmatmul.bf16.vlgmr.msrb.gmra.mxu0 %v6933_v62  ;;  %v4479_v14 = vor.u32 %v6221_v8, %v4478_v6  ;;  %v4483_v19 = vor.u32 %v6218_v11, %v4480_v12  ;;  %v5086_v47 = vld [vmem:[#allocation8 + $0x3c0] sm:$0xf]  ;;  %vm4182_vm15 = vcmask 74752  }
  0x60   :  { %819 = vmatpush.bf16.msra.mxu0 %v4407_v15  ;;  %788 = vmatmul.bf16.vlgmr.msrb.gmra.mxu1 %v6935_v4  ;;  %v4291_v15 = vor.u32 %v6170_v9, %v4288_v10  ;;  %v6376_v48 = vld [vmem:[#allocation8 + $0x3dc] sm:$0xf0] }
  0x61   :  { %832 = vmatpush.bf16.msra.mxu1 %v4599_v16  ;;  %801 = vmatmul.bf16.vlgmr.msrb.gmra.mxu2 %v6933_v62  ;;  %v4262_v16 = vld [vmem:[#allocation5 + $0x40] sm:$0xf]  ;;  %v6304_v50 = vld [vmem:[#allocation8 + $0x19c] sm:$0xf0]  ;;  %v5087_v55 = vor.u32 %v6376_v48, %v5086_v47 }
  0x62   :  { %845 = vmatpush.bf16.msra.mxu2 %v4411_v17  ;;  %814 = vmatmul.bf16.vlgmr.msrb.gmra.mxu3 %v6935_v4  ;;  %v6167_v17 = vld [vmem:[#allocation5 + $0x54] sm:$0xf0]  ;;  %v6504_v52 = vld [vmem:[#allocation8 + $0x7dc] sm:$0xf0]  ;;  %v4799_v56 = vor.u32 %v6304_v50, %v4798_v46 }
  0x63   :  { %858 = vmatpush.bf16.msra.mxu3 %v4603_v21  ;;  %v6164_v21 = vld [vmem:[#allocation5 + $0x44] sm:$0xf]  ;;  %v4263_v25 = vor.u32 %v6167_v17, %v4262_v16 }
  0x64   :  { %820 = vmatpush.bf16.msra.mxu0 %v4383_v27  ;;  %v4455_v27 = vor.u32 %v6215_v20, %v4454_v18  ;;  %v5054_v59 = vld [vmem:[#allocation8 + $0x380] sm:$0xf] }
  0x65   :  { %833 = vmatpush.bf16.msra.mxu1 %v4575_v28  ;;  %v4267_v28 = vor.u32 %v6164_v21, %v4264_v22  ;;  %v6368_v60 = vld [vmem:[#allocation8 + $0x39c] sm:$0xf0] }
  0x66   :  { %846 = vmatpush.bf16.msra.mxu2 %v4387_v29  ;;  %v6161_v29 = vld [vmem:[#allocation5 + $0x24] sm:$0xf0]  ;;  %v5055_v5 = vor.u32 %v6368_v60, %v5054_v59 }
  0x67   :  { %859 = vmatpush.bf16.msra.mxu3 %v4579_v33  ;;  %v6158_v33 = vld [vmem:[#allocation5 + $0x14] sm:$0xf]  ;;  %v6296_v63 = vld [vmem:[#allocation8 + $0x15c] sm:$0xf0] }
  0x68   :  { %821 = vmatpush.bf16.msra.mxu0 %v4359_v39  ;;  %v4239_v39 = vor.u32 %v6161_v29, %v4238_v26  ;;  %v4243_v43 = vor.u32 %v6158_v33, %v4240_v34  ;;  %v6424_v3 = vld [vmem:[#allocation8 + $0x55c] sm:$0xf0] }
  0x69   :  { %834 = vmatpush.bf16.msra.mxu1 %v4551_v40  ;;  %v5342_v40 = vld [vmem:[#allocation8 + $0x5c0] sm:$0xf] }
  0x6a   :  { %847 = vmatpush.bf16.msra.mxu2 %v4363_v41  ;;  %v6440_v41 = vld [vmem:[#allocation8 + $0x5dc] sm:$0xf0] }
  0x6b   :  { %860 = vmatpush.bf16.msra.mxu3 %v4555_v45  ;;  %v4831_v45 = vor.u32 %v6312_v38, %v4830_v37  ;;  %v5343_v49 = vor.u32 %v6440_v41, %v5342_v40  ;;  %v4734_v8 = vld [vmem:[#allocation8 + $0x100] sm:$0xf] }
  0x6c   :  { %822 = vmatpush.bf16.msra.mxu0 %v4335_v51  ;;  %v5598_v51 = vld [vmem:[#allocation8 + $0x7c0] sm:$0xf] }
  0x6d   :  { %835 = vmatpush.bf16.msra.mxu1 %v4527_v53  ;;  %v5310_v53 = vld [vmem:[#allocation8 + $0x580] sm:$0xf]  ;;  %v5599_v57 = vor.u32 %v6504_v52, %v5598_v51 }
  0x6e   :  { %848 = vmatpush.bf16.msra.mxu2 %v4339_v54  ;;  %v6432_v54 = vld [vmem:[#allocation8 + $0x59c] sm:$0xf0] }
  0x6f   :  { %861 = vmatpush.bf16.msra.mxu3 %v4531_v58  ;;  %v4766_v58 = vld [vmem:[#allocation8 + $0x140] sm:$0xf]  ;;  %v5311_v61 = vor.u32 %v6432_v54, %v5310_v53 }
  0x70   :  { %823 = vmatpush.bf16.msra.mxu0 %v4311_v0  ;;  %v5566_v0 = vld [vmem:[#allocation8 + $0x780] sm:$0xf]  ;;  %v4767_v6 = vor.u32 %v6296_v63, %v4766_v58 }
  0x71   :  { %836 = vmatpush.bf16.msra.mxu1 %v4503_v1  ;;  %v6496_v1 = vld [vmem:[#allocation8 + $0x79c] sm:$0xf0] }
  0x72   :  { %849 = vmatpush.bf16.msra.mxu2 %v4315_v2  ;;  %v5278_v2 = vld [vmem:[#allocation8 + $0x540] sm:$0xf] }
  0x73   :  { %862 = vmatpush.bf16.msra.mxu3 %v4507_v7  ;;  %v5567_v7 = vor.u32 %v6496_v1, %v5566_v0  ;;  %v5022_v9 = vld [vmem:[#allocation8 + $0x340] sm:$0xf]  ;;  %v5279_v11 = vor.u32 %v6424_v3, %v5278_v2  ;;  %v6308_v0 = vld [vmem:[#allocation8 + $0x1c4] sm:$0xf] }
  0x74   :  { %824 = vmatpush.bf16.msra.mxu0 %v4287_v13  ;;  %v6360_v10 = vld [vmem:[#allocation8 + $0x35c] sm:$0xf0]  ;;  %v4832_v2 = vld [vmem:[#allocation8 + $0x1e0] sm:$0xf0] }
  0x75   :  { %837 = vmatpush.bf16.msra.mxu1 %v4479_v14  ;;  %v6288_v12 = vld [vmem:[#allocation8 + $0x11c] sm:$0xf0]  ;;  %v5023_v16 = vor.u32 %v6360_v10, %v5022_v9 }
  0x76   :  { %850 = vmatpush.bf16.msra.mxu2 %v4291_v15  ;;  %v5534_v13 = vld [vmem:[#allocation8 + $0x740] sm:$0xf] }
  0x77   :  { %863 = vmatpush.bf16.msra.mxu3 %v4483_v19  ;;  %v6488_v14 = vld [vmem:[#allocation8 + $0x75c] sm:$0xf0] }
  0x78   :  { %825 = vmatpush.bf16.msra.mxu0 %v4263_v25  ;;  %v5246_v15 = vld [vmem:[#allocation8 + $0x500] sm:$0xf]  ;;  %v5535_v17 = vor.u32 %v6488_v14, %v5534_v13  ;;  %v6300_v13 = vld [vmem:[#allocation8 + $0x184] sm:$0xf] }
  0x79   :  { %838 = vmatpush.bf16.msra.mxu1 %v4455_v27  ;;  %v4702_v18 = vld [vmem:[#allocation8 + $0xc0] sm:$0xf] }
  0x7a   :  { %851 = vmatpush.bf16.msra.mxu2 %v4267_v28  ;;  %v4990_v19 = vld [vmem:[#allocation8 + $0x300] sm:$0xf] }
  0x7b   :  { %864 = vmatpush.bf16.msra.mxu3 %v4459_v32  ;;  %v6352_v20 = vld [vmem:[#allocation8 + $0x31c] sm:$0xf0] }
  0x7c   :  { %826 = vmatpush.bf16.msra.mxu0 %v4239_v39  ;;  %v6280_v22 = vld [vmem:[#allocation8 + $0xdc] sm:$0xf0]  ;;  %v4991_v27 = vor.u32 %v6352_v20, %v4990_v19 }
  0x7d   :  { %839 = vmatpush.bf16.msra.mxu1 %v4431_v42  ;;  %v5502_v23 = vld [vmem:[#allocation8 + $0x700] sm:$0xf]  ;;  %v4703_v28 = vor.u32 %v6280_v22, %v4702_v18 }
  0x7e   :  { %852 = vmatpush.bf16.msra.mxu2 %v4243_v43  ;;  %v6480_v24 = vld [vmem:[#allocation8 + $0x71c] sm:$0xf0] }
  0x7f   :  { %865 = vmatpush.bf16.msra.mxu3 %v4435_v44  ;;  %827 = vmatmul.bf16.vlgmr.msra.gmra.mxu0 %v6933_v62  ;;  %v5214_v25 = vld [vmem:[#allocation8 + $0x4c0] sm:$0xf]  ;;  %v5503_v29 = vor.u32 %v6480_v24, %v5502_v23  ;;  %v6372_v23 = vld [vmem:[#allocation8 + $0x3c4] sm:$0xf] }
  0x80   :  { %3187 = vmatpush.bf16.msrb.mxu0 %v4831_v45  ;;  %840 = vmatmul.bf16.vlgmr.msra.gmra.mxu1 %v6935_v4  ;;  %v6408_v26 = vld [vmem:[#allocation8 + $0x4dc] sm:$0xf0]  ;;  %v5088_v24 = vld [vmem:[#allocation8 + $0x3e0] sm:$0xf0] }
  0x81   :  { %853 = vmatmul.bf16.vlgmr.msra.gmra.mxu2 %v6933_v62  ;;  %3200 = vmatpush.bf16.msrb.mxu1 %v5087_v55  ;;  %v6416_v62 = vld [vmem:[#allocation8 + $0x51c] sm:$0xf0]  ;;  %v5215_v33 = vor.u32 %v6408_v26, %v5214_v25  ;;  %v5091_v26 = vor.u32 %v6372_v23, %v5088_v24  ;;  %v4928_v24 = vld [vmem:[#allocation8 + $0x2a0] sm:$0xf0] }
  0x82   :  { %3213 = vmatpush.bf16.msrb.mxu2 %v5343_v49  ;;  %866 = vmatmul.bf16.vlgmr.msra.gmra.mxu3 %v6935_v4  ;;  %v4735_v4 = vor.u32 %v6288_v12, %v4734_v8  ;;  %v5247_v21 = vor.u32 %v6416_v62, %v5246_v15  ;;  %v4670_v30 = vld [vmem:[#allocation8 + $0x80] sm:$0xf]  ;;  %v4800_v15 = vld [vmem:[#allocation8 + $0x1a0] sm:$0xf0] }
  0x83   :  { %3226 = vmatpush.bf16.msrb.mxu3 %v5599_v57  ;;  %v4958_v31 = vld [vmem:[#allocation8 + $0x2c0] sm:$0xf] }
  0x84   :  { %3188 = vmatpush.bf16.msrb.mxu0 %v4799_v56  ;;  %v6344_v32 = vld [vmem:[#allocation8 + $0x2dc] sm:$0xf0] }
  0x85   :  { %3201 = vmatpush.bf16.msrb.mxu1 %v5055_v5  ;;  %v6272_v34 = vld [vmem:[#allocation8 + $0x9c] sm:$0xf0]  ;;  %v4959_v39 = vor.u32 %v6344_v32, %v4958_v31  ;;  %v4768_v31 = vld [vmem:[#allocation8 + $0x160] sm:$0xf0] }
  0x86   :  { %3214 = vmatpush.bf16.msrb.mxu2 %v5311_v61  ;;  %v5470_v35 = vld [vmem:[#allocation8 + $0x6c0] sm:$0xf]  ;;  %v4671_v40 = vor.u32 %v6272_v34, %v4670_v30 }
  0x87   :  { %3227 = vmatpush.bf16.msrb.mxu3 %v5567_v7  ;;  %v6472_v36 = vld [vmem:[#allocation8 + $0x6dc] sm:$0xf0] }
  0x88   :  { %3189 = vmatpush.bf16.msrb.mxu0 %v4767_v6  ;;  %v5182_v37 = vld [vmem:[#allocation8 + $0x480] sm:$0xf]  ;;  %v5471_v41 = vor.u32 %v6472_v36, %v5470_v35  ;;  %v4835_v6 = vor.u32 %v6308_v0, %v4832_v2  ;;  %v6364_v36 = vld [vmem:[#allocation8 + $0x384] sm:$0xf]  ;;  %v6949_v0 = vld [vmem:[#allocation7] sm:$0x3f] }
  0x89   :  { %3202 = vmatpush.bf16.msrb.mxu1 %v5023_v16  ;;  %v6400_v38 = vld [vmem:[#allocation8 + $0x49c] sm:$0xf0] }
  0x8a   :  { %3215 = vmatpush.bf16.msrb.mxu2 %v5279_v11  ;;  %v4638_v42 = vld [vmem:[#allocation8 + $0x40] sm:$0xf]  ;;  %v5183_v45 = vor.u32 %v6400_v38, %v5182_v37  ;;  %v5056_v37 = vld [vmem:[#allocation8 + $0x3a0] sm:$0xf0] }
  0x8b   :  { %3228 = vmatpush.bf16.msrb.mxu3 %v5535_v17  ;;  %v4926_v43 = vld [vmem:[#allocation8 + $0x280] sm:$0xf] }
  0x8c   :  { %3190 = vmatpush.bf16.msrb.mxu0 %v4735_v4  ;;  %v6336_v44 = vld [vmem:[#allocation8 + $0x29c] sm:$0xf0]  ;;  %v4803_v4 = vor.u32 %v6300_v13, %v4800_v15  ;;  %v4960_v13 = vld [vmem:[#allocation8 + $0x2e0] sm:$0xf0] }
  0x8d   :  { %3203 = vmatpush.bf16.msrb.mxu1 %v4991_v27  ;;  %v6264_v46 = vld [vmem:[#allocation8 + $0x5c] sm:$0xf0]  ;;  %v4927_v51 = vor.u32 %v6336_v44, %v4926_v43 }
  0x8e   :  { %3216 = vmatpush.bf16.msrb.mxu2 %v5247_v21  ;;  %v5438_v47 = vld [vmem:[#allocation8 + $0x680] sm:$0xf]  ;;  %v4639_v52 = vor.u32 %v6264_v46, %v4638_v42  ;;  %v4736_v42 = vld [vmem:[#allocation8 + $0x120] sm:$0xf0] }
  0x8f   :  { %3229 = vmatpush.bf16.msrb.mxu3 %v5503_v29  ;;  %v6464_v48 = vld [vmem:[#allocation8 + $0x69c] sm:$0xf0]  ;;  %v6292_v29 = vld [vmem:[#allocation8 + $0x144] sm:$0xf] }
  0x90   :  { %3191 = vmatpush.bf16.msrb.mxu0 %v4703_v28  ;;  %v5150_v49 = vld [vmem:[#allocation8 + $0x440] sm:$0xf]  ;;  %v5439_v53 = vor.u32 %v6464_v48, %v5438_v47  ;;  %v4771_v34 = vor.u32 %v6292_v29, %v4768_v31  ;;  %v6356_v47 = vld [vmem:[#allocation8 + $0x344] sm:$0xf] }
  0x91   :  { %v6392_v50 = vld [vmem:[#allocation8 + $0x45c] sm:$0xf0]  ;;  %3204 = vmatpush.bf16.msrb.mxu1 %v4959_v39  ;;  %v5059_v39 = vor.u32 %v6364_v36, %v5056_v37  ;;  %v5024_v48 = vld [vmem:[#allocation8 + $0x360] sm:$0xf0] }
  0x92   :  { %3217 = vmatpush.bf16.msrb.mxu2 %v5215_v33  ;;  %v5151_v54 = vor.u32 %v6392_v50, %v5150_v49  ;;  %v4606_v55 = vld [vmem:[#allocation8] sm:$0xf]  ;;  %v6436_v36 = vld [vmem:[#allocation8 + $0x5c4] sm:$0xf] }
  0x93   :  { %3230 = vmatpush.bf16.msrb.mxu3 %v5471_v41  ;;  %v6256_v56 = vld [vmem:[#allocation8 + $0x1c] sm:$0xf0]  ;;  %v6284_v41 = vld [vmem:[#allocation8 + $0x104] sm:$0xf] }
  0x94   :  { %3192 = vmatpush.bf16.msrb.mxu0 %v4671_v40  ;;  %v5118_v57 = vld [vmem:[#allocation8 + $0x400] sm:$0xf]  ;;  %v4607_v59 = vor.u32 %v6256_v56, %v4606_v55  ;;  %v4739_v44 = vor.u32 %v6284_v41, %v4736_v42  ;;  %v5344_v37 = vld [vmem:[#allocation8 + $0x5e0] sm:$0xf0] }
  0x95   :  { %v6384_v58 = vld [vmem:[#allocation8 + $0x41c] sm:$0xf0]  ;;  %3205 = vmatpush.bf16.msrb.mxu1 %v4927_v51  ;;  %v6324_v41 = vld [vmem:[#allocation8 + $0x244] sm:$0xf] }
  0x96   :  { %3218 = vmatpush.bf16.msrb.mxu2 %v5183_v45  ;;  %v5119_v60 = vor.u32 %v6384_v58, %v5118_v57  ;;  %v5854_v61 = vld [vmem:[#allocation8 + $0x9c0] sm:$0xf]  ;;  %v6348_v58 = vld [vmem:[#allocation8 + $0x304] sm:$0xf] }
  0x97   :  { %3231 = vmatpush.bf16.msrb.mxu3 %v5439_v53  ;;  %v6568_v63 = vld [vmem:[#allocation8 + $0x9dc] sm:$0xf0]  ;;  %v6276_v53 = vld [vmem:[#allocation8 + $0xc4] sm:$0xf] }
  0x98   :  { %3193 = vmatpush.bf16.msrb.mxu0 %v4639_v52  ;;  %v5855_v1 = vor.u32 %v6568_v63, %v5854_v61  ;;  %v4894_v3 = vld [vmem:[#allocation8 + $0x240] sm:$0xf]  ;;  %v5027_v52 = vor.u32 %v6356_v47, %v5024_v48  ;;  %v6428_v48 = vld [vmem:[#allocation8 + $0x584] sm:$0xf] }
  0x99   :  { %v6328_v5 = vld [vmem:[#allocation8 + $0x25c] sm:$0xf0] }
  0x9a   :  { %3219 = vmatpush.bf16.msrb.mxu2 %v5151_v54  ;;  %v4895_v7 = vor.u32 %v6328_v5, %v4894_v3  ;;  %v5406_v8 = vld [vmem:[#allocation8 + $0x640] sm:$0xf]  ;;  %v4704_v54 = vld [vmem:[#allocation8 + $0xe0] sm:$0xf0] }
  0x9b   :  { %v6456_v9 = vld [vmem:[#allocation8 + $0x65c] sm:$0xf0]  ;;  %v6268_v3 = vld [vmem:[#allocation8 + $0x84] sm:$0xf] }
  0x9c   :  { %3194 = vmatpush.bf16.msrb.mxu0 %v4607_v59  ;;  %v5407_v10 = vor.u32 %v6456_v9, %v5406_v8  ;;  %3206 = vmatpush.bf16.msrb.mxu1 %v4895_v7  ;;  %v5822_v11 = vld [vmem:[#allocation8 + $0x980] sm:$0xf]  ;;  %v4992_v59 = vld [vmem:[#allocation8 + $0x320] sm:$0xf0] }
  0x9d   :  { %v6560_v12 = vld [vmem:[#allocation8 + $0x99c] sm:$0xf0]  ;;  %v4995_v63 = vor.u32 %v6348_v58, %v4992_v59  ;;  %v4864_v58 = vld [vmem:[#allocation8 + $0x220] sm:$0xf0] }
  0x9e   :  { %3220 = vmatpush.bf16.msrb.mxu2 %v5119_v60  ;;  %3232 = vmatpush.bf16.msrb.mxu3 %v5407_v10  ;;  %v5823_v14 = vor.u32 %v6560_v12, %v5822_v11  ;;  %v4862_v62 = vld [vmem:[#allocation8 + $0x200] sm:$0xf]  ;;  %v4707_v60 = vor.u32 %v6276_v53, %v4704_v54  ;;  %v6340_v10 = vld [vmem:[#allocation8 + $0x2c4] sm:$0xf]  ;;  %v223_v11 = vperm.slane %v6949_v0, 0 }
  0x9f   :  { %v6320_v16 = vld [vmem:[#allocation8 + $0x21c] sm:$0xf0]  ;;  %v6500_v59 = vld [vmem:[#allocation8 + $0x7c4] sm:$0xf] }
  0xa0   :  { %3239 = vmatpush.bf16.msra.mxu0 %v5855_v1  ;;  %v4863_v17 = vor.u32 %v6320_v16, %v4862_v62  ;;  %v5374_v18 = vld [vmem:[#allocation8 + $0x600] sm:$0xf]  ;;  %v6260_v16 = vld [vmem:[#allocation8 + $0x44] sm:$0xf] }
  0xa1   :  { %v6448_v19 = vld [vmem:[#allocation8 + $0x61c] sm:$0xf0] }
  0xa2   :  { %3265 = vmatpush.bf16.msra.mxu2 %v4835_v6  ;;  %v6110_v20 = vld [vmem:[#allocation8 + $0xbc0] sm:$0xf]  ;;  %v5375_v21 = vor.u32 %v6448_v19, %v5374_v18  ;;  %3207 = vmatpush.bf16.msrb.mxu1 %v4863_v17  ;;  %v4672_v6 = vld [vmem:[#allocation8 + $0xa0] sm:$0xf0] }
  0xa3   :  { %v6632_v22 = vld [vmem:[#allocation8 + $0xbdc] sm:$0xf0]  ;;  %v4675_v7 = vor.u32 %v6268_v3, %v4672_v6  ;;  %v4640_v17 = vld [vmem:[#allocation8 + $0x60] sm:$0xf0] }
  0xa4   :  { %3240 = vmatpush.bf16.msra.mxu0 %v5823_v14  ;;  %v6111_v25 = vor.u32 %v6632_v22, %v6110_v20  ;;  %v5790_v27 = vld [vmem:[#allocation8 + $0x940] sm:$0xf]  ;;  %3233 = vmatpush.bf16.msrb.mxu3 %v5375_v21  ;;  %v4963_v14 = vor.u32 %v6340_v10, %v4960_v13  ;;  %v4643_v18 = vor.u32 %v6260_v16, %v4640_v17  ;;  %v6332_v21 = vld [vmem:[#allocation8 + $0x284] sm:$0xf] }
  0xa5   :  { %v6552_v28 = vld [vmem:[#allocation8 + $0x95c] sm:$0xf0]  ;;  %v5280_v6 = vld [vmem:[#allocation8 + $0x560] sm:$0xf0] }
  0xa6   :  { %3266 = vmatpush.bf16.msra.mxu2 %v4803_v4  ;;  %v5791_v30 = vor.u32 %v6552_v28, %v5790_v27  ;;  %v6078_v32 = vld [vmem:[#allocation8 + $0xb80] sm:$0xf]  ;;  %3252 = vmatpush.bf16.msra.mxu1 %v6111_v25  ;;  %v224_v27 = vperm.slane %v6949_v0, 1  ;;  %v4931_v28 = vor.u32 %v6332_v21, %v4928_v24  ;;  %v5568_v10 = vld [vmem:[#allocation8 + $0x7a0] sm:$0xf0] }
  0xa7   :  { %v6624_v33 = vld [vmem:[#allocation8 + $0xb9c] sm:$0xf0]  ;;  %v5536_v16 = vld [vmem:[#allocation8 + $0x760] sm:$0xf0] }
  0xa8   :  { %3278 = vmatpush.bf16.msra.mxu3 %v5091_v26  ;;  %v6079_v35 = vor.u32 %v6624_v33, %v6078_v32  ;;  %v5758_v38 = vld [vmem:[#allocation8 + $0x900] sm:$0xf]  ;;  %3241 = vmatpush.bf16.msra.mxu0 %v5791_v30  ;;  %v6252_v32 = vld [vmem:[#allocation8 + $0x4] sm:$0xf] }
  0xa9   :  { %v6544_v40 = vld [vmem:[#allocation8 + $0x91c] sm:$0xf0]  ;;  %v4608_v33 = vld [vmem:[#allocation8 + $0x20] sm:$0xf0] }
  0xaa   :  { %3267 = vmatpush.bf16.msra.mxu2 %v4771_v34  ;;  %v5759_v43 = vor.u32 %v6544_v40, %v5758_v38  ;;  %v6046_v45 = vld [vmem:[#allocation8 + $0xb40] sm:$0xf]  ;;  %3253 = vmatpush.bf16.msra.mxu1 %v6079_v35  ;;  %v4611_v35 = vor.u32 %v6252_v32, %v4608_v33  ;;  %v5504_v21 = vld [vmem:[#allocation8 + $0x720] sm:$0xf0] }
  0xab   :  { %v6616_v46 = vld [vmem:[#allocation8 + $0xb5c] sm:$0xf0] }
  0xac   :  { %v5726_v49 = vld [vmem:[#allocation8 + $0x8c0] sm:$0xf]  ;;  %3279 = vmatpush.bf16.msra.mxu3 %v5059_v39  ;;  %v6047_v51 = vor.u32 %v6616_v46, %v6046_v45  ;;  %3242 = vmatpush.bf16.msra.mxu0 %v5759_v43  ;;  %v4896_v45 = vld [vmem:[#allocation8 + $0x260] sm:$0xf0]  ;;  %v5347_v46 = vor.u32 %v6436_v36, %v5344_v37 }
  0xad   :  { %v6536_v50 = vld [vmem:[#allocation8 + $0x8dc] sm:$0xf0]  ;;  %v4899_v47 = vor.u32 %v6324_v41, %v4896_v45  ;;  %v6460_v36 = vld [vmem:[#allocation8 + $0x684] sm:$0xf]  ;;  %v226_v41 = vperm.slane %v6949_v0, 3 }
  0xae   :  { %v6014_v55 = vld [vmem:[#allocation8 + $0xb00] sm:$0xf]  ;;  %v5727_v56 = vor.u32 %v6536_v50, %v5726_v49  ;;  %3268 = vmatpush.bf16.msra.mxu2 %v4739_v44  ;;  %3254 = vmatpush.bf16.msra.mxu1 %v6047_v51  ;;  %v5312_v51 = vld [vmem:[#allocation8 + $0x5a0] sm:$0xf0] }
  0xaf   :  { %v6608_v57 = vld [vmem:[#allocation8 + $0xb1c] sm:$0xf0]  ;;  %v5440_v37 = vld [vmem:[#allocation8 + $0x6a0] sm:$0xf0] }
  0xb0   :  { %3280 = vmatpush.bf16.msra.mxu3 %v5027_v52  ;;  %v6015_v61 = vor.u32 %v6608_v57, %v6014_v55  ;;  %3243 = vmatpush.bf16.msra.mxu0 %v5727_v56  ;;  %v5694_v1 = vld [vmem:[#allocation8 + $0x880] sm:$0xf]  ;;  %v6316_v57 = vld [vmem:[#allocation8 + $0x204] sm:$0xf] }
  0xb1   :  { %v6528_v2 = vld [vmem:[#allocation8 + $0x89c] sm:$0xf0]  ;;  %v6380_v45 = vld [vmem:[#allocation8 + $0x404] sm:$0xf] }
  0xb2   :  { %3269 = vmatpush.bf16.msra.mxu2 %v4707_v60  ;;  %v5695_v5 = vor.u32 %v6528_v2, %v5694_v1  ;;  %3255 = vmatpush.bf16.msra.mxu1 %v6015_v61  ;;  %v5982_v8 = vld [vmem:[#allocation8 + $0xac0] sm:$0xf]  ;;  %v4867_v61 = vor.u32 %v6316_v57, %v4864_v58  ;;  %v5315_v2 = vor.u32 %v6428_v48, %v5312_v51  ;;  %v6556_v48 = vld [vmem:[#allocation8 + $0x984] sm:$0xf] }
  0xb3   :  { %v6600_v9 = vld [vmem:[#allocation8 + $0xadc] sm:$0xf0] }
  0xb4   :  { %3281 = vmatpush.bf16.msra.mxu3 %v4995_v63  ;;  %3244 = vmatpush.bf16.msra.mxu0 %v5695_v5  ;;  %v5983_v12 = vor.u32 %v6600_v9, %v5982_v8  ;;  %v5662_v15 = vld [vmem:[#allocation8 + $0x840] sm:$0xf]  ;;  %v5600_v63 = vld [vmem:[#allocation8 + $0x7e0] sm:$0xf0] }
  0xb5   :  { %v6520_v62 = vld [vmem:[#allocation8 + $0x85c] sm:$0xf0]  ;;  %v5603_v3 = vor.u32 %v6500_v59, %v5600_v63  ;;  %v6420_v5 = vld [vmem:[#allocation8 + $0x544] sm:$0xf] }
  0xb6   :  { %3270 = vmatpush.bf16.msra.mxu2 %v4675_v7  ;;  %v5663_v4 = vor.u32 %v6520_v62, %v5662_v15  ;;  %3256 = vmatpush.bf16.msra.mxu1 %v5983_v12  ;;  %v5950_v19 = vld [vmem:[#allocation8 + $0xa80] sm:$0xf]  ;;  %v6492_v9 = vld [vmem:[#allocation8 + $0x784] sm:$0xf] }
  0xb7   :  { %v6592_v20 = vld [vmem:[#allocation8 + $0xa9c] sm:$0xf0]  ;;  %v5571_v13 = vor.u32 %v6492_v9, %v5568_v10  ;;  %v5248_v15 = vld [vmem:[#allocation8 + $0x520] sm:$0xf0] }
  0xb8   :  { %3282 = vmatpush.bf16.msra.mxu3 %v4963_v14  ;;  %3245 = vmatpush.bf16.msra.mxu0 %v5663_v4  ;;  %v5951_v23 = vor.u32 %v6592_v20, %v5950_v19  ;;  %v5630_v29 = vld [vmem:[#allocation8 + $0x800] sm:$0xf]  ;;  %v6412_v14 = vld [vmem:[#allocation8 + $0x504] sm:$0xf] }
  0xb9   :  { %v6512_v30 = vld [vmem:[#allocation8 + $0x81c] sm:$0xf0]  ;;  %v6484_v62 = vld [vmem:[#allocation8 + $0x744] sm:$0xf]  ;;  %v5251_v4 = vor.u32 %v6412_v14, %v5248_v15 }
  0xba   :  { %3271 = vmatpush.bf16.msra.mxu2 %v4643_v18  ;;  %v5631_v31 = vor.u32 %v6512_v30, %v5630_v29  ;;  %3257 = vmatpush.bf16.msra.mxu1 %v5951_v23  ;;  %v5918_v39 = vld [vmem:[#allocation8 + $0xa40] sm:$0xf]  ;;  %v5539_v17 = vor.u32 %v6484_v62, %v5536_v16  ;;  %v6404_v18 = vld [vmem:[#allocation8 + $0x4c4] sm:$0xf]  ;;  %v225_v23 = vperm.slane %v6949_v0, 2 }
  0xbb   :  { %v6584_v40 = vld [vmem:[#allocation8 + $0xa5c] sm:$0xf0]  ;;  %v5216_v19 = vld [vmem:[#allocation8 + $0x4e0] sm:$0xf0] }
  0xbc   :  { %v724_v22 = vpop.f32.mrf.mxu0  ;;  %3283 = vmatpush.bf16.msra.mxu3 %v4931_v28  ;;  %3246 = vmatpush.bf16.msra.mxu0 %v5631_v31  ;;  %v5919_v44 = vor.u32 %v6584_v40, %v5918_v39  ;;  %v5886_v52 = vld [vmem:[#allocation8 + $0xa00] sm:$0xf]  ;;  %v6476_v20 = vld [vmem:[#allocation8 + $0x704] sm:$0xf] }
  0xbd   :  { %v725_v25 = vadd.f32 %v724_v22, %v223_v11  ;;  %v737_v26 = vpop.f32.mrf.mxu1  ;;  %v6576_v53 = vld [vmem:[#allocation8 + $0xa1c] sm:$0xf0]  ;;  %v5283_v11 = vor.u32 %v6420_v5, %v5280_v6  ;;  %v5219_v22 = vor.u32 %v6404_v18, %v5216_v19  ;;  %v5507_v24 = vor.u32 %v6476_v20, %v5504_v21  ;;  %v5472_v28 = vld [vmem:[#allocation8 + $0x6e0] sm:$0xf0] }
  0xbe   :  { %3272 = vmatpush.bf16.msra.mxu2 %v4611_v35  ;;  %3258 = vmatpush.bf16.msra.mxu1 %v5919_v44  ;;  %v5887_v56 = vor.u32 %v6576_v53, %v5886_v52  ;;  %v5152_v35 = vld [vmem:[#allocation8 + $0x460] sm:$0xf0]  ;;  %v5443_v44 = vor.u32 %v6460_v36, %v5440_v37 }
  0xbf   :  { %v738_v34 = vadd.f32 %v737_v26, %v725_v25  ;;  %v6396_v25 = vld [vmem:[#allocation8 + $0x484] sm:$0xf] }
  0xc0   :  { %3284 = vmatpush.bf16.msra.mxu3 %v4899_v47  ;;  %v5184_v26 = vld [vmem:[#allocation8 + $0x4a0] sm:$0xf0] }
  0xc1   :  { %v871_v42 = vmax.f32 %v738_v34, 0.0  ;;  %v5187_v30 = vor.u32 %v6396_v25, %v5184_v26  ;;  %v6388_v34 = vld [vmem:[#allocation8 + $0x444] sm:$0xf] }
  0xc2   :  { %3259 = vmatpush.bf16.msra.mxu1 %v5887_v56  ;;  %v6564_v39 = vld [vmem:[#allocation8 + $0x9c4] sm:$0xf] }
  0xc3   :  { %v6953_v49 = vpack.c.bf16 %v871_v42, %v871_v42  ;;  %v5856_v40 = vld [vmem:[#allocation8 + $0x9e0] sm:$0xf0]  ;;  %v5155_v42 = vor.u32 %v6388_v34, %v5152_v35 }
  0xc4   :  { %v750_v38 = vpop.f32.mrf.mxu2  ;;  %v726_v55 = vpop.f32.mrf.mxu0  ;;  %3285 = vmatpush.bf16.msra.mxu3 %v4867_v61  ;;  %v5859_v47 = vor.u32 %v6564_v39, %v5856_v40  ;;  %v5824_v52 = vld [vmem:[#allocation8 + $0x9a0] sm:$0xf0] }
  0xc5   :  { %v751_v43 = vadd.f32 %v750_v38, %v224_v27  ;;  %v763_v50 = vpop.f32.mrf.mxu3  ;;  %3195 = vmatmul.bf16.vlgmr.msrb.gmra.mxu0 %v6953_v49  ;;  %v739_v60 = vpop.f32.mrf.mxu1  ;;  %v6468_v27 = vld [vmem:[#allocation8 + $0x6c4] sm:$0xf] }
  0xc6   :  { %3291 = vmatpush.bf16.msrb.mxu0 %v5347_v46  ;;  %v5475_v33 = vor.u32 %v6468_v27, %v5472_v28  ;;  %v5120_v46 = vld [vmem:[#allocation8 + $0x420] sm:$0xf0] }
  0xc7   :  { %v764_v54 = vadd.f32 %v763_v50, %v751_v43  ;;  %v6452_v53 = vld [vmem:[#allocation8 + $0x644] sm:$0xf]  ;;  %v5123_v58 = vor.u32 %v6380_v45, %v5120_v46  ;;  %v4838_v46 = vld [vmem:[#allocation8 + $0x1c8] sm:$0xf] }
  0xc8   :  { %v6628_v60 = vld [vmem:[#allocation8 + $0xbc4] sm:$0xf] }
  0xc9   :  { %v872_v1 = vmax.f32 %v764_v54, 0.0  ;;  %v5408_v54 = vld [vmem:[#allocation8 + $0x660] sm:$0xf0] }
  0xca   :  { %3292 = vmatpush.bf16.msrb.mxu0 %v5315_v2  ;;  %v5411_v61 = vor.u32 %v6452_v53, %v5408_v54  ;;  %v6112_v2 = vld [vmem:[#allocation8 + $0xbe0] sm:$0xf0]  ;;  %v228_v53 = vperm.slane %v6949_v0, 5 }
  0xcb   :  { %v6956_v7 = vpack.c.bf16 %v872_v1, %v872_v1  ;;  %v5827_v1 = vor.u32 %v6556_v48, %v5824_v52  ;;  %v5376_v5 = vld [vmem:[#allocation8 + $0x620] sm:$0xf0]  ;;  %v6115_v10 = vor.u32 %v6628_v60, %v6112_v2  ;;  %v6313_v48 = vld [vmem:[#allocation8 + $0x1e4] sm:$0xf0] }
  0xcc   :  { %v752_v8 = vpop.f32.mrf.mxu2  ;;  %v6548_v6 = vld [vmem:[#allocation8 + $0x944] sm:$0xf]  ;;  %v6441_v52 = vld [vmem:[#allocation8 + $0x5e4] sm:$0xf0] }
  0xcd   :  { %3208 = vmatmul.bf16.vlgmr.msrb.gmra.mxu1 %v6956_v7  ;;  %v765_v12 = vpop.f32.mrf.mxu3  ;;  %v5792_v8 = vld [vmem:[#allocation8 + $0x960] sm:$0xf0]  ;;  %v6305_v2 = vld [vmem:[#allocation8 + $0x1a4] sm:$0xf0] }
  0xce   :  { %3304 = vmatpush.bf16.msrb.mxu1 %v5603_v3  ;;  %3293 = vmatpush.bf16.msrb.mxu0 %v5283_v11  ;;  %v6444_v3 = vld [vmem:[#allocation8 + $0x604] sm:$0xf] }
  0xcf   :  { %v5379_v11 = vor.u32 %v6444_v3, %v5376_v5  ;;  %v6620_v14 = vld [vmem:[#allocation8 + $0xb84] sm:$0xf]  ;;  %v5318_v3 = vld [vmem:[#allocation8 + $0x588] sm:$0xf] }
  0xd0   :  { %v6080_v15 = vld [vmem:[#allocation8 + $0xba0] sm:$0xf0]  ;;  %v6433_v5 = vld [vmem:[#allocation8 + $0x5a4] sm:$0xf0] }
  0xd1   :  { %v6540_v16 = vld [vmem:[#allocation8 + $0x904] sm:$0xf]  ;;  %v6083_v18 = vor.u32 %v6620_v14, %v6080_v15  ;;  %v5094_v14 = vld [vmem:[#allocation8 + $0x3c8] sm:$0xf] }
  0xd2   :  { %3305 = vmatpush.bf16.msrb.mxu1 %v5571_v13  ;;  %3294 = vmatpush.bf16.msrb.mxu0 %v5251_v4  ;;  %v5795_v13 = vor.u32 %v6548_v6, %v5792_v8  ;;  %v5760_v4 = vld [vmem:[#allocation8 + $0x920] sm:$0xf0]  ;;  %v6377_v15 = vld [vmem:[#allocation8 + $0x3e4] sm:$0xf0] }
  0xd3   :  { %v5763_v19 = vor.u32 %v6540_v16, %v5760_v4  ;;  %v6612_v20 = vld [vmem:[#allocation8 + $0xb44] sm:$0xf]  ;;  %v5319_v4 = vor.u32 %v6433_v5, %v5318_v3  ;;  %v4678_v3 = vld [vmem:[#allocation8 + $0x88] sm:$0xf] }
  0xd4   :  { %v6048_v21 = vld [vmem:[#allocation8 + $0xb60] sm:$0xf0]  ;;  %v6273_v5 = vld [vmem:[#allocation8 + $0xa4] sm:$0xf0] }
  0xd5   :  { %v6604_v26 = vld [vmem:[#allocation8 + $0xb04] sm:$0xf] }
  0xd6   :  { %3306 = vmatpush.bf16.msrb.mxu1 %v5539_v17  ;;  %3295 = vmatpush.bf16.msrb.mxu0 %v5219_v22  ;;  %v6532_v22 = vld [vmem:[#allocation8 + $0x8c4] sm:$0xf] }
  0xd7   :  { %v6016_v27 = vld [vmem:[#allocation8 + $0xb20] sm:$0xf0] }
  0xd8   :  { %v6524_v28 = vld [vmem:[#allocation8 + $0x884] sm:$0xf] }
  0xd9   :  { %v5984_v34 = vld [vmem:[#allocation8 + $0xae0] sm:$0xf0] }
  0xda   :  { %3307 = vmatpush.bf16.msrb.mxu1 %v5507_v24  ;;  %3296 = vmatpush.bf16.msrb.mxu0 %v5187_v30  ;;  %v6051_v24 = vor.u32 %v6612_v20, %v6048_v21  ;;  %v6019_v30 = vor.u32 %v6604_v26, %v6016_v27  ;;  %v6516_v35 = vld [vmem:[#allocation8 + $0x844] sm:$0xf]  ;;  %v6297_v20 = vld [vmem:[#allocation8 + $0x164] sm:$0xf0] }
  0xdb   :  { %v5664_v36 = vld [vmem:[#allocation8 + $0x860] sm:$0xf0]  ;;  %v5286_v21 = vld [vmem:[#allocation8 + $0x548] sm:$0xf] }
  0xdc   :  { %v776_v29 = vpop.f32.mrf.mxu0  ;;  %v5632_v45 = vld [vmem:[#allocation8 + $0x820] sm:$0xf0]  ;;  %v5062_v27 = vld [vmem:[#allocation8 + $0x388] sm:$0xf] }
  0xdd   :  { %v777_v31 = vadd.f32 %v776_v29, %v225_v23  ;;  %v789_v32 = vpop.f32.mrf.mxu1  ;;  %v5728_v23 = vld [vmem:[#allocation8 + $0x8e0] sm:$0xf0] }
  0xde   :  { %3308 = vmatpush.bf16.msrb.mxu1 %v5475_v33  ;;  %3297 = vmatpush.bf16.msrb.mxu0 %v5155_v42  ;;  %v5731_v25 = vor.u32 %v6532_v22, %v5728_v23  ;;  %v5696_v29 = vld [vmem:[#allocation8 + $0x8a0] sm:$0xf0]  ;;  %v6425_v22 = vld [vmem:[#allocation8 + $0x564] sm:$0xf0] }
  0xdf   :  { %v790_v38 = vadd.f32 %v789_v32, %v777_v31  ;;  %v227_v31 = vperm.slane %v6949_v0, 4  ;;  %v5699_v32 = vor.u32 %v6524_v28, %v5696_v29  ;;  %v6596_v33 = vld [vmem:[#allocation8 + $0xac4] sm:$0xf]  ;;  %v6369_v28 = vld [vmem:[#allocation8 + $0x3a4] sm:$0xf0] }
  0xe0   :  { %v6588_v42 = vld [vmem:[#allocation8 + $0xa84] sm:$0xf] }
  0xe1   :  { %v873_v43 = vmax.f32 %v790_v38, 0.0  ;;  %v5987_v38 = vor.u32 %v6596_v33, %v5984_v34  ;;  %v6497_v33 = vld [vmem:[#allocation8 + $0x7a4] sm:$0xf0] }
  0xe2   :  { %3309 = vmatpush.bf16.msrb.mxu1 %v5443_v44  ;;  %3298 = vmatpush.bf16.msrb.mxu0 %v5123_v58  ;;  %v6508_v44 = vld [vmem:[#allocation8 + $0x804] sm:$0xf]  ;;  %v4742_v34 = vld [vmem:[#allocation8 + $0x108] sm:$0xf] }
  0xe3   :  { %v6961_v50 = vpack.c.bf16 %v873_v43, %v873_v43  ;;  %v5952_v43 = vld [vmem:[#allocation8 + $0xaa0] sm:$0xf0] }
  0xe4   :  { %v802_v51 = vpop.f32.mrf.mxu2  ;;  %v778_v57 = vpop.f32.mrf.mxu0  ;;  %v5955_v54 = vor.u32 %v6588_v42, %v5952_v43  ;;  %v5920_v58 = vld [vmem:[#allocation8 + $0xa60] sm:$0xf0]  ;;  %v5030_v42 = vld [vmem:[#allocation8 + $0x348] sm:$0xf] }
  0xe5   :  { %v803_v55 = vadd.f32 %v802_v51, %v226_v41  ;;  %v815_v56 = vpop.f32.mrf.mxu3  ;;  %v791_v59 = vpop.f32.mrf.mxu1  ;;  %3221 = vmatmul.bf16.vlgmr.msrb.gmra.mxu2 %v6961_v50  ;;  %v5667_v41 = vor.u32 %v6516_v35, %v5664_v36  ;;  %v5350_v51 = vld [vmem:[#allocation8 + $0x5c8] sm:$0xf]  ;;  %v6580_v57 = vld [vmem:[#allocation8 + $0xa44] sm:$0xf] }
  0xe6   :  { %3317 = vmatpush.bf16.msrb.mxu2 %v5859_v47  ;;  %3310 = vmatpush.bf16.msrb.mxu1 %v5411_v61  ;;  %v4839_v59 = vor.u32 %v6313_v48, %v4838_v46  ;;  %v5351_v60 = vor.u32 %v6441_v52, %v5350_v51  ;;  %v4806_v61 = vld [vmem:[#allocation8 + $0x188] sm:$0xf]  ;;  %v5923_v0 = vor.u32 %v6580_v57, %v5920_v58 }
  0xe7   :  { %v816_v63 = vadd.f32 %v815_v56, %v803_v55  ;;  %v5635_v56 = vor.u32 %v6508_v44, %v5632_v45  ;;  %v4807_v16 = vor.u32 %v6305_v2, %v4806_v61  ;;  %v6289_v36 = vld [vmem:[#allocation8 + $0x124] sm:$0xf0] }
  0xe8   :  { %v4743_v43 = vor.u32 %v6289_v36, %v4742_v34  ;;  %v6361_v45 = vld [vmem:[#allocation8 + $0x364] sm:$0xf0] }
  0xe9   :  { %v874_v9 = vmax.f32 %v816_v63, 0.0  ;;  %v5542_v46 = vld [vmem:[#allocation8 + $0x748] sm:$0xf] }
  0xea   :  { %3318 = vmatpush.bf16.msrb.mxu2 %v5827_v1  ;;  %3311 = vmatpush.bf16.msrb.mxu1 %v5379_v11  ;;  %v5222_v48 = vld [vmem:[#allocation8 + $0x4c8] sm:$0xf] }
  0xeb   :  { %v6964_v12 = vpack.c.bf16 %v874_v9, %v874_v9  ;;  %v6409_v51 = vld [vmem:[#allocation8 + $0x4e4] sm:$0xf0] }
  0xec   :  { %v804_v62 = vpop.f32.mrf.mxu2  ;;  %v4710_v52 = vld [vmem:[#allocation8 + $0xc8] sm:$0xf]  ;;  %v5223_v57 = vor.u32 %v6409_v51, %v5222_v48 }
  0xed   :  { %v817_v17 = vpop.f32.mrf.mxu3  ;;  %3234 = vmatmul.bf16.vlgmr.msrb.gmra.mxu3 %v6964_v12  ;;  %v6353_v58 = vld [vmem:[#allocation8 + $0x324] sm:$0xf0] }
  0xee   :  { %3330 = vmatpush.bf16.msrb.mxu3 %v6115_v10  ;;  %3319 = vmatpush.bf16.msrb.mxu2 %v5795_v13  ;;  %v6572_v10 = vld [vmem:[#allocation8 + $0xa04] sm:$0xf]  ;;  %v5606_v17 = vld [vmem:[#allocation8 + $0x7c8] sm:$0xf] }
  0xef   :  { %v5888_v13 = vld [vmem:[#allocation8 + $0xa20] sm:$0xf0]  ;;  %v6401_v2 = vld [vmem:[#allocation8 + $0x4a4] sm:$0xf0] }
  0xf0   :  { %v5862_v34 = vld [vmem:[#allocation8 + $0x9c8] sm:$0xf] }
  0xf1   :  { %v4902_v36 = vld [vmem:[#allocation8 + $0x248] sm:$0xf] }
  0xf2   :  { %3331 = vmatpush.bf16.msrb.mxu3 %v6083_v18  ;;  %3320 = vmatpush.bf16.msrb.mxu2 %v5763_v19  ;;  %v6505_v18 = vld [vmem:[#allocation8 + $0x7e4] sm:$0xf0] }
  0xf3   :  { %v4774_v19 = vld [vmem:[#allocation8 + $0x148] sm:$0xf]  ;;  %v5607_v26 = vor.u32 %v6505_v18, %v5606_v17 }
  0xf4   :  { %v6561_v51 = vld [vmem:[#allocation8 + $0x9a4] sm:$0xf0] }
  0xf5   :  { %3273 = vmatmul.bf16.vlgmr.msra.gmra.mxu2 %v6953_v49 }
  0xf6   :  { %3332 = vmatpush.bf16.msrb.mxu3 %v6051_v24  ;;  %3321 = vmatpush.bf16.msrb.mxu2 %v5731_v25  ;;  %v5891_v24 = vor.u32 %v6572_v10, %v5888_v13  ;;  %v5095_v25 = vor.u32 %v6377_v15, %v5094_v14  ;;  %v6345_v10 = vld [vmem:[#allocation8 + $0x2e4] sm:$0xf0]  ;;  %v4679_v14 = vor.u32 %v6273_v5, %v4678_v3 }
  0xf7   :  { %v6473_v13 = vld [vmem:[#allocation8 + $0x6e4] sm:$0xf0] }
  0xf8   :  { %v5158_v15 = vld [vmem:[#allocation8 + $0x448] sm:$0xf] }
  0xfa   :  { %3333 = vmatpush.bf16.msrb.mxu3 %v6019_v30  ;;  %3322 = vmatpush.bf16.msrb.mxu2 %v5699_v32  ;;  %v4775_v30 = vor.u32 %v6297_v20, %v4774_v19  ;;  %v5574_v32 = vld [vmem:[#allocation8 + $0x788] sm:$0xf] }
  0xfb   :  { %v4934_v19 = vld [vmem:[#allocation8 + $0x288] sm:$0xf] }
  0xfc   :  { %v828_v37 = vpop.f32.mrf.mxu0 }
  0xfd   :  { %v829_v39 = vadd.f32 %v828_v37, %v227_v31  ;;  %v841_v40 = vpop.f32.mrf.mxu1  ;;  %3286 = vmatmul.bf16.vlgmr.msra.gmra.mxu3 %v6956_v7  ;;  %v5287_v31 = vor.u32 %v6425_v22, %v5286_v21  ;;  %v5254_v37 = vld [vmem:[#allocation8 + $0x508] sm:$0xf] }
  0xfe   :  { %3334 = vmatpush.bf16.msrb.mxu3 %v5987_v38  ;;  %3323 = vmatpush.bf16.msrb.mxu2 %v5667_v41  ;;  %v6417_v38 = vld [vmem:[#allocation8 + $0x524] sm:$0xf0]  ;;  %v5575_v41 = vor.u32 %v6497_v33, %v5574_v32 }
  0xff   :  { %v842_v47 = vadd.f32 %v841_v40, %v829_v39  ;;  %v5063_v40 = vor.u32 %v6369_v28, %v5062_v27  ;;  %v5255_v44 = vor.u32 %v6417_v38, %v5254_v37  ;;  %v6337_v21 = vld [vmem:[#allocation8 + $0x2a4] sm:$0xf0] }
 0x100   :  { %v5446_v22 = vld [vmem:[#allocation8 + $0x688] sm:$0xf]  ;;  %v4935_v32 = vor.u32 %v6337_v21, %v4934_v19 }
 0x101   :  { %v875_v55 = vmax.f32 %v842_v47, 0.0  ;;  %v6489_v47 = vld [vmem:[#allocation8 + $0x764] sm:$0xf0] }
 0x102   :  { %3335 = vmatpush.bf16.msrb.mxu3 %v5955_v54  ;;  %3324 = vmatpush.bf16.msrb.mxu2 %v5635_v56  ;;  %v5031_v54 = vor.u32 %v6361_v45, %v5030_v42  ;;  %v4998_v56 = vld [vmem:[#allocation8 + $0x308] sm:$0xf]  ;;  %v6301_v45 = vld [vmem:[#allocation8 + $0x18c] sm:$0xf] }
 0x103   :  { %v6971_v63 = vpack.c.bf16 %v875_v55, %v875_v55  ;;  %v5543_v55 = vor.u32 %v6489_v47, %v5542_v46  ;;  %v6385_v27 = vld [vmem:[#allocation8 + $0x424] sm:$0xf0]  ;;  %v4808_v46 = vld [vmem:[#allocation8 + $0x1a8] sm:$0xf0] }
 0x104   :  { %v854_v1 = vpop.f32.mrf.mxu2  ;;  %v830_v9 = vpop.f32.mrf.mxu0  ;;  %v6257_v28 = vld [vmem:[#allocation8 + $0x24] sm:$0xf0] }
 0x105   :  { %v855_v6 = vadd.f32 %v854_v1, %v228_v53  ;;  %v867_v8 = vpop.f32.mrf.mxu3  ;;  %v843_v11 = vpop.f32.mrf.mxu1  ;;  %3247 = vmatmul.bf16.vlgmr.msra.gmra.mxu0 %v6971_v63  ;;  %3325 = vmatmul.bf16.vlgmr.msrb.gmra.mxu2 %v6971_v63  ;;  %v6281_v53 = vld [vmem:[#allocation8 + $0xe4] sm:$0xf0] }
 0x106   :  { %3343 = vmatpush.bf16.msra.mxu0 %v4839_v59  ;;  %3369 = vmatpush.bf16.msra.mxu2 %v5351_v60  ;;  %v5510_v59 = vld [vmem:[#allocation8 + $0x708] sm:$0xf]  ;;  %v4711_v61 = vor.u32 %v6281_v53, %v4710_v52 }
 0x107   :  { %v868_v62 = vadd.f32 %v867_v8, %v855_v6  ;;  %3336 = vmatpush.bf16.msrb.mxu3 %v5923_v0  ;;  %v6481_v60 = vld [vmem:[#allocation8 + $0x724] sm:$0xf0]  ;;  %v4999_v6 = vor.u32 %v6353_v58, %v4998_v56 }
 0x108   :  { %v5190_v1 = vld [vmem:[#allocation8 + $0x488] sm:$0xf]  ;;  %v5511_v8 = vor.u32 %v6481_v60, %v5510_v59  ;;  %v6373_v59 = vld [vmem:[#allocation8 + $0x3cc] sm:$0xf] }
 0x109   :  { %v876_v23 = vmax.f32 %v868_v62, 0.0  ;;  %v4966_v9 = vld [vmem:[#allocation8 + $0x2c8] sm:$0xf]  ;;  %v5191_v0 = vor.u32 %v6401_v2, %v5190_v1  ;;  %v5096_v60 = vld [vmem:[#allocation8 + $0x3e8] sm:$0xf0] }
 0x10a   :  { %3344 = vmatpush.bf16.msra.mxu0 %v4807_v16  ;;  %3370 = vmatpush.bf16.msra.mxu2 %v5319_v4  ;;  %v5478_v11 = vld [vmem:[#allocation8 + $0x6c8] sm:$0xf]  ;;  %v4967_v17 = vor.u32 %v6345_v10, %v4966_v9  ;;  %v6293_v1 = vld [vmem:[#allocation8 + $0x14c] sm:$0xf] }
 0x10b   :  { %v6975_v29 = vpack.c.bf16 %v876_v23, %v876_v23  ;;  %3337 = vmatpush.bf16.msrb.mxu3 %v5891_v24  ;;  %v6393_v62 = vld [vmem:[#allocation8 + $0x464] sm:$0xf0]  ;;  %v5479_v18 = vor.u32 %v6473_v13, %v5478_v11  ;;  %v4776_v2 = vld [vmem:[#allocation8 + $0x168] sm:$0xf0] }
 0x10c   :  { %v856_v35 = vpop.f32.mrf.mxu2  ;;  %v4646_v16 = vld [vmem:[#allocation8 + $0x48] sm:$0xf]  ;;  %v5159_v20 = vor.u32 %v6393_v62, %v5158_v15  ;;  %v4779_v11 = vor.u32 %v6293_v1, %v4776_v2  ;;  %v5064_v15 = vld [vmem:[#allocation8 + $0x3a8] sm:$0xf0] }
 0x10d   :  { %v869_v39 = vpop.f32.mrf.mxu3  ;;  %3260 = vmatmul.bf16.vlgmr.msra.gmra.mxu1 %v6975_v29  ;;  %v6265_v4 = vld [vmem:[#allocation8 + $0x64] sm:$0xf0]  ;;  %v6333_v2 = vld [vmem:[#allocation8 + $0x28c] sm:$0xf] }
 0x10e   :  { %3356 = vmatpush.bf16.msra.mxu1 %v5095_v25  ;;  %3345 = vmatpush.bf16.msra.mxu0 %v4775_v30  ;;  %v6465_v23 = vld [vmem:[#allocation8 + $0x6a4] sm:$0xf0]  ;;  %v4647_v24 = vor.u32 %v6265_v4, %v4646_v16  ;;  %v6309_v30 = vld [vmem:[#allocation8 + $0x1cc] sm:$0xf] }
 0x10f   :  { %3382 = vmatpush.bf16.msra.mxu3 %v5607_v26  ;;  %3371 = vmatpush.bf16.msra.mxu2 %v5287_v31  ;;  %v4614_v25 = vld [vmem:[#allocation8 + $0x8] sm:$0xf]  ;;  %v4840_v31 = vld [vmem:[#allocation8 + $0x1e8] sm:$0xf0]  ;;  %v5447_v33 = vor.u32 %v6465_v23, %v5446_v22 }
 0x110   :  { %3338 = vmatmul.bf16.vlgmr.msrb.gmra.mxu3 %v6975_v29  ;;  %v5126_v26 = vld [vmem:[#allocation8 + $0x408] sm:$0xf]  ;;  %v4843_v42 = vor.u32 %v6309_v30, %v4840_v31  ;;  %v6285_v16 = vld [vmem:[#allocation8 + $0x10c] sm:$0xf] }
 0x111   :  { %v6569_v35 = vld [vmem:[#allocation8 + $0x9e4] sm:$0xf0]  ;;  %v5127_v37 = vor.u32 %v6385_v27, %v5126_v26  ;;  %v4744_v4 = vld [vmem:[#allocation8 + $0x128] sm:$0xf0] }
 0x112   :  { %3357 = vmatpush.bf16.msra.mxu1 %v5063_v40  ;;  %3346 = vmatpush.bf16.msra.mxu0 %v4743_v43  ;;  %v6329_v38 = vld [vmem:[#allocation8 + $0x264] sm:$0xf0]  ;;  %v5863_v43 = vor.u32 %v6569_v35, %v5862_v34  ;;  %v4747_v22 = vor.u32 %v6285_v16, %v4744_v4  ;;  %v6277_v27 = vld [vmem:[#allocation8 + $0xcc] sm:$0xf] }
 0x113   :  { %3383 = vmatpush.bf16.msra.mxu3 %v5575_v41  ;;  %3372 = vmatpush.bf16.msra.mxu2 %v5255_v44  ;;  %v5414_v39 = vld [vmem:[#allocation8 + $0x648] sm:$0xf]  ;;  %v4615_v41 = vor.u32 %v6257_v28, %v4614_v25  ;;  %v4903_v47 = vor.u32 %v6329_v38, %v4902_v36  ;;  %v5032_v25 = vld [vmem:[#allocation8 + $0x368] sm:$0xf0] }
 0x114   :  { %v6457_v40 = vld [vmem:[#allocation8 + $0x664] sm:$0xf0]  ;;  %v4712_v28 = vld [vmem:[#allocation8 + $0xe8] sm:$0xf0] }
 0x115   :  { %3299 = vmatmul.bf16.vlgmr.msrb.gmra.mxu0 %v6961_v50  ;;  %v5830_v44 = vld [vmem:[#allocation8 + $0x988] sm:$0xf]  ;;  %v5415_v48 = vor.u32 %v6457_v40, %v5414_v39  ;;  %v4715_v35 = vor.u32 %v6277_v27, %v4712_v28  ;;  %v5000_v38 = vld [vmem:[#allocation8 + $0x328] sm:$0xf0] }
 0x116   :  { %3358 = vmatpush.bf16.msra.mxu1 %v5031_v54  ;;  %3347 = vmatpush.bf16.msra.mxu0 %v4711_v61  ;;  %v4870_v52 = vld [vmem:[#allocation8 + $0x208] sm:$0xf]  ;;  %v5831_v61 = vor.u32 %v6561_v51, %v5830_v44  ;;  %v6269_v40 = vld [vmem:[#allocation8 + $0x8c] sm:$0xf] }
 0x117   :  { %3384 = vmatpush.bf16.msra.mxu3 %v5543_v55  ;;  %3373 = vmatpush.bf16.msra.mxu2 %v5223_v57  ;;  %v6321_v53 = vld [vmem:[#allocation8 + $0x224] sm:$0xf0]  ;;  %v4811_v57 = vor.u32 %v6301_v45, %v4808_v46  ;;  %v6341_v51 = vld [vmem:[#allocation8 + $0x2cc] sm:$0xf] }
 0x118   :  { %v5382_v54 = vld [vmem:[#allocation8 + $0x608] sm:$0xf]  ;;  %v4871_v3 = vor.u32 %v6321_v53, %v4870_v52  ;;  %v4968_v52 = vld [vmem:[#allocation8 + $0x2e8] sm:$0xf0] }
 0x119   :  { %v6449_v55 = vld [vmem:[#allocation8 + $0x624] sm:$0xf0]  ;;  %v5320_v28 = vld [vmem:[#allocation8 + $0x5a8] sm:$0xf0] }
 0x11a   :  { %3359 = vmatpush.bf16.msra.mxu1 %v4999_v6  ;;  %3348 = vmatpush.bf16.msra.mxu0 %v4679_v14  ;;  %v6118_v56 = vld [vmem:[#allocation8 + $0xbc8] sm:$0xf]  ;;  %v5383_v5 = vor.u32 %v6449_v55, %v5382_v54  ;;  %v6365_v14 = vld [vmem:[#allocation8 + $0x38c] sm:$0xf] }
 0x11b   :  { %3385 = vmatpush.bf16.msra.mxu3 %v5511_v8  ;;  %3374 = vmatpush.bf16.msra.mxu2 %v5191_v0  ;;  %v6633_v58 = vld [vmem:[#allocation8 + $0xbe4] sm:$0xf0]  ;;  %v5099_v0 = vor.u32 %v6373_v59, %v5096_v60  ;;  %v6261_v54 = vld [vmem:[#allocation8 + $0x4c] sm:$0xf]  ;;  %v4971_v59 = vor.u32 %v6341_v51, %v4968_v52 }
 0x11c   :  { %v5798_v6 = vld [vmem:[#allocation8 + $0x948] sm:$0xf]  ;;  %v6119_v9 = vor.u32 %v6633_v58, %v6118_v56  ;;  %v4648_v55 = vld [vmem:[#allocation8 + $0x68] sm:$0xf0] }
 0x11d   :  { %3312 = vmatmul.bf16.vlgmr.msrb.gmra.mxu1 %v6964_v12  ;;  %v6553_v8 = vld [vmem:[#allocation8 + $0x964] sm:$0xf0]  ;;  %v5576_v52 = vld [vmem:[#allocation8 + $0x7a8] sm:$0xf0] }
 0x11e   :  { %3360 = vmatpush.bf16.msra.mxu1 %v4967_v17  ;;  %3349 = vmatpush.bf16.msra.mxu0 %v4647_v24  ;;  %v6086_v10 = vld [vmem:[#allocation8 + $0xb88] sm:$0xf]  ;;  %v5799_v62 = vor.u32 %v6553_v8, %v5798_v6  ;;  %v6357_v24 = vld [vmem:[#allocation8 + $0x34c] sm:$0xf] }
 0x11f   :  { %3386 = vmatpush.bf16.msra.mxu3 %v5479_v18  ;;  %3375 = vmatpush.bf16.msra.mxu2 %v5159_v20  ;;  %v6625_v13 = vld [vmem:[#allocation8 + $0xba4] sm:$0xf0]  ;;  %v5067_v20 = vor.u32 %v6365_v14, %v5064_v15  ;;  %v6253_v8 = vld [vmem:[#allocation8 + $0xc] sm:$0xf] }
 0x120   :  { %v5766_v17 = vld [vmem:[#allocation8 + $0x908] sm:$0xf]  ;;  %v6087_v19 = vor.u32 %v6625_v13, %v6086_v10  ;;  %v6565_v10 = vld [vmem:[#allocation8 + $0x9cc] sm:$0xf] }
 0x121   :  { %v6545_v18 = vld [vmem:[#allocation8 + $0x924] sm:$0xf0]  ;;  %v6437_v15 = vld [vmem:[#allocation8 + $0x5cc] sm:$0xf] }
 0x122   :  { %3361 = vmatpush.bf16.msra.mxu1 %v4935_v32  ;;  %3350 = vmatpush.bf16.msra.mxu0 %v4615_v41  ;;  %v6054_v21 = vld [vmem:[#allocation8 + $0xb48] sm:$0xf]  ;;  %v5767_v26 = vor.u32 %v6545_v18, %v5766_v17  ;;  %v4680_v41 = vld [vmem:[#allocation8 + $0xa8] sm:$0xf0] }
 0x123   :  { %3387 = vmatpush.bf16.msra.mxu3 %v5447_v33  ;;  %3376 = vmatpush.bf16.msra.mxu2 %v5127_v37  ;;  %v6617_v23 = vld [vmem:[#allocation8 + $0xb64] sm:$0xf0]  ;;  %v5035_v33 = vor.u32 %v6357_v24, %v5032_v25  ;;  %v6349_v37 = vld [vmem:[#allocation8 + $0x30c] sm:$0xf] }
 0x124   :  { %v5734_v30 = vld [vmem:[#allocation8 + $0x8c8] sm:$0xf]  ;;  %v6055_v32 = vor.u32 %v6617_v23, %v6054_v21  ;;  %v5003_v45 = vor.u32 %v6349_v37, %v5000_v38  ;;  %v6325_v18 = vld [vmem:[#allocation8 + $0x24c] sm:$0xf] }
 0x125   :  { %3351 = vmatmul.bf16.vlgmr.msra.gmra.mxu0 %v6953_v49  ;;  %v6537_v31 = vld [vmem:[#allocation8 + $0x8e4] sm:$0xf0]  ;;  %v6429_v23 = vld [vmem:[#allocation8 + $0x58c] sm:$0xf] }
 0x126   :  { %3395 = vmatpush.bf16.msrb.mxu0 %v5863_v43  ;;  %3362 = vmatpush.bf16.msra.mxu1 %v4903_v47  ;;  %v6022_v34 = vld [vmem:[#allocation8 + $0xb08] sm:$0xf]  ;;  %v5735_v39 = vor.u32 %v6537_v31, %v5734_v30  ;;  %v4683_v47 = vor.u32 %v6269_v40, %v4680_v41  ;;  %v6557_v24 = vld [vmem:[#allocation8 + $0x98c] sm:$0xf] }
 0x127   :  { %3421 = vmatpush.bf16.msrb.mxu2 %v4843_v42  ;;  %3388 = vmatpush.bf16.msra.mxu3 %v5415_v48  ;;  %v6609_v36 = vld [vmem:[#allocation8 + $0xb24] sm:$0xf0]  ;;  %v5832_v25 = vld [vmem:[#allocation8 + $0x9a8] sm:$0xf0] }
 0x128   :  { %3377 = vmatmul.bf16.vlgmr.msra.gmra.mxu2 %v6961_v50  ;;  %v5702_v42 = vld [vmem:[#allocation8 + $0x888] sm:$0xf]  ;;  %v6023_v44 = vor.u32 %v6609_v36, %v6022_v34  ;;  %v6501_v34 = vld [vmem:[#allocation8 + $0x7cc] sm:$0xf] }
 0x129   :  { %v6529_v43 = vld [vmem:[#allocation8 + $0x8a4] sm:$0xf0]  ;;  %v5608_v36 = vld [vmem:[#allocation8 + $0x7e8] sm:$0xf0] }
 0x12a   :  { %3396 = vmatpush.bf16.msrb.mxu0 %v5831_v61  ;;  %3363 = vmatpush.bf16.msra.mxu1 %v4871_v3  ;;  %v5990_v46 = vld [vmem:[#allocation8 + $0xac8] sm:$0xf]  ;;  %v5703_v53 = vor.u32 %v6529_v43, %v5702_v42  ;;  %v4651_v61 = vor.u32 %v6261_v54, %v4648_v55  ;;  %v4936_v3 = vld [vmem:[#allocation8 + $0x2a8] sm:$0xf0] }
 0x12b   :  { %3422 = vmatpush.bf16.msrb.mxu2 %v4811_v57  ;;  %3389 = vmatpush.bf16.msra.mxu3 %v5383_v5  ;;  %v6601_v48 = vld [vmem:[#allocation8 + $0xae4] sm:$0xf0]  ;;  %v4939_v14 = vor.u32 %v6333_v2, %v4936_v3  ;;  %v6629_v37 = vld [vmem:[#allocation8 + $0xbcc] sm:$0xf] }
 0x12c   :  { %v5670_v56 = vld [vmem:[#allocation8 + $0x848] sm:$0xf]  ;;  %v5991_v58 = vor.u32 %v6601_v48, %v5990_v46  ;;  %v6120_v38 = vld [vmem:[#allocation8 + $0xbe8] sm:$0xf0] }
 0x12d   :  { %3364 = vmatmul.bf16.vlgmr.msra.gmra.mxu1 %v6956_v7  ;;  %v6521_v57 = vld [vmem:[#allocation8 + $0x864] sm:$0xf0]  ;;  %v6549_v40 = vld [vmem:[#allocation8 + $0x94c] sm:$0xf] }
 0x12e   :  { %3408 = vmatpush.bf16.msrb.mxu1 %v6119_v9  ;;  %3390 = vmatmul.bf16.vlgmr.msra.gmra.mxu3 %v6964_v12  ;;  %v5958_v60 = vld [vmem:[#allocation8 + $0xa88] sm:$0xf]  ;;  %v5671_v5 = vor.u32 %v6521_v57, %v5670_v56  ;;  %v4616_v9 = vld [vmem:[#allocation8 + $0x28] sm:$0xf0] }
 0x12f   :  { %3434 = vmatpush.bf16.msrb.mxu3 %v5099_v0  ;;  %3423 = vmatpush.bf16.msrb.mxu2 %v4779_v11  ;;  %v6593_v1 = vld [vmem:[#allocation8 + $0xaa4] sm:$0xf0]  ;;  %v5864_v11 = vld [vmem:[#allocation8 + $0x9e8] sm:$0xf0]  ;;  %v4619_v4 = vor.u32 %v6253_v8, %v4616_v9 }
 0x130   :  { %3397 = vmatpush.bf16.msrb.mxu0 %v5799_v62  ;;  %v5638_v6 = vld [vmem:[#allocation8 + $0x808] sm:$0xf]  ;;  %v5959_v13 = vor.u32 %v6593_v1, %v5958_v60  ;;  %v5352_v62 = vld [vmem:[#allocation8 + $0x5e8] sm:$0xf0]  ;;  %v5867_v21 = vor.u32 %v6565_v10, %v5864_v11 }
 0x131   :  { %v6513_v0 = vld [vmem:[#allocation8 + $0x824] sm:$0xf0]  ;;  %v5800_v41 = vld [vmem:[#allocation8 + $0x968] sm:$0xf0] }
 0x132   :  { %3409 = vmatpush.bf16.msrb.mxu1 %v6087_v19  ;;  %v5926_v16 = vld [vmem:[#allocation8 + $0xa48] sm:$0xf]  ;;  %v4904_v19 = vld [vmem:[#allocation8 + $0x268] sm:$0xf0]  ;;  %v5803_v51 = vor.u32 %v6549_v40, %v5800_v41 }
 0x133   :  { %3435 = vmatpush.bf16.msrb.mxu3 %v5067_v20  ;;  %3424 = vmatpush.bf16.msrb.mxu2 %v4747_v22  ;;  %v6585_v17 = vld [vmem:[#allocation8 + $0xa64] sm:$0xf0]  ;;  %v5639_v20 = vor.u32 %v6513_v0, %v5638_v6  ;;  %v5355_v22 = vor.u32 %v6437_v15, %v5352_v62  ;;  %v4907_v27 = vor.u32 %v6325_v18, %v4904_v19  ;;  %v6421_v46 = vld [vmem:[#allocation8 + $0x54c] sm:$0xf] }
 0x134   :  { %3398 = vmatpush.bf16.msrb.mxu0 %v5767_v26  ;;  %v5927_v26 = vor.u32 %v6585_v17, %v5926_v16  ;;  %v5894_v30 = vld [vmem:[#allocation8 + $0xa08] sm:$0xf]  ;;  %v6493_v48 = vld [vmem:[#allocation8 + $0x78c] sm:$0xf] }
 0x135   :  { %v6577_v31 = vld [vmem:[#allocation8 + $0xa24] sm:$0xf0]  ;;  %v6088_v54 = vld [vmem:[#allocation8 + $0xba8] sm:$0xf0] }
 0x136   :  { %3410 = vmatpush.bf16.msrb.mxu1 %v6055_v32  ;;  %v6317_v32 = vld [vmem:[#allocation8 + $0x20c] sm:$0xf]  ;;  %v5895_v42 = vor.u32 %v6577_v31, %v5894_v30 }
 0x137   :  { %3436 = vmatpush.bf16.msrb.mxu3 %v5035_v33  ;;  %3425 = vmatpush.bf16.msrb.mxu2 %v4715_v35  ;;  %v4872_v33 = vld [vmem:[#allocation8 + $0x228] sm:$0xf0]  ;;  %v5835_v35 = vor.u32 %v6557_v24, %v5832_v25 }
 0x138   :  { %3399 = vmatpush.bf16.msrb.mxu0 %v5735_v39  ;;  %v5323_v39 = vor.u32 %v6429_v23, %v5320_v28  ;;  %v4875_v43 = vor.u32 %v6317_v32, %v4872_v33  ;;  %v6541_v55 = vld [vmem:[#allocation8 + $0x90c] sm:$0xf] }
 0x139   :  { %v5768_v56 = vld [vmem:[#allocation8 + $0x928] sm:$0xf0] }
 0x13a   :  { %3411 = vmatpush.bf16.msrb.mxu1 %v6023_v44  ;;  %v5611_v44 = vor.u32 %v6501_v34, %v5608_v36  ;;  %v6413_v60 = vld [vmem:[#allocation8 + $0x50c] sm:$0xf]  ;;  %v5771_v2 = vor.u32 %v6541_v55, %v5768_v56 }
 0x13b   :  { %3437 = vmatpush.bf16.msrb.mxu3 %v5003_v45  ;;  %3426 = vmatpush.bf16.msrb.mxu2 %v4683_v47  ;;  %v6123_v45 = vor.u32 %v6629_v37, %v6120_v38  ;;  %v5288_v47 = vld [vmem:[#allocation8 + $0x568] sm:$0xf0] }
 0x13c   :  { %3400 = vmatpush.bf16.msrb.mxu0 %v5703_v53  ;;  %v6621_v53 = vld [vmem:[#allocation8 + $0xb8c] sm:$0xf]  ;;  %v5291_v57 = vor.u32 %v6421_v46, %v5288_v47 }
 0x13d   :  { %v6485_v1 = vld [vmem:[#allocation8 + $0x74c] sm:$0xf] }
 0x13e   :  { %3412 = vmatpush.bf16.msrb.mxu1 %v5991_v58  ;;  %v5579_v58 = vor.u32 %v6493_v48, %v5576_v52  ;;  %v5544_v3 = vld [vmem:[#allocation8 + $0x768] sm:$0xf0]  ;;  %v6442_v52 = vld [vmem:[#allocation8 + $0x5ec] sm:$0xf0] }
 0x13f   :  { %3438 = vmatpush.bf16.msrb.mxu3 %v4971_v59  ;;  %3427 = vmatpush.bf16.msrb.mxu2 %v4651_v61  ;;  %v6091_v59 = vor.u32 %v6621_v53, %v6088_v54  ;;  %v5256_v61 = vld [vmem:[#allocation8 + $0x528] sm:$0xf0]  ;;  %v5547_v10 = vor.u32 %v6485_v1, %v5544_v3 }
 0x140   :  { %3401 = vmatpush.bf16.msrb.mxu0 %v5671_v5  ;;  %v6613_v5 = vld [vmem:[#allocation8 + $0xb4c] sm:$0xf]  ;;  %v5259_v0 = vor.u32 %v6413_v60, %v5256_v61  ;;  %v6314_v60 = vld [vmem:[#allocation8 + $0x1ec] sm:$0xf0] }
 0x141   :  { %v6056_v6 = vld [vmem:[#allocation8 + $0xb68] sm:$0xf0] }
 0x142   :  { %3413 = vmatpush.bf16.msrb.mxu1 %v5959_v13  ;;  %v6533_v8 = vld [vmem:[#allocation8 + $0x8cc] sm:$0xf]  ;;  %v6059_v11 = vor.u32 %v6613_v5, %v6056_v6  ;;  %v6989_v15 = vpop.f32.mrf.mxu0 }
 0x143   :  { %3439 = vmatpush.bf16.msrb.mxu3 %v4939_v14  ;;  %3428 = vmatpush.bf16.msrb.mxu2 %v4619_v4  ;;  %v5736_v9 = vld [vmem:[#allocation8 + $0x8e8] sm:$0xf0] }
 0x144   :  { %3402 = vmatpush.bf16.msrb.mxu0 %v5639_v20  ;;  %v6405_v13 = vld [vmem:[#allocation8 + $0x4cc] sm:$0xf]  ;;  %v5739_v16 = vor.u32 %v6533_v8, %v5736_v9  ;;  %v5326_v8 = vld [vmem:[#allocation8 + $0x590] sm:$0xf] }
 0x145   :  { %v5224_v14 = vld [vmem:[#allocation8 + $0x4e8] sm:$0xf0]  ;;  %v6434_v9 = vld [vmem:[#allocation8 + $0x5ac] sm:$0xf0] }
 0x146   :  { %3414 = vmatpush.bf16.msrb.mxu1 %v5927_v26  ;;  %3429 = vmatmul.bf16.vlgmr.msrb.gmra.mxu2 %v6953_v49  ;;  %v6477_v62 = vld [vmem:[#allocation8 + $0x70c] sm:$0xf] }
 0x147   :  { %3473 = vmatpush.bf16.msra.mxu2 %v5867_v21  ;;  %3440 = vmatpush.bf16.msrb.mxu3 %v4907_v27  ;;  %v5512_v4 = vld [vmem:[#allocation8 + $0x728] sm:$0xf0]  ;;  %v5227_v21 = vor.u32 %v6405_v13, %v5224_v14  ;;  %v6306_v13 = vld [vmem:[#allocation8 + $0x1ac] sm:$0xf0] }
 0x148   :  { %3447 = vmatpush.bf16.msra.mxu0 %v5355_v22  ;;  %v6605_v17 = vld [vmem:[#allocation8 + $0xb0c] sm:$0xf]  ;;  %v5515_v22 = vor.u32 %v6477_v62, %v5512_v4 }
 0x149   :  { %3403 = vmatmul.bf16.vlgmr.msrb.gmra.mxu0 %v6971_v63  ;;  %v6024_v18 = vld [vmem:[#allocation8 + $0xb28] sm:$0xf0] }
 0x14a   :  { %3415 = vmatpush.bf16.msrb.mxu1 %v5895_v42  ;;  %v6525_v19 = vld [vmem:[#allocation8 + $0x88c] sm:$0xf]  ;;  %v6027_v23 = vor.u32 %v6605_v17, %v6024_v18  ;;  %v6991_v27 = vpop.f32.mrf.mxu1  ;;  %v3198_v40 = vpop.f32.mrf.mxu0  ;;  %v5327_v18 = vor.u32 %v6434_v9, %v5326_v8 }
 0x14b   :  { %3474 = vmatpush.bf16.msra.mxu2 %v5835_v35  ;;  %3441 = vmatpush.bf16.msrb.mxu3 %v4875_v43  ;;  %v5704_v20 = vld [vmem:[#allocation8 + $0x8a8] sm:$0xf0]  ;;  %v6418_v40 = vld [vmem:[#allocation8 + $0x52c] sm:$0xf0] }
 0x14c   :  { %3448 = vmatpush.bf16.msra.mxu0 %v5323_v39  ;;  %v6397_v24 = vld [vmem:[#allocation8 + $0x48c] sm:$0xf]  ;;  %v5707_v28 = vor.u32 %v6525_v19, %v5704_v20  ;;  %v5102_v19 = vld [vmem:[#allocation8 + $0x3d0] sm:$0xf] }
 0x14d   :  { %3416 = vmatmul.bf16.vlgmr.msrb.gmra.mxu1 %v6975_v29  ;;  %v5192_v25 = vld [vmem:[#allocation8 + $0x4a8] sm:$0xf0]  ;;  %v6378_v20 = vld [vmem:[#allocation8 + $0x3ec] sm:$0xf0] }
 0x14e   :  { %3460 = vmatpush.bf16.msra.mxu1 %v5611_v44  ;;  %3442 = vmatmul.bf16.vlgmr.msrb.gmra.mxu3 %v6956_v7  ;;  %v6469_v26 = vld [vmem:[#allocation8 + $0x6cc] sm:$0xf]  ;;  %v5195_v35 = vor.u32 %v6397_v24, %v5192_v25  ;;  %v6426_v24 = vld [vmem:[#allocation8 + $0x56c] sm:$0xf0] }
 0x14f   :  { %3486 = vmatpush.bf16.msra.mxu3 %v6123_v45  ;;  %3475 = vmatpush.bf16.msra.mxu2 %v5803_v51  ;;  %v5480_v30 = vld [vmem:[#allocation8 + $0x6e8] sm:$0xf0]  ;;  %v5358_v51 = vld [vmem:[#allocation8 + $0x5d0] sm:$0xf] }
 0x150   :  { %3449 = vmatpush.bf16.msra.mxu0 %v5291_v57  ;;  %v6597_v31 = vld [vmem:[#allocation8 + $0xacc] sm:$0xf]  ;;  %v5483_v36 = vor.u32 %v6469_v26, %v5480_v30  ;;  %v4846_v57 = vld [vmem:[#allocation8 + $0x1d0] sm:$0xf]  ;;  %v5103_v30 = vor.u32 %v6378_v20, %v5102_v19 }
 0x151   :  { %v5992_v32 = vld [vmem:[#allocation8 + $0xae8] sm:$0xf0]  ;;  %v6394_v19 = vld [vmem:[#allocation8 + $0x46c] sm:$0xf0] }
 0x152   :  { %3461 = vmatpush.bf16.msra.mxu1 %v5579_v58  ;;  %v6517_v33 = vld [vmem:[#allocation8 + $0x84c] sm:$0xf]  ;;  %v5995_v37 = vor.u32 %v6597_v31, %v5992_v32  ;;  %v3211_v58 = vpop.f32.mrf.mxu1  ;;  %v4782_v31 = vld [vmem:[#allocation8 + $0x150] sm:$0xf] }
 0x153   :  { %3487 = vmatpush.bf16.msra.mxu3 %v6091_v59  ;;  %3476 = vmatpush.bf16.msra.mxu2 %v5771_v2  ;;  %v5672_v34 = vld [vmem:[#allocation8 + $0x868] sm:$0xf0]  ;;  %v5359_v2 = vor.u32 %v6442_v52, %v5358_v51  ;;  %v6298_v32 = vld [vmem:[#allocation8 + $0x16c] sm:$0xf0] }
 0x154   :  { %3450 = vmatpush.bf16.msra.mxu0 %v5259_v0  ;;  %v6389_v38 = vld [vmem:[#allocation8 + $0x44c] sm:$0xf]  ;;  %v5675_v42 = vor.u32 %v6517_v33, %v5672_v34  ;;  %v4847_v0 = vor.u32 %v6314_v60, %v4846_v57  ;;  %v5550_v51 = vld [vmem:[#allocation8 + $0x750] sm:$0xf] }
 0x155   :  { %v5160_v39 = vld [vmem:[#allocation8 + $0x468] sm:$0xf0]  ;;  %v6490_v52 = vld [vmem:[#allocation8 + $0x76c] sm:$0xf0] }
 0x156   :  { %3462 = vmatpush.bf16.msra.mxu1 %v5547_v10  ;;  %v6461_v41 = vld [vmem:[#allocation8 + $0x68c] sm:$0xf]  ;;  %v5163_v48 = vor.u32 %v6389_v38, %v5160_v39  ;;  %v6498_v38 = vld [vmem:[#allocation8 + $0x7ac] sm:$0xf0] }
 0x157   :  { %3488 = vmatpush.bf16.msra.mxu3 %v6059_v11  ;;  %3477 = vmatpush.bf16.msra.mxu2 %v5739_v16  ;;  %v5448_v43 = vld [vmem:[#allocation8 + $0x6a8] sm:$0xf0]  ;;  %v4814_v11 = vld [vmem:[#allocation8 + $0x190] sm:$0xf] }
 0x158   :  { %3451 = vmatpush.bf16.msra.mxu0 %v5227_v21  ;;  %v6589_v44 = vld [vmem:[#allocation8 + $0xa8c] sm:$0xf]  ;;  %v5451_v53 = vor.u32 %v6461_v41, %v5448_v43  ;;  %v5614_v21 = vld [vmem:[#allocation8 + $0x7d0] sm:$0xf]  ;;  %v4815_v25 = vor.u32 %v6306_v13, %v4814_v11  ;;  %v4783_v41 = vor.u32 %v6298_v32, %v4782_v31 }
 0x159   :  { %v5960_v45 = vld [vmem:[#allocation8 + $0xaa8] sm:$0xf0]  ;;  %v5262_v39 = vld [vmem:[#allocation8 + $0x510] sm:$0xf] }
 0x15a   :  { %3463 = vmatpush.bf16.msra.mxu1 %v5515_v22  ;;  %v6509_v46 = vld [vmem:[#allocation8 + $0x80c] sm:$0xf]  ;;  %v5963_v54 = vor.u32 %v6589_v44, %v5960_v45  ;;  %v6506_v22 = vld [vmem:[#allocation8 + $0x7ec] sm:$0xf0] }
 0x15b   :  { %3489 = vmatpush.bf16.msra.mxu3 %v6027_v23  ;;  %3478 = vmatpush.bf16.msra.mxu2 %v5707_v28  ;;  %v5640_v47 = vld [vmem:[#allocation8 + $0x828] sm:$0xf0]  ;;  %v5294_v23 = vld [vmem:[#allocation8 + $0x550] sm:$0xf]  ;;  %v5615_v33 = vor.u32 %v6506_v22, %v5614_v21 }
 0x15c   :  { %3452 = vmatpush.bf16.msra.mxu0 %v5195_v35  ;;  %v6381_v55 = vld [vmem:[#allocation8 + $0x40c] sm:$0xf]  ;;  %v5643_v59 = vor.u32 %v6509_v46, %v5640_v47  ;;  %v5295_v34 = vor.u32 %v6426_v24, %v5294_v23  ;;  %v5070_v35 = vld [vmem:[#allocation8 + $0x390] sm:$0xf]  ;;  %v5263_v46 = vor.u32 %v6418_v40, %v5262_v39 }
 0x15d   :  { %v5128_v56 = vld [vmem:[#allocation8 + $0x428] sm:$0xf0]  ;;  %v4750_v43 = vld [vmem:[#allocation8 + $0x110] sm:$0xf] }
 0x15e   :  { %3464 = vmatpush.bf16.msra.mxu1 %v5483_v36  ;;  %v6453_v61 = vld [vmem:[#allocation8 + $0x64c] sm:$0xf]  ;;  %v5131_v6 = vor.u32 %v6381_v55, %v5128_v56  ;;  %v6370_v36 = vld [vmem:[#allocation8 + $0x3ac] sm:$0xf0] }
 0x15f   :  { %3490 = vmatpush.bf16.msra.mxu3 %v5995_v37  ;;  %3479 = vmatpush.bf16.msra.mxu2 %v5675_v42  ;;  %v5416_v1 = vld [vmem:[#allocation8 + $0x668] sm:$0xf0]  ;;  %v5582_v37 = vld [vmem:[#allocation8 + $0x790] sm:$0xf]  ;;  %v5071_v42 = vor.u32 %v6370_v36, %v5070_v35 }
 0x160   :  { %v6581_v3 = vld [vmem:[#allocation8 + $0xa4c] sm:$0xf]  ;;  %3453 = vmatpush.bf16.msra.mxu0 %v5163_v48  ;;  %v5419_v10 = vor.u32 %v6453_v61, %v5416_v1  ;;  %v6290_v44 = vld [vmem:[#allocation8 + $0x12c] sm:$0xf0]  ;;  %v5583_v45 = vor.u32 %v6498_v38, %v5582_v37  ;;  %v6310_v37 = vld [vmem:[#allocation8 + $0x1d4] sm:$0xf] }
 0x161   :  { %v5928_v5 = vld [vmem:[#allocation8 + $0xa68] sm:$0xf0]  ;;  %v5038_v47 = vld [vmem:[#allocation8 + $0x350] sm:$0xf]  ;;  %v4751_v55 = vor.u32 %v6290_v44, %v4750_v43  ;;  %v4848_v38 = vld [vmem:[#allocation8 + $0x1f0] sm:$0xf0] }
 0x162   :  { %3465 = vmatpush.bf16.msra.mxu1 %v5451_v53  ;;  %v6445_v14 = vld [vmem:[#allocation8 + $0x60c] sm:$0xf]  ;;  %v5931_v62 = vor.u32 %v6581_v3, %v5928_v5  ;;  %v6362_v48 = vld [vmem:[#allocation8 + $0x36c] sm:$0xf0] }
 0x163   :  { %3491 = vmatpush.bf16.msra.mxu3 %v5963_v54  ;;  %3480 = vmatpush.bf16.msra.mxu2 %v5643_v59  ;;  %v5384_v16 = vld [vmem:[#allocation8 + $0x628] sm:$0xf0]  ;;  %v5230_v53 = vld [vmem:[#allocation8 + $0x4d0] sm:$0xf]  ;;  %v5039_v56 = vor.u32 %v6362_v48, %v5038_v47  ;;  %v5551_v59 = vor.u32 %v6490_v52, %v5550_v51  ;;  %v4851_v48 = vor.u32 %v6310_v37, %v4848_v38 }
 0x164   :  { %v6573_v4 = vld [vmem:[#allocation8 + $0xa0c] sm:$0xf]  ;;  %3454 = vmatpush.bf16.msra.mxu0 %v5131_v6  ;;  %v5387_v26 = vor.u32 %v6445_v14, %v5384_v16  ;;  %v6410_v54 = vld [vmem:[#allocation8 + $0x4ec] sm:$0xf0] }
 0x165   :  { %v5896_v17 = vld [vmem:[#allocation8 + $0xa28] sm:$0xf0]  ;;  %v4718_v57 = vld [vmem:[#allocation8 + $0xd0] sm:$0xf]  ;;  %v5231_v60 = vor.u32 %v6410_v54, %v5230_v53  ;;  %v6302_v54 = vld [vmem:[#allocation8 + $0x194] sm:$0xf] }
 0x166   :  { %3466 = vmatpush.bf16.msra.mxu1 %v5419_v10  ;;  %3481 = vmatmul.bf16.vlgmr.msra.gmra.mxu2 %v6971_v63  ;;  %v5899_v28 = vor.u32 %v6573_v4, %v5896_v17  ;;  %v6282_v58 = vld [vmem:[#allocation8 + $0xec] sm:$0xf0] }
 0x167   :  { %3525 = vmatpush.bf16.msrb.mxu2 %v5359_v2  ;;  %3492 = vmatpush.bf16.msra.mxu3 %v5931_v62  ;;  %v5006_v61 = vld [vmem:[#allocation8 + $0x310] sm:$0xf]  ;;  %v4719_v9 = vor.u32 %v6282_v58, %v4718_v57 }
 0x168   :  { %3499 = vmatpush.bf16.msrb.mxu0 %v4847_v0  ;;  %v6354_v1 = vld [vmem:[#allocation8 + $0x32c] sm:$0xf0]  ;;  %v6997_v8 = vpop.f32.mrf.mxu2 }
 0x169   :  { %3455 = vmatmul.bf16.vlgmr.msra.gmra.mxu0 %v6961_v50  ;;  %v5518_v2 = vld [vmem:[#allocation8 + $0x710] sm:$0xf]  ;;  %v5007_v0 = vor.u32 %v6354_v1, %v5006_v61 }
 0x16a   :  { %3467 = vmatpush.bf16.msra.mxu1 %v5387_v26  ;;  %v6482_v3 = vld [vmem:[#allocation8 + $0x72c] sm:$0xf0] }
 0x16b   :  { %3526 = vmatpush.bf16.msrb.mxu2 %v5327_v18  ;;  %3493 = vmatpush.bf16.msra.mxu3 %v5899_v28  ;;  %v5198_v5 = vld [vmem:[#allocation8 + $0x490] sm:$0xf]  ;;  %v5519_v13 = vor.u32 %v6482_v3, %v5518_v2 }
 0x16c   :  { %3500 = vmatpush.bf16.msrb.mxu0 %v4815_v25  ;;  %v6402_v6 = vld [vmem:[#allocation8 + $0x4ac] sm:$0xf0] }
 0x16d   :  { %3468 = vmatmul.bf16.vlgmr.msra.gmra.mxu1 %v6964_v12  ;;  %v4686_v10 = vld [vmem:[#allocation8 + $0x90] sm:$0xf]  ;;  %v5199_v14 = vor.u32 %v6402_v6, %v5198_v5 }
 0x16e   :  { %3512 = vmatpush.bf16.msrb.mxu1 %v5103_v30  ;;  %3494 = vmatmul.bf16.vlgmr.msra.gmra.mxu3 %v6975_v29  ;;  %v6274_v11 = vld [vmem:[#allocation8 + $0xac] sm:$0xf0] }
 0x16f   :  { %3538 = vmatpush.bf16.msrb.mxu3 %v5615_v33  ;;  %3527 = vmatpush.bf16.msrb.mxu2 %v5295_v34  ;;  %v4974_v62 = vld [vmem:[#allocation8 + $0x2d0] sm:$0xf]  ;;  %v4687_v20 = vor.u32 %v6274_v11, %v4686_v10  ;;  %v6374_v10 = vld [vmem:[#allocation8 + $0x3d4] sm:$0xf] }
 0x170   :  { %3501 = vmatpush.bf16.msrb.mxu0 %v4783_v41  ;;  %v6346_v16 = vld [vmem:[#allocation8 + $0x2ec] sm:$0xf0]  ;;  %v6999_v31 = vpop.f32.mrf.mxu3  ;;  %v3224_v35 = vpop.f32.mrf.mxu2 }
 0x171   :  { %v5486_v4 = vld [vmem:[#allocation8 + $0x6d0] sm:$0xf]  ;;  %v4975_v21 = vor.u32 %v6346_v16, %v4974_v62  ;;  %v4784_v62 = vld [vmem:[#allocation8 + $0x170] sm:$0xf0] }
 0x172   :  { %3513 = vmatpush.bf16.msrb.mxu1 %v5071_v42  ;;  %v6474_v17 = vld [vmem:[#allocation8 + $0x6ec] sm:$0xf0] }
 0x173   :  { %3539 = vmatpush.bf16.msrb.mxu3 %v5583_v45  ;;  %3528 = vmatpush.bf16.msrb.mxu2 %v5263_v46  ;;  %v5166_v18 = vld [vmem:[#allocation8 + $0x450] sm:$0xf]  ;;  %v5487_v24 = vor.u32 %v6474_v17, %v5486_v4 }
 0x174   :  { %3502 = vmatpush.bf16.msrb.mxu0 %v4751_v55  ;;  %v4654_v22 = vld [vmem:[#allocation8 + $0x50] sm:$0xf]  ;;  %v5167_v25 = vor.u32 %v6394_v19, %v5166_v18  ;;  %v4816_v55 = vld [vmem:[#allocation8 + $0x1b0] sm:$0xf0] }
 0x175   :  { %v6266_v23 = vld [vmem:[#allocation8 + $0x6c] sm:$0xf0]  ;;  %v4819_v6 = vor.u32 %v6302_v54, %v4816_v55 }
 0x176   :  { %3514 = vmatpush.bf16.msrb.mxu1 %v5039_v56  ;;  %v4942_v26 = vld [vmem:[#allocation8 + $0x290] sm:$0xf]  ;;  %v4655_v36 = vor.u32 %v6266_v23, %v4654_v22 }
 0x177   :  { %3540 = vmatpush.bf16.msrb.mxu3 %v5551_v59  ;;  %3529 = vmatpush.bf16.msrb.mxu2 %v5231_v60  ;;  %v6338_v28 = vld [vmem:[#allocation8 + $0x2ac] sm:$0xf0] }
 0x178   :  { %3503 = vmatpush.bf16.msrb.mxu0 %v4719_v9  ;;  %v5454_v30 = vld [vmem:[#allocation8 + $0x690] sm:$0xf]  ;;  %v4943_v39 = vor.u32 %v6338_v28, %v4942_v26  ;;  %v3237_v5 = vpop.f32.mrf.mxu3  ;;  %v3274_v11 = vpop.f32.mrf.mxu2  ;;  %v5072_v26 = vld [vmem:[#allocation8 + $0x3b0] sm:$0xf0] }
 0x179   :  { %v6466_v32 = vld [vmem:[#allocation8 + $0x6ac] sm:$0xf0]  ;;  %v6286_v28 = vld [vmem:[#allocation8 + $0x114] sm:$0xf] }
 0x17a   :  { %3515 = vmatpush.bf16.msrb.mxu1 %v5007_v0  ;;  %v5134_v33 = vld [vmem:[#allocation8 + $0x410] sm:$0xf]  ;;  %v5455_v43 = vor.u32 %v6466_v32, %v5454_v30  ;;  %v4752_v30 = vld [vmem:[#allocation8 + $0x130] sm:$0xf0] }
 0x17b   :  { %3541 = vmatpush.bf16.msrb.mxu3 %v5519_v13  ;;  %3530 = vmatpush.bf16.msrb.mxu2 %v5199_v14  ;;  %v6386_v34 = vld [vmem:[#allocation8 + $0x42c] sm:$0xf0]  ;;  %v5104_v13 = vld [vmem:[#allocation8 + $0x3f0] sm:$0xf0] }
 0x17c   :  { %3504 = vmatpush.bf16.msrb.mxu0 %v4687_v20  ;;  %v4622_v40 = vld [vmem:[#allocation8 + $0x10] sm:$0xf]  ;;  %v5135_v44 = vor.u32 %v6386_v34, %v5134_v33  ;;  %v6294_v14 = vld [vmem:[#allocation8 + $0x154] sm:$0xf] }
 0x17d   :  { %v6258_v41 = vld [vmem:[#allocation8 + $0x2c] sm:$0xf0]  ;;  %v4787_v22 = vor.u32 %v6294_v14, %v4784_v62 }
 0x17e   :  { %3516 = vmatpush.bf16.msrb.mxu1 %v4975_v21  ;;  %v5870_v42 = vld [vmem:[#allocation8 + $0x9d0] sm:$0xf]  ;;  %v4623_v53 = vor.u32 %v6258_v41, %v4622_v40  ;;  %v5107_v21 = vor.u32 %v6374_v10, %v5104_v13  ;;  %v4755_v40 = vor.u32 %v6286_v28, %v4752_v30  ;;  %v6334_v30 = vld [vmem:[#allocation8 + $0x294] sm:$0xf] }
 0x17f   :  { %3542 = vmatpush.bf16.msrb.mxu3 %v5487_v24  ;;  %3531 = vmatpush.bf16.msrb.mxu2 %v5167_v25  ;;  %v6570_v45 = vld [vmem:[#allocation8 + $0x9ec] sm:$0xf0]  ;;  %v6366_v25 = vld [vmem:[#allocation8 + $0x394] sm:$0xf] }
 0x180   :  { %v4910_v46 = vld [vmem:[#allocation8 + $0x250] sm:$0xf]  ;;  %3505 = vmatpush.bf16.msrb.mxu0 %v4655_v36  ;;  %v5871_v56 = vor.u32 %v6570_v45, %v5870_v42  ;;  %v3210_v36 = vadd.f32 %v6991_v27, %v6989_v15  ;;  %v3287_v37 = vpop.f32.mrf.mxu3  ;;  %v3276_v45 = vpop.f32.mrf.mxu2 }
 0x181   :  { %v6330_v47 = vld [vmem:[#allocation8 + $0x26c] sm:$0xf0] }
 0x182   :  { %v5422_v51 = vld [vmem:[#allocation8 + $0x650] sm:$0xf]  ;;  %3517 = vmatpush.bf16.msrb.mxu1 %v4943_v39  ;;  %v4911_v57 = vor.u32 %v6330_v47, %v4910_v46  ;;  %v3248_v38 = vpop.f32.mrf.mxu0  ;;  %v5075_v39 = vor.u32 %v6366_v25, %v5072_v26  ;;  %v5040_v46 = vld [vmem:[#allocation8 + $0x370] sm:$0xf0] }
 0x183   :  { %v6458_v52 = vld [vmem:[#allocation8 + $0x66c] sm:$0xf0]  ;;  %3543 = vmatpush.bf16.msrb.mxu3 %v5455_v43  ;;  %3532 = vmatpush.bf16.msrb.mxu2 %v5135_v44  ;;  %v6358_v43 = vld [vmem:[#allocation8 + $0x354] sm:$0xf]  ;;  %v7005_v44 = vadd.f32 %v3287_v37, %v3274_v11 }
 0x184   :  { %v5838_v58 = vld [vmem:[#allocation8 + $0x990] sm:$0xf]  ;;  %v5423_v61 = vor.u32 %v6458_v52, %v5422_v51  ;;  %3506 = vmatpush.bf16.msrb.mxu0 %v4623_v53  ;;  %v6278_v47 = vld [vmem:[#allocation8 + $0xd4] sm:$0xf]  ;;  %v3223_v51 = vadd.f32 %v6997_v8, %v3210_v36  ;;  %v5043_v55 = vor.u32 %v6358_v43, %v5040_v46 }
 0x185   :  { %v6562_v59 = vld [vmem:[#allocation8 + $0x9ac] sm:$0xf0]  ;;  %v4688_v8 = vld [vmem:[#allocation8 + $0xb0] sm:$0xf0] }
 0x186   :  { %v4878_v60 = vld [vmem:[#allocation8 + $0x210] sm:$0xf]  ;;  %3518 = vmatpush.bf16.msrb.mxu1 %v4911_v57  ;;  %v5839_v16 = vor.u32 %v6562_v59, %v5838_v58  ;;  %3533 = vmatmul.bf16.vlgmr.msrb.gmra.mxu2 %v6961_v50  ;;  %v3236_v54 = vadd.f32 %v6999_v31, %v3223_v51  ;;  %v6350_v59 = vld [vmem:[#allocation8 + $0x314] sm:$0xf] }
 0x187   :  { %v6322_v1 = vld [vmem:[#allocation8 + $0x22c] sm:$0xf0]  ;;  %3577 = vmatpush.bf16.msra.mxu2 %v4851_v48  ;;  %3544 = vmatpush.bf16.msrb.mxu3 %v5423_v61  ;;  %v4720_v48 = vld [vmem:[#allocation8 + $0xf0] sm:$0xf0] }
 0x188   :  { %v5390_v2 = vld [vmem:[#allocation8 + $0x610] sm:$0xf]  ;;  %3551 = vmatpush.bf16.msra.mxu0 %v5871_v56  ;;  %v4879_v4 = vor.u32 %v6322_v1, %v4878_v60  ;;  %v4723_v56 = vor.u32 %v6278_v47, %v4720_v48  ;;  %v5008_v60 = vld [vmem:[#allocation8 + $0x330] sm:$0xf0]  ;;  %v3249_v1 = vadd.f32 %v3248_v38, %v3236_v54 }
 0x189   :  { %v6450_v3 = vld [vmem:[#allocation8 + $0x62c] sm:$0xf0]  ;;  %3507 = vmatmul.bf16.vlgmr.msrb.gmra.mxu0 %v6953_v49  ;;  %v6270_v61 = vld [vmem:[#allocation8 + $0x94] sm:$0xf]  ;;  %v5011_v11 = vor.u32 %v6350_v59, %v5008_v60 }
 0x18a   :  { %v6126_v9 = vld [vmem:[#allocation8 + $0xbd0] sm:$0xf]  ;;  %v5391_v17 = vor.u32 %v6450_v3, %v5390_v2  ;;  %3519 = vmatpush.bf16.msrb.mxu1 %v4879_v4  ;;  %v3261_v3 = vpop.f32.mrf.mxu1  ;;  %v3250_v10 = vpop.f32.mrf.mxu0  ;;  %v4691_v13 = vor.u32 %v6270_v61, %v4688_v8  ;;  %v6566_v36 = vld [vmem:[#allocation8 + $0x9d4] sm:$0xf] }
 0x18b   :  { %v6634_v0 = vld [vmem:[#allocation8 + $0xbec] sm:$0xf0]  ;;  %3578 = vmatpush.bf16.msra.mxu2 %v4819_v6  ;;  %v7011_v31 = vadd.f32 %v3261_v3, %v3249_v1  ;;  %v7013_v4 = vpop.f32.mrf.mxu2  ;;  %v5872_v37 = vld [vmem:[#allocation8 + $0x9f0] sm:$0xf0] }
 0x18c   :  { %v6127_v18 = vor.u32 %v6634_v0, %v6126_v9  ;;  %v5806_v19 = vld [vmem:[#allocation8 + $0x950] sm:$0xf]  ;;  %3552 = vmatpush.bf16.msra.mxu0 %v5839_v16  ;;  %3545 = vmatpush.bf16.msrb.mxu3 %v5391_v17  ;;  %v3289_v0 = vpop.f32.mrf.mxu3  ;;  %v6342_v16 = vld [vmem:[#allocation8 + $0x2d4] sm:$0xf] }
 0x18d   :  { %v6554_v20 = vld [vmem:[#allocation8 + $0x96c] sm:$0xf0]  ;;  %3520 = vmatmul.bf16.vlgmr.msrb.gmra.mxu1 %v6956_v7  ;;  %v4976_v17 = vld [vmem:[#allocation8 + $0x2f0] sm:$0xf0] }
 0x18e   :  { %v6094_v23 = vld [vmem:[#allocation8 + $0xb90] sm:$0xf]  ;;  %v5807_v32 = vor.u32 %v6554_v20, %v5806_v19  ;;  %3564 = vmatpush.bf16.msra.mxu1 %v6127_v18  ;;  %v6262_v18 = vld [vmem:[#allocation8 + $0x54] sm:$0xf] }
 0x18f   :  { %v6626_v24 = vld [vmem:[#allocation8 + $0xbac] sm:$0xf0]  ;;  %3579 = vmatpush.bf16.msra.mxu2 %v4787_v22  ;;  %3546 = vmatmul.bf16.vlgmr.msrb.gmra.mxu3 %v6964_v12  ;;  %v4656_v19 = vld [vmem:[#allocation8 + $0x70] sm:$0xf0] }
 0x190   :  { %v6095_v33 = vor.u32 %v6626_v24, %v6094_v23  ;;  %v5774_v34 = vld [vmem:[#allocation8 + $0x910] sm:$0xf]  ;;  %3590 = vmatpush.bf16.msra.mxu3 %v5107_v21  ;;  %3553 = vmatpush.bf16.msra.mxu0 %v5807_v32  ;;  %v4979_v24 = vor.u32 %v6342_v16, %v4976_v17  ;;  %v4659_v25 = vor.u32 %v6262_v18, %v4656_v19  ;;  %v4944_v32 = vld [vmem:[#allocation8 + $0x2b0] sm:$0xf0]  ;;  %v7018_v18 = vld [vmem:[#allocation10] sm:$0xff] }
 0x191   :  { %v6546_v35 = vld [vmem:[#allocation8 + $0x92c] sm:$0xf0]  ;;  %v4947_v45 = vor.u32 %v6334_v30, %v4944_v32  ;;  %v5360_v47 = vld [vmem:[#allocation8 + $0x5f0] sm:$0xf0] }
 0x192   :  { %v6062_v41 = vld [vmem:[#allocation8 + $0xb50] sm:$0xf]  ;;  %v5775_v15 = vor.u32 %v6546_v35, %v5774_v34  ;;  %3565 = vmatpush.bf16.msra.mxu1 %v6095_v33  ;;  %v6254_v33 = vld [vmem:[#allocation8 + $0x14] sm:$0xf]  ;;  %v3263_v38 = vpop.f32.mrf.mxu1 }
 0x193   :  { %v6618_v42 = vld [vmem:[#allocation8 + $0xb6c] sm:$0xf0]  ;;  %3580 = vmatpush.bf16.msra.mxu2 %v4755_v40  ;;  %v4624_v34 = vld [vmem:[#allocation8 + $0x30] sm:$0xf0]  ;;  %v3821_v38 = vperm.slane %v7018_v18, 0 }
 0x194   :  { %v6063_v27 = vor.u32 %v6618_v42, %v6062_v41  ;;  %v5742_v52 = vld [vmem:[#allocation8 + $0x8d0] sm:$0xf]  ;;  %3591 = vmatpush.bf16.msra.mxu3 %v5075_v39  ;;  %3554 = vmatpush.bf16.msra.mxu0 %v5775_v15  ;;  %v6438_v42 = vld [vmem:[#allocation8 + $0x5d4] sm:$0xf]  ;;  %v7015_v43 = vpop.f32.mrf.mxu3  ;;  %v4627_v46 = vor.u32 %v6254_v33, %v4624_v34  ;;  %v3300_v15 = vpop.f32.mrf.mxu0 }
 0x195   :  { %v6538_v53 = vld [vmem:[#allocation8 + $0x8ec] sm:$0xf0]  ;;  %v4912_v54 = vld [vmem:[#allocation8 + $0x270] sm:$0xf0]  ;;  %v5363_v59 = vor.u32 %v6438_v42, %v5360_v47 }
 0x196   :  { %v6030_v57 = vld [vmem:[#allocation8 + $0xb10] sm:$0xf]  ;;  %v5743_v2 = vor.u32 %v6538_v53, %v5742_v52  ;;  %3566 = vmatpush.bf16.msra.mxu1 %v6063_v27  ;;  %v3328_v27 = vpop.f32.mrf.mxu2  ;;  %v5875_v52 = vor.u32 %v6566_v36, %v5872_v37  ;;  %v6326_v53 = vld [vmem:[#allocation8 + $0x254] sm:$0xf] }
 0x197   :  { %v6610_v58 = vld [vmem:[#allocation8 + $0xb2c] sm:$0xf0]  ;;  %3581 = vmatpush.bf16.msra.mxu2 %v4723_v56  ;;  %v6430_v61 = vld [vmem:[#allocation8 + $0x594] sm:$0xf] }
 0x198   :  { %v6031_v5 = vor.u32 %v6610_v58, %v6030_v57  ;;  %v5710_v6 = vld [vmem:[#allocation8 + $0x890] sm:$0xf]  ;;  %3592 = vmatpush.bf16.msra.mxu3 %v5043_v55  ;;  %3555 = vmatpush.bf16.msra.mxu0 %v5743_v2  ;;  %v3301_v55 = vadd.f32 %v3300_v15, %v7005_v44  ;;  %v6558_v57 = vld [vmem:[#allocation8 + $0x994] sm:$0xf]  ;;  %v4915_v2 = vor.u32 %v6326_v53, %v4912_v54 }
 0x199   :  { %v6530_v9 = vld [vmem:[#allocation8 + $0x8ac] sm:$0xf0]  ;;  %v5840_v58 = vld [vmem:[#allocation8 + $0x9b0] sm:$0xf0] }
 0x19a   :  { %v5998_v14 = vld [vmem:[#allocation8 + $0xad0] sm:$0xf]  ;;  %v5711_v20 = vor.u32 %v6530_v9, %v5710_v6  ;;  %3567 = vmatpush.bf16.msra.mxu1 %v6031_v5  ;;  %v5328_v8 = vld [vmem:[#allocation8 + $0x5b0] sm:$0xf0]  ;;  %v5843_v9 = vor.u32 %v6558_v57, %v5840_v58 }
 0x19b   :  { %v6602_v62 = vld [vmem:[#allocation8 + $0xaec] sm:$0xf0]  ;;  %3582 = vmatpush.bf16.msra.mxu2 %v4691_v13  ;;  %v6318_v5 = vld [vmem:[#allocation8 + $0x214] sm:$0xf]  ;;  %v5331_v16 = vor.u32 %v6430_v61, %v5328_v8 }
 0x19c   :  { %v5999_v21 = vor.u32 %v6602_v62, %v5998_v14  ;;  %v5678_v22 = vld [vmem:[#allocation8 + $0x850] sm:$0xf]  ;;  %3593 = vmatpush.bf16.msra.mxu3 %v5011_v11  ;;  %3556 = vmatpush.bf16.msra.mxu0 %v5711_v20  ;;  %v4880_v6 = vld [vmem:[#allocation8 + $0x230] sm:$0xf0]  ;;  %v3313_v62 = vpop.f32.mrf.mxu1  ;;  %v3341_v20 = vpop.f32.mrf.mxu3 }
 0x19d   :  { %v6522_v23 = vld [vmem:[#allocation8 + $0x86c] sm:$0xf0]  ;;  %v6502_v0 = vld [vmem:[#allocation8 + $0x7d4] sm:$0xf]  ;;  %v3314_v19 = vadd.f32 %v3313_v62, %v3301_v55 }
 0x19e   :  { %v5966_v26 = vld [vmem:[#allocation8 + $0xa90] sm:$0xf]  ;;  %v5679_v35 = vor.u32 %v6522_v23, %v5678_v22  ;;  %3568 = vmatpush.bf16.msra.mxu1 %v5999_v21  ;;  %v5616_v10 = vld [vmem:[#allocation8 + $0x7f0] sm:$0xf0]  ;;  %v4883_v21 = vor.u32 %v6318_v5, %v4880_v6 }
 0x19f   :  { %v6594_v28 = vld [vmem:[#allocation8 + $0xaac] sm:$0xf0]  ;;  %3583 = vmatpush.bf16.msra.mxu2 %v4659_v25  ;;  %v6630_v44 = vld [vmem:[#allocation8 + $0xbd4] sm:$0xf]  ;;  %v5619_v22 = vor.u32 %v6502_v0, %v5616_v10  ;;  %v3302_v25 = vpop.f32.mrf.mxu0  ;;  %v3327_v34 = vadd.f32 %v7013_v4, %v3314_v19 }
 0x1a0   :  { %v5967_v39 = vor.u32 %v6594_v28, %v5966_v26  ;;  %v5646_v40 = vld [vmem:[#allocation8 + $0x810] sm:$0xf]  ;;  %3594 = vmatpush.bf16.msra.mxu3 %v4979_v24  ;;  %3557 = vmatpush.bf16.msra.mxu0 %v5679_v35  ;;  %v6128_v11 = vld [vmem:[#allocation8 + $0xbf0] sm:$0xf0] }
 0x1a1   :  { %v6514_v41 = vld [vmem:[#allocation8 + $0x82c] sm:$0xf0]  ;;  %v6550_v13 = vld [vmem:[#allocation8 + $0x954] sm:$0xf]  ;;  %v6131_v26 = vor.u32 %v6630_v44, %v6128_v11  ;;  %v3340_v42 = vadd.f32 %v7015_v43, %v3327_v34 }
 0x1a2   :  { %v5934_v48 = vld [vmem:[#allocation8 + $0xa50] sm:$0xf]  ;;  %v5647_v56 = vor.u32 %v6514_v41, %v5646_v40  ;;  %3569 = vmatpush.bf16.msra.mxu1 %v5967_v39  ;;  %v5808_v14 = vld [vmem:[#allocation8 + $0x970] sm:$0xf0]  ;;  %v3812_v41 = vmul.f32 2.0, %v7011_v31 }
 0x1a3   :  { %v6586_v51 = vld [vmem:[#allocation8 + $0xa6c] sm:$0xf0]  ;;  %3584 = vmatpush.bf16.msra.mxu2 %v4627_v46  ;;  %v6422_v23 = vld [vmem:[#allocation8 + $0x554] sm:$0xf]  ;;  %v5811_v28 = vor.u32 %v6550_v13, %v5808_v14  ;;  %v3813_v53 = vmul.f32 2.0, %v3340_v42 }
 0x1a4   :  { %v5935_v60 = vor.u32 %v6586_v51, %v5934_v48  ;;  %v5902_v1 = vld [vmem:[#allocation8 + $0xa10] sm:$0xf]  ;;  %3595 = vmatpush.bf16.msra.mxu3 %v4947_v45  ;;  %3558 = vmatpush.bf16.msra.mxu0 %v5647_v56  ;;  %v5296_v24 = vld [vmem:[#allocation8 + $0x570] sm:$0xf0]  ;;  %v3822_v45 = vperm.slane %v7018_v18, 1  ;;  %v3315_v43 = vpop.f32.mrf.mxu1  ;;  %v7029_v56 = vsub.f32 %v3821_v38, %v3812_v41 }
 0x1a5   :  { %v6578_v3 = vld [vmem:[#allocation8 + $0xa2c] sm:$0xf0]  ;;  %v6494_v30 = vld [vmem:[#allocation8 + $0x794] sm:$0xf]  ;;  %v5299_v39 = vor.u32 %v6422_v23, %v5296_v24 }
 0x1a6   :  { %3570 = vmatpush.bf16.msra.mxu1 %v5935_v60  ;;  %v5903_v17 = vor.u32 %v6578_v3, %v5902_v1  ;;  %3585 = vmatmul.bf16.vlgmr.msra.gmra.mxu2 %v6953_v49  ;;  %v5584_v32 = vld [vmem:[#allocation8 + $0x7b0] sm:$0xf0]  ;;  %v7031_v57 = vsub.f32 %v3822_v45, %v3813_v53 }
 0x1a7   :  { %3629 = vmatpush.bf16.msrb.mxu2 %v5875_v52  ;;  %3559 = vmatmul.bf16.vlgmr.msra.gmra.mxu0 %v6971_v63  ;;  %v6622_v33 = vld [vmem:[#allocation8 + $0xb94] sm:$0xf]  ;;  %v5587_v46 = vor.u32 %v6494_v30, %v5584_v32  ;;  %v3352_v61 = vpop.f32.mrf.mxu0 }
 0x1a8   :  { %3603 = vmatpush.bf16.msrb.mxu0 %v5363_v59  ;;  %3596 = vmatpush.bf16.msra.mxu3 %v4915_v2  ;;  %v6096_v35 = vld [vmem:[#allocation8 + $0xbb0] sm:$0xf0]  ;;  %vm3845_vm0 = vcmp.lt.f32.partialorder %v7031_v57, %v7029_v56 }
 0x1a9   :  { %v6542_v36 = vld [vmem:[#allocation8 + $0x914] sm:$0xf]  ;;  %v6099_v48 = vor.u32 %v6622_v33, %v6096_v35  ;;  %v7040_v44 = vsel %vm3845_vm0, %v7031_v57, %v7029_v56 }
 0x1aa   :  { %v5776_v37 = vld [vmem:[#allocation8 + $0x930] sm:$0xf0]  ;;  %3571 = vmatpush.bf16.msra.mxu1 %v5903_v17 }
 0x1ab   :  { %3630 = vmatpush.bf16.msrb.mxu2 %v5843_v9  ;;  %v6414_v40 = vld [vmem:[#allocation8 + $0x514] sm:$0xf]  ;;  %v5779_v51 = vor.u32 %v6542_v36, %v5776_v37  ;;  %v3378_v24 = vpop.f32.mrf.mxu2 }
 0x1ac   :  { %3604 = vmatpush.bf16.msrb.mxu0 %v5331_v16  ;;  %3597 = vmatpush.bf16.msra.mxu3 %v4883_v21  ;;  %v5264_v47 = vld [vmem:[#allocation8 + $0x530] sm:$0xf0] }
 0x1ad   :  { %v6486_v4 = vld [vmem:[#allocation8 + $0x754] sm:$0xf]  ;;  %3572 = vmatmul.bf16.vlgmr.msra.gmra.mxu1 %v6975_v29  ;;  %v5267_v55 = vor.u32 %v6414_v40, %v5264_v47  ;;  %v5366_v47 = vld [vmem:[#allocation8 + $0x5d8] sm:$0xf] }
 0x1ae   :  { %3616 = vmatpush.bf16.msrb.mxu1 %v5619_v22  ;;  %v5552_v15 = vld [vmem:[#allocation8 + $0x770] sm:$0xf0] }
 0x1af   :  { %3631 = vmatpush.bf16.msrb.mxu2 %v5811_v28  ;;  %v6614_v27 = vld [vmem:[#allocation8 + $0xb54] sm:$0xf]  ;;  %3598 = vmatmul.bf16.vlgmr.msra.gmra.mxu3 %v6956_v7  ;;  %v5555_v58 = vor.u32 %v6486_v4, %v5552_v15  ;;  %v3354_v34 = vpop.f32.mrf.mxu0  ;;  %v6443_v4 = vld [vmem:[#allocation8 + $0x5f4] sm:$0xf0] }
 0x1b0   :  { %3642 = vmatpush.bf16.msrb.mxu3 %v6131_v26  ;;  %v6064_v52 = vld [vmem:[#allocation8 + $0xb70] sm:$0xf0]  ;;  %3605 = vmatpush.bf16.msrb.mxu0 %v5299_v39  ;;  %v3365_v26 = vpop.f32.mrf.mxu1  ;;  %v6299_v34 = vld [vmem:[#allocation8 + $0x174] sm:$0xf0] }
 0x1b1   :  { %v6534_v31 = vld [vmem:[#allocation8 + $0x8d4] sm:$0xf]  ;;  %v6067_v8 = vor.u32 %v6614_v27, %v6064_v52  ;;  %v3366_v33 = vadd.f32 %v3365_v26, %v3352_v61  ;;  %v4854_v27 = vld [vmem:[#allocation8 + $0x1d8] sm:$0xf]  ;;  %v3391_v52 = vpop.f32.mrf.mxu3 }
 0x1b2   :  { %v5744_v54 = vld [vmem:[#allocation8 + $0x8f0] sm:$0xf0]  ;;  %3617 = vmatpush.bf16.msrb.mxu1 %v5587_v46 }
 0x1b3   :  { %v6406_v59 = vld [vmem:[#allocation8 + $0x4d4] sm:$0xf]  ;;  %3632 = vmatpush.bf16.msrb.mxu2 %v5779_v51  ;;  %v5747_v1 = vor.u32 %v6534_v31, %v5744_v54  ;;  %v3379_v45 = vadd.f32 %v3378_v24, %v3366_v33  ;;  %v6315_v54 = vld [vmem:[#allocation8 + $0x1f4] sm:$0xf0] }
 0x1b4   :  { %v5232_v60 = vld [vmem:[#allocation8 + $0x4f0] sm:$0xf0]  ;;  %3643 = vmatpush.bf16.msrb.mxu3 %v6099_v48  ;;  %3606 = vmatpush.bf16.msrb.mxu0 %v5267_v55  ;;  %v6427_v24 = vld [vmem:[#allocation8 + $0x574] sm:$0xf0] }
 0x1b5   :  { %v6478_v2 = vld [vmem:[#allocation8 + $0x714] sm:$0xf]  ;;  %v5235_v10 = vor.u32 %v6406_v59, %v5232_v60  ;;  %v5367_v59 = vor.u32 %v6443_v4, %v5366_v47  ;;  %v4790_v33 = vld [vmem:[#allocation8 + $0x158] sm:$0xf] }
 0x1b6   :  { %v5520_v3 = vld [vmem:[#allocation8 + $0x730] sm:$0xf0]  ;;  %3618 = vmatpush.bf16.msrb.mxu1 %v5555_v58  ;;  %v7042_v58 = vadd.f32 %v3391_v52, %v3379_v45  ;;  %v4791_v45 = vor.u32 %v6299_v34, %v4790_v33  ;;  %v4758_v47 = vld [vmem:[#allocation8 + $0x118] sm:$0xf] }
 0x1b7   :  { %v6606_v5 = vld [vmem:[#allocation8 + $0xb14] sm:$0xf]  ;;  %v5523_v11 = vor.u32 %v6478_v2, %v5520_v3  ;;  %3633 = vmatpush.bf16.msrb.mxu2 %v5747_v1  ;;  %v5334_v2 = vld [vmem:[#allocation8 + $0x598] sm:$0xf] }
 0x1b8   :  { %v6032_v6 = vld [vmem:[#allocation8 + $0xb30] sm:$0xf0]  ;;  %3644 = vmatpush.bf16.msrb.mxu3 %v6067_v8  ;;  %3607 = vmatpush.bf16.msrb.mxu0 %v5235_v10  ;;  %v3380_v8 = vpop.f32.mrf.mxu2  ;;  %v6435_v3 = vld [vmem:[#allocation8 + $0x5b4] sm:$0xf0] }
 0x1b9   :  { %v6526_v9 = vld [vmem:[#allocation8 + $0x894] sm:$0xf]  ;;  %v6035_v62 = vor.u32 %v6606_v5, %v6032_v6  ;;  %v3367_v5 = vpop.f32.mrf.mxu1  ;;  %v4855_v6 = vor.u32 %v6315_v54, %v4854_v27  ;;  %v6307_v10 = vld [vmem:[#allocation8 + $0x1b4] sm:$0xf0] }
 0x1ba   :  { %v5712_v0 = vld [vmem:[#allocation8 + $0x8b0] sm:$0xf0]  ;;  %3619 = vmatpush.bf16.msrb.mxu1 %v5523_v11  ;;  %v6291_v4 = vld [vmem:[#allocation8 + $0x134] sm:$0xf0] }
 0x1bb   :  { %v6398_v13 = vld [vmem:[#allocation8 + $0x494] sm:$0xf]  ;;  %v5715_v16 = vor.u32 %v6526_v9, %v5712_v0  ;;  %v4822_v0 = vld [vmem:[#allocation8 + $0x198] sm:$0xf] }
 0x1bc   :  { %v5200_v14 = vld [vmem:[#allocation8 + $0x4b0] sm:$0xf0]  ;;  %3645 = vmatpush.bf16.msrb.mxu3 %v6035_v62  ;;  %v6363_v27 = vld [vmem:[#allocation8 + $0x374] sm:$0xf0] }
 0x1bd   :  { %v6470_v17 = vld [vmem:[#allocation8 + $0x6d4] sm:$0xf]  ;;  %v5203_v25 = vor.u32 %v6398_v13, %v5200_v14  ;;  %3634 = vmatpush.bf16.msrb.mxu2 %v5715_v16  ;;  %v5558_v52 = vld [vmem:[#allocation8 + $0x758] sm:$0xf] }
 0x1be   :  { %v5488_v19 = vld [vmem:[#allocation8 + $0x6f0] sm:$0xf0]  ;;  %v6411_v54 = vld [vmem:[#allocation8 + $0x4f4] sm:$0xf0] }
 0x1bf   :  { %v6598_v20 = vld [vmem:[#allocation8 + $0xad4] sm:$0xf]  ;;  %v5491_v28 = vor.u32 %v6470_v17, %v5488_v19  ;;  %3608 = vmatpush.bf16.msrb.mxu0 %v5203_v25  ;;  %v5335_v17 = vor.u32 %v6435_v3, %v5334_v2  ;;  %v5110_v19 = vld [vmem:[#allocation8 + $0x3d8] sm:$0xf]  ;;  %v4823_v25 = vor.u32 %v6307_v10, %v4822_v0 }
 0x1c0   :  { %v6000_v21 = vld [vmem:[#allocation8 + $0xaf0] sm:$0xf0]  ;;  %v5014_v2 = vld [vmem:[#allocation8 + $0x318] sm:$0xf] }
 0x1c1   :  { %v6518_v22 = vld [vmem:[#allocation8 + $0x854] sm:$0xf]  ;;  %v6003_v35 = vor.u32 %v6598_v20, %v6000_v21  ;;  %3620 = vmatpush.bf16.msrb.mxu1 %v5491_v28  ;;  %v6379_v20 = vld [vmem:[#allocation8 + $0x3f4] sm:$0xf0]  ;;  %v3393_v28 = vpop.f32.mrf.mxu3 }
 0x1c2   :  { %v5680_v23 = vld [vmem:[#allocation8 + $0x870] sm:$0xf0]  ;;  %v5622_v21 = vld [vmem:[#allocation8 + $0x7d8] sm:$0xf] }
 0x1c3   :  { %v6390_v30 = vld [vmem:[#allocation8 + $0x454] sm:$0xf]  ;;  %v5683_v36 = vor.u32 %v6518_v22, %v5680_v23  ;;  %3646 = vmatpush.bf16.msrb.mxu3 %v6003_v35  ;;  %v6507_v22 = vld [vmem:[#allocation8 + $0x7f4] sm:$0xf0] }
 0x1c4   :  { %v5168_v32 = vld [vmem:[#allocation8 + $0x470] sm:$0xf0]  ;;  %v5302_v23 = vld [vmem:[#allocation8 + $0x558] sm:$0xf]  ;;  %v5623_v35 = vor.u32 %v6507_v22, %v5622_v21 }
 0x1c5   :  { %v6462_v37 = vld [vmem:[#allocation8 + $0x694] sm:$0xf]  ;;  %v5171_v46 = vor.u32 %v6390_v30, %v5168_v32  ;;  %3635 = vmatpush.bf16.msrb.mxu2 %v5683_v36  ;;  %v5111_v32 = vor.u32 %v6379_v20, %v5110_v19  ;;  %v5303_v36 = vor.u32 %v6427_v24, %v5302_v23  ;;  %v6355_v3 = vld [vmem:[#allocation8 + $0x334] sm:$0xf0] }
 0x1c6   :  { %v5456_v38 = vld [vmem:[#allocation8 + $0x6b0] sm:$0xf0]  ;;  %v5526_v5 = vld [vmem:[#allocation8 + $0x718] sm:$0xf] }
 0x1c7   :  { %v6590_v39 = vld [vmem:[#allocation8 + $0xa94] sm:$0xf]  ;;  %v5459_v48 = vor.u32 %v6462_v37, %v5456_v38  ;;  %3609 = vmatpush.bf16.msrb.mxu0 %v5171_v46  ;;  %v5078_v37 = vld [vmem:[#allocation8 + $0x398] sm:$0xf] }
 0x1c8   :  { %v5968_v40 = vld [vmem:[#allocation8 + $0xab0] sm:$0xf0]  ;;  %v6371_v38 = vld [vmem:[#allocation8 + $0x3b4] sm:$0xf0] }
 0x1c9   :  { %v6510_v41 = vld [vmem:[#allocation8 + $0x814] sm:$0xf]  ;;  %v5971_v53 = vor.u32 %v6590_v39, %v5968_v40  ;;  %3621 = vmatpush.bf16.msrb.mxu1 %v5459_v48  ;;  %v5590_v39 = vld [vmem:[#allocation8 + $0x798] sm:$0xf]  ;;  %v5079_v46 = vor.u32 %v6371_v38, %v5078_v37 }
 0x1ca   :  { %v5648_v42 = vld [vmem:[#allocation8 + $0x830] sm:$0xf0]  ;;  %v6499_v40 = vld [vmem:[#allocation8 + $0x7b4] sm:$0xf0] }
 0x1cb   :  { %v6382_v51 = vld [vmem:[#allocation8 + $0x414] sm:$0xf]  ;;  %v5651_v31 = vor.u32 %v6510_v41, %v5648_v42  ;;  %3647 = vmatpush.bf16.msrb.mxu3 %v5971_v53  ;;  %v5270_v41 = vld [vmem:[#allocation8 + $0x518] sm:$0xf]  ;;  %v5591_v48 = vor.u32 %v6499_v40, %v5590_v39 }
 0x1cc   :  { %v5136_v15 = vld [vmem:[#allocation8 + $0x430] sm:$0xf0]  ;;  %v6419_v42 = vld [vmem:[#allocation8 + $0x534] sm:$0xf0] }
 0x1cd   :  { %v6454_v43 = vld [vmem:[#allocation8 + $0x654] sm:$0xf]  ;;  %v5139_v1 = vor.u32 %v6382_v51, %v5136_v15  ;;  %3636 = vmatpush.bf16.msrb.mxu2 %v5651_v31  ;;  %v5271_v51 = vor.u32 %v6419_v42, %v5270_v41  ;;  %v5046_v15 = vld [vmem:[#allocation8 + $0x358] sm:$0xf] }
 0x1ce   :  { %v5424_v55 = vld [vmem:[#allocation8 + $0x670] sm:$0xf0]  ;;  %v6491_v53 = vld [vmem:[#allocation8 + $0x774] sm:$0xf0] }
 0x1cf   :  { %v6582_v60 = vld [vmem:[#allocation8 + $0xa54] sm:$0xf]  ;;  %v5427_v9 = vor.u32 %v6454_v43, %v5424_v55  ;;  %3610 = vmatpush.bf16.msrb.mxu0 %v5139_v1  ;;  %v5238_v31 = vld [vmem:[#allocation8 + $0x4d8] sm:$0xf]  ;;  %v4759_v43 = vor.u32 %v6291_v4, %v4758_v47  ;;  %v5047_v55 = vor.u32 %v6363_v27, %v5046_v15  ;;  %v5559_v8 = vor.u32 %v6491_v53, %v5558_v52  ;;  %v6311_v4 = vld [vmem:[#allocation8 + $0x1dc] sm:$0xf] }
 0x1d0   :  { %v5936_v61 = vld [vmem:[#allocation8 + $0xa70] sm:$0xf0]  ;;  %3637 = vmatmul.bf16.vlgmr.msrb.gmra.mxu2 %v6971_v63  ;;  %v5239_v1 = vor.u32 %v6411_v54, %v5238_v31  ;;  %v5206_v0 = vld [vmem:[#allocation8 + $0x498] sm:$0xf] }
 0x1d1   :  { %v6446_v11 = vld [vmem:[#allocation8 + $0x614] sm:$0xf]  ;;  %v5939_v13 = vor.u32 %v6582_v60, %v5936_v61  ;;  %3681 = vmatpush.bf16.msra.mxu2 %v5367_v59  ;;  %3622 = vmatpush.bf16.msrb.mxu1 %v5427_v9  ;;  %v4726_v59 = vld [vmem:[#allocation8 + $0xd8] sm:$0xf]  ;;  %v3404_v61 = vpop.f32.mrf.mxu0  ;;  %v3443_v31 = vpop.f32.mrf.mxu3 }
 0x1d2   :  { %v5392_v14 = vld [vmem:[#allocation8 + $0x630] sm:$0xf0]  ;;  %3611 = vmatmul.bf16.vlgmr.msrb.gmra.mxu0 %v6961_v50  ;;  %v6283_v60 = vld [vmem:[#allocation8 + $0xf4] sm:$0xf0] }
 0x1d3   :  { %v6574_v62 = vld [vmem:[#allocation8 + $0xa14] sm:$0xf]  ;;  %3655 = vmatpush.bf16.msra.mxu0 %v4855_v6  ;;  %v5395_v26 = vor.u32 %v6446_v11, %v5392_v14  ;;  %3648 = vmatpush.bf16.msrb.mxu3 %v5939_v13  ;;  %v3405_v6 = vadd.f32 %v3404_v61, %v7042_v58  ;;  %v6483_v9 = vld [vmem:[#allocation8 + $0x734] sm:$0xf0]  ;;  %v4727_v11 = vor.u32 %v6283_v60, %v4726_v59  ;;  %v3417_v58 = vpop.f32.mrf.mxu1  ;;  %v6866_v61 = vmov 0  }
 0x1d4   :  { %v5904_v16 = vld [vmem:[#allocation8 + $0xa30] sm:$0xf0]  ;;  %v6403_v10 = vld [vmem:[#allocation8 + $0x4b4] sm:$0xf0]  ;;  %v5015_v13 = vor.u32 %v6355_v3, %v5014_v2 }
 0x1d5   :  { %v5907_v30 = vor.u32 %v6574_v62, %v5904_v16  ;;  %3682 = vmatpush.bf16.msra.mxu2 %v5335_v17  ;;  %3623 = vmatpush.bf16.msrb.mxu1 %v5395_v26  ;;  %v4694_v14 = vld [vmem:[#allocation8 + $0x98] sm:$0xf]  ;;  %v5527_v16 = vor.u32 %v6483_v9, %v5526_v5  ;;  %v5207_v17 = vor.u32 %v6403_v10, %v5206_v0  ;;  %v3430_v26 = vpop.f32.mrf.mxu2 }
 0x1d6   :  { %v6275_v62 = vld [vmem:[#allocation8 + $0xb4] sm:$0xf0] }
 0x1d7   :  { %3656 = vmatpush.bf16.msra.mxu0 %v4823_v25  ;;  %3649 = vmatpush.bf16.msrb.mxu3 %v5907_v30  ;;  %v4982_v19 = vld [vmem:[#allocation8 + $0x2d8] sm:$0xf]  ;;  %v3823_v25 = vperm.slane %v7018_v18, 2  ;;  %v4695_v28 = vor.u32 %v6275_v62, %v4694_v14  ;;  %v3418_v30 = vadd.f32 %v3417_v58, %v3405_v6 }
 0x1d8   :  { %3624 = vmatmul.bf16.vlgmr.msrb.gmra.mxu1 %v6964_v12  ;;  %v6347_v20 = vld [vmem:[#allocation8 + $0x2f4] sm:$0xf0] }
 0x1d9   :  { %3668 = vmatpush.bf16.msra.mxu1 %v5111_v32  ;;  %3683 = vmatpush.bf16.msra.mxu2 %v5303_v36  ;;  %v5494_v21 = vld [vmem:[#allocation8 + $0x6d8] sm:$0xf]  ;;  %v4983_v32 = vor.u32 %v6347_v20, %v4982_v19  ;;  %v3406_v36 = vpop.f32.mrf.mxu0  ;;  %v3814_v42 = vmul.f32 2.0, %v3418_v30 }
 0x1da   :  { %3650 = vmatmul.bf16.vlgmr.msrb.gmra.mxu3 %v6975_v29  ;;  %v6475_v22 = vld [vmem:[#allocation8 + $0x6f4] sm:$0xf0] }
 0x1db   :  { %3694 = vmatpush.bf16.msra.mxu3 %v5623_v35  ;;  %3657 = vmatpush.bf16.msra.mxu0 %v4791_v45  ;;  %v5174_v23 = vld [vmem:[#allocation8 + $0x458] sm:$0xf]  ;;  %v5495_v37 = vor.u32 %v6475_v22, %v5494_v21  ;;  %v3419_v9 = vpop.f32.mrf.mxu1 }
 0x1dc   :  { %v6395_v24 = vld [vmem:[#allocation8 + $0x474] sm:$0xf0] }
 0x1dd   :  { %3669 = vmatpush.bf16.msra.mxu1 %v5079_v46  ;;  %3684 = vmatpush.bf16.msra.mxu2 %v5271_v51  ;;  %v4662_v33 = vld [vmem:[#allocation8 + $0x58] sm:$0xf]  ;;  %v5175_v38 = vor.u32 %v6395_v24, %v5174_v23  ;;  %v3839_v51 = vsub.f32 %v3823_v25, %v3814_v42  ;;  %v3432_v0 = vpop.f32.mrf.mxu2  ;;  %v6375_v25 = vld [vmem:[#allocation8 + $0x3dc] sm:$0xf] }
 0x1de   :  { %v6267_v34 = vld [vmem:[#allocation8 + $0x74] sm:$0xf0]  ;;  %v6367_v42 = vld [vmem:[#allocation8 + $0x39c] sm:$0xf] }
 0x1df   :  { %3695 = vmatpush.bf16.msra.mxu3 %v5591_v48  ;;  %3658 = vmatpush.bf16.msra.mxu0 %v4759_v43  ;;  %v4950_v35 = vld [vmem:[#allocation8 + $0x298] sm:$0xf]  ;;  %v4663_v47 = vor.u32 %v6267_v34, %v4662_v33  ;;  %v4856_v48 = vld [vmem:[#allocation8 + $0x1f8] sm:$0xf0]  ;;  %vm3848_vm1 = vcmp.lt.f32.partialorder %v3839_v51, %v7040_v44  ;;  %v3445_v33 = vpop.f32.mrf.mxu3 }
 0x1e0   :  { %v6339_v39 = vld [vmem:[#allocation8 + $0x2b4] sm:$0xf0]  ;;  %v4859_v2 = vor.u32 %v6311_v4, %v4856_v48  ;;  %v7059_v14 = vsel %vm3848_vm1, %v3839_v51, %v7040_v44  ;;  %v5112_v44 = vld [vmem:[#allocation8 + $0x3f8] sm:$0xf0] }
 0x1e1   :  { %3670 = vmatpush.bf16.msra.mxu1 %v5047_v55  ;;  %3685 = vmatpush.bf16.msra.mxu2 %v5239_v1  ;;  %v5462_v40 = vld [vmem:[#allocation8 + $0x698] sm:$0xf]  ;;  %v4951_v15 = vor.u32 %v6339_v39, %v4950_v35  ;;  %v7054_v1 = vadd.f32 %v3443_v31, %v3430_v26  ;;  %v6295_v26 = vld [vmem:[#allocation8 + $0x15c] sm:$0xf] }
 0x1e2   :  { %v6467_v41 = vld [vmem:[#allocation8 + $0x6b4] sm:$0xf0] }
 0x1e3   :  { %3696 = vmatpush.bf16.msra.mxu3 %v5559_v8  ;;  %3659 = vmatpush.bf16.msra.mxu0 %v4727_v11  ;;  %v5142_v45 = vld [vmem:[#allocation8 + $0x418] sm:$0xf]  ;;  %v5463_v54 = vor.u32 %v6467_v41, %v5462_v40  ;;  %v3847_v8 = vsel %vm3845_vm0, 1, %v6866_v61  ;;  %v6303_v11 = vld [vmem:[#allocation8 + $0x19c] sm:$0xf] }
 0x1e4   :  { %v6387_v46 = vld [vmem:[#allocation8 + $0x434] sm:$0xf0]  ;;  %v7056_v6 = vsel %vm3848_vm1, 2, %v3847_v8 }
 0x1e5   :  { %3671 = vmatpush.bf16.msra.mxu1 %v5015_v13  ;;  %3686 = vmatpush.bf16.msra.mxu2 %v5207_v17  ;;  %v4630_v27 = vld [vmem:[#allocation8 + $0x18] sm:$0xf]  ;;  %v5143_v43 = vor.u32 %v6387_v46, %v5142_v45  ;;  %v4824_v13 = vld [vmem:[#allocation8 + $0x1b8] sm:$0xf0] }
 0x1e6   :  { %v6259_v52 = vld [vmem:[#allocation8 + $0x34] sm:$0xf0]  ;;  %v4827_v23 = vor.u32 %v6303_v11, %v4824_v13  ;;  %v5080_v45 = vld [vmem:[#allocation8 + $0x3b8] sm:$0xf0]  ;;  %v3456_v11 = vpop.f32.mrf.mxu0 }
 0x1e7   :  { %3697 = vmatpush.bf16.msra.mxu3 %v5527_v16  ;;  %3660 = vmatpush.bf16.msra.mxu0 %v4695_v28  ;;  %v5878_v53 = vld [vmem:[#allocation8 + $0x9d8] sm:$0xf]  ;;  %v4631_v10 = vor.u32 %v6259_v52, %v4630_v27  ;;  %v4792_v28 = vld [vmem:[#allocation8 + $0x178] sm:$0xf0]  ;;  %v5083_v27 = vor.u32 %v6367_v42, %v5080_v45 }
 0x1e8   :  { %v6571_v55 = vld [vmem:[#allocation8 + $0x9f4] sm:$0xf0]  ;;  %v4795_v39 = vor.u32 %v6295_v26, %v4792_v28  ;;  %v6287_v46 = vld [vmem:[#allocation8 + $0x11c] sm:$0xf] }
 0x1e9   :  { %3672 = vmatpush.bf16.msra.mxu1 %v4983_v32  ;;  %3687 = vmatpush.bf16.msra.mxu2 %v5175_v38  ;;  %v4918_v59 = vld [vmem:[#allocation8 + $0x258] sm:$0xf]  ;;  %v5879_v56 = vor.u32 %v6571_v55, %v5878_v53  ;;  %v5115_v38 = vor.u32 %v6375_v25, %v5112_v44  ;;  %v6279_v55 = vld [vmem:[#allocation8 + $0xdc] sm:$0xf] }
 0x1ea   :  { %v6331_v60 = vld [vmem:[#allocation8 + $0x274] sm:$0xf0]  ;;  %v5016_v13 = vld [vmem:[#allocation8 + $0x338] sm:$0xf0]  ;;  %v3469_v28 = vpop.f32.mrf.mxu1 }
 0x1eb   :  { %3698 = vmatpush.bf16.msra.mxu3 %v5495_v37  ;;  %v5430_v3 = vld [vmem:[#allocation8 + $0x658] sm:$0xf]  ;;  %3661 = vmatpush.bf16.msra.mxu0 %v4663_v47  ;;  %v4919_v57 = vor.u32 %v6331_v60, %v4918_v59  ;;  %v4760_v47 = vld [vmem:[#allocation8 + $0x138] sm:$0xf0] }
 0x1ec   :  { %v6459_v5 = vld [vmem:[#allocation8 + $0x674] sm:$0xf0]  ;;  %v4763_v52 = vor.u32 %v6287_v46, %v4760_v47  ;;  %v4728_v59 = vld [vmem:[#allocation8 + $0xf8] sm:$0xf0] }
 0x1ed   :  { %3673 = vmatpush.bf16.msra.mxu1 %v4951_v15  ;;  %v5846_v62 = vld [vmem:[#allocation8 + $0x998] sm:$0xf]  ;;  %3688 = vmatpush.bf16.msra.mxu2 %v5143_v43  ;;  %v5431_v19 = vor.u32 %v6459_v5, %v5430_v3  ;;  %v5048_v43 = vld [vmem:[#allocation8 + $0x378] sm:$0xf0]  ;;  %v4731_v5 = vor.u32 %v6279_v55, %v4728_v59 }
 0x1ee   :  { %v6563_v16 = vld [vmem:[#allocation8 + $0x9b4] sm:$0xf0]  ;;  %v4984_v25 = vld [vmem:[#allocation8 + $0x2f8] sm:$0xf0]  ;;  %v3458_v42 = vpop.f32.mrf.mxu0 }
 0x1ef   :  { %v4886_v17 = vld [vmem:[#allocation8 + $0x218] sm:$0xf]  ;;  %3699 = vmatpush.bf16.msra.mxu3 %v5463_v54  ;;  %3662 = vmatpush.bf16.msra.mxu0 %v4631_v10  ;;  %v5847_v30 = vor.u32 %v6563_v16, %v5846_v62  ;;  %v6359_v54 = vld [vmem:[#allocation8 + $0x35c] sm:$0xf]  ;;  %v3457_v62 = vadd.f32 %v3456_v11, %v7054_v1 }
 0x1f0   :  { %v6323_v20 = vld [vmem:[#allocation8 + $0x234] sm:$0xf0]  ;;  %3689 = vmatmul.bf16.vlgmr.msra.gmra.mxu2 %v6961_v50  ;;  %v5051_v3 = vor.u32 %v6359_v54, %v5048_v43  ;;  %v6351_v10 = vld [vmem:[#allocation8 + $0x31c] sm:$0xf] }
 0x1f1   :  { %v5398_v21 = vld [vmem:[#allocation8 + $0x618] sm:$0xf]  ;;  %3733 = vmatpush.bf16.msrb.mxu2 %v4859_v2  ;;  %3674 = vmatpush.bf16.msra.mxu1 %v4919_v57  ;;  %v4887_v32 = vor.u32 %v6323_v20, %v4886_v17  ;;  %v4696_v57 = vld [vmem:[#allocation8 + $0xb8] sm:$0xf0] }
 0x1f2   :  { %v6451_v22 = vld [vmem:[#allocation8 + $0x634] sm:$0xf0]  ;;  %3663 = vmatmul.bf16.vlgmr.msra.gmra.mxu0 %v6953_v49  ;;  %v6263_v44 = vld [vmem:[#allocation8 + $0x5c] sm:$0xf] }
 0x1f3   :  { %v6134_v24 = vld [vmem:[#allocation8 + $0xbd8] sm:$0xf]  ;;  %3707 = vmatpush.bf16.msrb.mxu0 %v5879_v56  ;;  %3700 = vmatpush.bf16.msra.mxu3 %v5431_v19  ;;  %v5399_v34 = vor.u32 %v6451_v22, %v5398_v21  ;;  %v6271_v56 = vld [vmem:[#allocation8 + $0x9c] sm:$0xf]  ;;  %v5019_v21 = vor.u32 %v6351_v10, %v5016_v13 }
 0x1f4   :  { %v6635_v58 = vld [vmem:[#allocation8 + $0xbf4] sm:$0xf0]  ;;  %v4699_v22 = vor.u32 %v6271_v56, %v4696_v57  ;;  %v4664_v26 = vld [vmem:[#allocation8 + $0x78] sm:$0xf0] }
 0x1f5   :  { %v6135_v35 = vor.u32 %v6635_v58, %v6134_v24  ;;  %v5814_v36 = vld [vmem:[#allocation8 + $0x958] sm:$0xf]  ;;  %3734 = vmatpush.bf16.msrb.mxu2 %v4827_v23  ;;  %3675 = vmatpush.bf16.msra.mxu1 %v4887_v32  ;;  %v6343_v58 = vld [vmem:[#allocation8 + $0x2dc] sm:$0xf]  ;;  %v3470_v32 = vadd.f32 %v3469_v28, %v3457_v62 }
 0x1f6   :  { %v6555_v37 = vld [vmem:[#allocation8 + $0x974] sm:$0xf0]  ;;  %v4952_v45 = vld [vmem:[#allocation8 + $0x2b8] sm:$0xf0] }
 0x1f7   :  { %v6102_v40 = vld [vmem:[#allocation8 + $0xb98] sm:$0xf]  ;;  %3708 = vmatpush.bf16.msrb.mxu0 %v5847_v30  ;;  %v5815_v4 = vor.u32 %v6555_v37, %v5814_v36  ;;  %3701 = vmatpush.bf16.msra.mxu3 %v5399_v34  ;;  %v3482_v30 = vpop.f32.mrf.mxu2  ;;  %v4987_v36 = vor.u32 %v6343_v58, %v4984_v25  ;;  %v4667_v37 = vor.u32 %v6263_v44, %v4664_v26  ;;  %v6255_v46 = vld [vmem:[#allocation8 + $0x1c] sm:$0xf] }
 0x1f8   :  { %v6627_v41 = vld [vmem:[#allocation8 + $0xbb4] sm:$0xf0]  ;;  %3676 = vmatmul.bf16.vlgmr.msra.gmra.mxu1 %v6956_v7  ;;  %v4632_v47 = vld [vmem:[#allocation8 + $0x38] sm:$0xf0] }
 0x1f9   :  { %3720 = vmatpush.bf16.msrb.mxu1 %v6135_v35  ;;  %v6103_v48 = vor.u32 %v6627_v41, %v6102_v40  ;;  %v5782_v51 = vld [vmem:[#allocation8 + $0x918] sm:$0xf]  ;;  %3735 = vmatpush.bf16.msrb.mxu2 %v4795_v39  ;;  %v6335_v40 = vld [vmem:[#allocation8 + $0x29c] sm:$0xf]  ;;  %v3483_v41 = vadd.f32 %v3482_v30, %v3470_v32  ;;  %v4635_v54 = vor.u32 %v6255_v46, %v4632_v47 }
 0x1fa   :  { %v6547_v15 = vld [vmem:[#allocation8 + $0x934] sm:$0xf0]  ;;  %3702 = vmatmul.bf16.vlgmr.msra.gmra.mxu3 %v6964_v12  ;;  %v5368_v43 = vld [vmem:[#allocation8 + $0x5f8] sm:$0xf0] }
 0x1fb   :  { %3746 = vmatpush.bf16.msrb.mxu3 %v5115_v38  ;;  %v6070_v53 = vld [vmem:[#allocation8 + $0xb58] sm:$0xf]  ;;  %3709 = vmatpush.bf16.msrb.mxu0 %v5815_v4  ;;  %v5783_v60 = vor.u32 %v6547_v15, %v5782_v51  ;;  %v5880_v51 = vld [vmem:[#allocation8 + $0x9f8] sm:$0xf0] }
 0x1fc   :  { %v6619_v31 = vld [vmem:[#allocation8 + $0xb74] sm:$0xf0]  ;;  %v6431_v11 = vld [vmem:[#allocation8 + $0x59c] sm:$0xf] }
 0x1fd   :  { %3721 = vmatpush.bf16.msrb.mxu1 %v6103_v48  ;;  %v6071_v61 = vor.u32 %v6619_v31, %v6070_v53  ;;  %v5750_v8 = vld [vmem:[#allocation8 + $0x8d8] sm:$0xf]  ;;  %3736 = vmatpush.bf16.msrb.mxu2 %v4763_v52  ;;  %v6567_v48 = vld [vmem:[#allocation8 + $0x9dc] sm:$0xf]  ;;  %v4955_v31 = vor.u32 %v6335_v40, %v4952_v45 }
 0x1fe   :  { %v6539_v2 = vld [vmem:[#allocation8 + $0x8f4] sm:$0xf0]  ;;  %v6439_v53 = vld [vmem:[#allocation8 + $0x5dc] sm:$0xf] }
 0x1ff   :  { %3747 = vmatpush.bf16.msrb.mxu3 %v5083_v27  ;;  %v6038_v9 = vld [vmem:[#allocation8 + $0xb18] sm:$0xf]  ;;  %3710 = vmatpush.bf16.msrb.mxu0 %v5783_v60  ;;  %v5751_v16 = vor.u32 %v6539_v2, %v5750_v8  ;;  %v3495_v60 = vpop.f32.mrf.mxu3  ;;  %v5883_v8 = vor.u32 %v6567_v48, %v5880_v51  ;;  %v6327_v2 = vld [vmem:[#allocation8 + $0x25c] sm:$0xf]  ;;  %v5371_v57 = vor.u32 %v6439_v53, %v5368_v43 }
 0x200   :  { %v6611_v0 = vld [vmem:[#allocation8 + $0xb34] sm:$0xf0]  ;;  %v6559_v13 = vld [vmem:[#allocation8 + $0x99c] sm:$0xf] }
 0x201   :  { %3722 = vmatpush.bf16.msrb.mxu1 %v6071_v61  ;;  %v6039_v17 = vor.u32 %v6611_v0, %v6038_v9  ;;  %v5718_v19 = vld [vmem:[#allocation8 + $0x898] sm:$0xf]  ;;  %3737 = vmatpush.bf16.msrb.mxu2 %v4731_v5  ;;  %v3824_v61 = vperm.slane %v7018_v18, 3  ;;  %v3496_v5 = vadd.f32 %v3495_v60, %v3483_v41  ;;  %v3471_v9 = vpop.f32.mrf.mxu1  ;;  %v3484_v0 = vpop.f32.mrf.mxu2  ;;  %v5848_v56 = vld [vmem:[#allocation8 + $0x9b8] sm:$0xf0] }
 0x202   :  { %v6531_v20 = vld [vmem:[#allocation8 + $0x8b4] sm:$0xf0]  ;;  %v5624_v58 = vld [vmem:[#allocation8 + $0x7f8] sm:$0xf0] }
 0x203   :  { %3748 = vmatpush.bf16.msrb.mxu3 %v5051_v3  ;;  %v6006_v23 = vld [vmem:[#allocation8 + $0xad8] sm:$0xf]  ;;  %3711 = vmatpush.bf16.msrb.mxu0 %v5751_v16  ;;  %v5719_v1 = vor.u32 %v6531_v20, %v5718_v19  ;;  %v4920_v3 = vld [vmem:[#allocation8 + $0x278] sm:$0xf0]  ;;  %v3815_v20 = vmul.f32 2.0, %v3496_v5 }
 0x204   :  { %v6603_v24 = vld [vmem:[#allocation8 + $0xaf4] sm:$0xf0]  ;;  %v5336_v16 = vld [vmem:[#allocation8 + $0x5b8] sm:$0xf0]  ;;  %v4923_v18 = vor.u32 %v6327_v2, %v4920_v3 }
 0x205   :  { %3723 = vmatpush.bf16.msrb.mxu1 %v6039_v17  ;;  %v6007_v33 = vor.u32 %v6603_v24, %v6006_v23  ;;  %v5686_v34 = vld [vmem:[#allocation8 + $0x858] sm:$0xf]  ;;  %3738 = vmatpush.bf16.msrb.mxu2 %v4699_v22  ;;  %v4888_v22 = vld [vmem:[#allocation8 + $0x238] sm:$0xf0]  ;;  %v5851_v23 = vor.u32 %v6559_v13, %v5848_v56  ;;  %v3840_v44 = vsub.f32 %v3824_v61, %v3815_v20 }
 0x206   :  { %v6523_v35 = vld [vmem:[#allocation8 + $0x874] sm:$0xf0]  ;;  %v6503_v24 = vld [vmem:[#allocation8 + $0x7dc] sm:$0xf] }
 0x207   :  { %3749 = vmatpush.bf16.msrb.mxu3 %v5019_v21  ;;  %v5974_v38 = vld [vmem:[#allocation8 + $0xa98] sm:$0xf]  ;;  %3712 = vmatpush.bf16.msrb.mxu0 %v5719_v1  ;;  %v5687_v4 = vor.u32 %v6523_v35, %v5686_v34  ;;  %v6319_v21 = vld [vmem:[#allocation8 + $0x21c] sm:$0xf]  ;;  %v5339_v1 = vor.u32 %v6431_v11, %v5336_v16  ;;  %vm3851_vm2 = vcmp.lt.f32.partialorder %v3840_v44, %v7059_v14 }
 0x208   :  { %v6595_v39 = vld [vmem:[#allocation8 + $0xab4] sm:$0xf0]  ;;  %v6631_v25 = vld [vmem:[#allocation8 + $0xbdc] sm:$0xf]  ;;  %v5627_v34 = vor.u32 %v6503_v24, %v5624_v58 }
 0x209   :  { %3724 = vmatpush.bf16.msrb.mxu1 %v6007_v33  ;;  %v5975_v15 = vor.u32 %v6595_v39, %v5974_v38  ;;  %v5654_v27 = vld [vmem:[#allocation8 + $0x818] sm:$0xf]  ;;  %3739 = vmatpush.bf16.msrb.mxu2 %v4667_v37  ;;  %v6136_v26 = vld [vmem:[#allocation8 + $0xbf8] sm:$0xf0]  ;;  %v4891_v33 = vor.u32 %v6319_v21, %v4888_v22  ;;  %v7072_v38 = vsel %vm3851_vm2, 3, %v7056_v6  ;;  %v3497_v39 = vpop.f32.mrf.mxu3 }
 0x20a   :  { %v6515_v52 = vld [vmem:[#allocation8 + $0x834] sm:$0xf0]  ;;  %v6551_v28 = vld [vmem:[#allocation8 + $0x95c] sm:$0xf]  ;;  %v6139_v40 = vor.u32 %v6631_v25, %v6136_v26  ;;  %v3521_v58 = vpop.f32.mrf.mxu1  ;;  %v3534_v25 = vpop.f32.mrf.mxu2 }
 0x20b   :  { %3750 = vmatpush.bf16.msrb.mxu3 %v4987_v36  ;;  %v5942_v55 = vld [vmem:[#allocation8 + $0xa58] sm:$0xf]  ;;  %3713 = vmatpush.bf16.msrb.mxu0 %v5687_v4  ;;  %v5655_v10 = vor.u32 %v6515_v52, %v5654_v27  ;;  %v5816_v30 = vld [vmem:[#allocation8 + $0x978] sm:$0xf0] }
 0x20c   :  { %v6587_v59 = vld [vmem:[#allocation8 + $0xa74] sm:$0xf0]  ;;  %v6423_v35 = vld [vmem:[#allocation8 + $0x55c] sm:$0xf]  ;;  %v5819_v41 = vor.u32 %v6551_v28, %v5816_v30 }
 0x20d   :  { %3725 = vmatpush.bf16.msrb.mxu1 %v5975_v15  ;;  %v5943_v62 = vor.u32 %v6587_v59, %v5942_v55  ;;  %v5910_v17 = vld [vmem:[#allocation8 + $0xa18] sm:$0xf]  ;;  %3740 = vmatpush.bf16.msrb.mxu2 %v4635_v54  ;;  %v5304_v36 = vld [vmem:[#allocation8 + $0x578] sm:$0xf0] }
 0x20e   :  { %v6579_v19 = vld [vmem:[#allocation8 + $0xa34] sm:$0xf0]  ;;  %v6495_v37 = vld [vmem:[#allocation8 + $0x79c] sm:$0xf]  ;;  %v5307_v6 = vor.u32 %v6423_v35, %v5304_v36 }
 0x20f   :  { %3751 = vmatpush.bf16.msrb.mxu3 %v4955_v31  ;;  %3714 = vmatpush.bf16.msrb.mxu0 %v5655_v10  ;;  %v5911_v32 = vor.u32 %v6579_v19, %v5910_v17  ;;  %v5592_v42 = vld [vmem:[#allocation8 + $0x7b8] sm:$0xf0]  ;;  %v3508_v10 = vpop.f32.mrf.mxu0 }
 0x210   :  { %3741 = vmatmul.bf16.vlgmr.msrb.gmra.mxu2 %v6953_v49  ;;  %v6623_v45 = vld [vmem:[#allocation8 + $0xb9c] sm:$0xf]  ;;  %v7078_v49 = vsel %vm3851_vm2, %v3840_v44, %v7059_v14  ;;  %v5595_v48 = vor.u32 %v6495_v37, %v5592_v42  ;;  %v3522_v26 = vadd.f32 %v3521_v58, %v3508_v10 }
 0x211   :  { %3785 = vmatpush.bf16.msra.mxu2 %v5883_v8  ;;  %3726 = vmatpush.bf16.msrb.mxu1 %v5943_v62  ;;  %v6104_v46 = vld [vmem:[#allocation8 + $0xbb8] sm:$0xf0] }
 0x212   :  { %3715 = vmatmul.bf16.vlgmr.msrb.gmra.mxu0 %v6971_v63  ;;  %v6543_v47 = vld [vmem:[#allocation8 + $0x91c] sm:$0xf]  ;;  %v6107_v27 = vor.u32 %v6623_v45, %v6104_v46  ;;  %v3535_v37 = vadd.f32 %v3534_v25, %v3522_v26 }
 0x213   :  { %3759 = vmatpush.bf16.msra.mxu0 %v5371_v57  ;;  %3752 = vmatpush.bf16.msrb.mxu3 %v4923_v18  ;;  %v5784_v4 = vld [vmem:[#allocation8 + $0x938] sm:$0xf0] }
 0x214   :  { %v6415_v51 = vld [vmem:[#allocation8 + $0x51c] sm:$0xf]  ;;  %v5787_v52 = vor.u32 %v6543_v47, %v5784_v4 }
 0x215   :  { %3786 = vmatpush.bf16.msra.mxu2 %v5851_v23  ;;  %3727 = vmatpush.bf16.msrb.mxu1 %v5911_v32  ;;  %v5272_v15 = vld [vmem:[#allocation8 + $0x538] sm:$0xf0] }
 0x216   :  { %v6487_v53 = vld [vmem:[#allocation8 + $0x75c] sm:$0xf]  ;;  %v5275_v59 = vor.u32 %v6415_v51, %v5272_v15 }
 0x217   :  { %3760 = vmatpush.bf16.msra.mxu0 %v5339_v1  ;;  %3753 = vmatpush.bf16.msrb.mxu3 %v4891_v33  ;;  %v5560_v31 = vld [vmem:[#allocation8 + $0x778] sm:$0xf0]  ;;  %v3510_v39 = vpop.f32.mrf.mxu0 }
 0x218   :  { %v6615_v54 = vld [vmem:[#allocation8 + $0xb5c] sm:$0xf]  ;;  %3728 = vmatmul.bf16.vlgmr.msrb.gmra.mxu1 %v6975_v29  ;;  %v5563_v60 = vor.u32 %v6487_v53, %v5560_v31 }
 0x219   :  { %3772 = vmatpush.bf16.msra.mxu1 %v5627_v34  ;;  %3787 = vmatpush.bf16.msra.mxu2 %v5819_v41  ;;  %v6072_v14 = vld [vmem:[#allocation8 + $0xb78] sm:$0xf0] }
 0x21a   :  { %v6535_v43 = vld [vmem:[#allocation8 + $0x8dc] sm:$0xf]  ;;  %3754 = vmatmul.bf16.vlgmr.msrb.gmra.mxu3 %v6956_v7  ;;  %v6075_v2 = vor.u32 %v6615_v54, %v6072_v14  ;;  %v3523_v54 = vpop.f32.mrf.mxu1  ;;  %v3536_v14 = vpop.f32.mrf.mxu2 }
 0x21b   :  { %3798 = vmatpush.bf16.msra.mxu3 %v6139_v40  ;;  %v5752_v55 = vld [vmem:[#allocation8 + $0x8f8] sm:$0xf0]  ;;  %3761 = vmatpush.bf16.msra.mxu0 %v5307_v6  ;;  %v3917_v54 = vld [vmem:[%s7528_s5 + $0xd8] sm:$0xff] }
 0x21c   :  { %v6407_v61 = vld [vmem:[#allocation8 + $0x4dc] sm:$0xf]  ;;  %v5755_v3 = vor.u32 %v6535_v43, %v5752_v55  ;;  %v3933_v14 = vld [vmem:[%s7528_s5 + $0x158] sm:$0xff] }
 0x21d   :  { %3773 = vmatpush.bf16.msra.mxu1 %v5595_v48  ;;  %v5240_v8 = vld [vmem:[#allocation8 + $0x4f8] sm:$0xf0]  ;;  %3788 = vmatpush.bf16.msra.mxu2 %v5787_v52 }
 0x21e   :  { %v6479_v5 = vld [vmem:[#allocation8 + $0x71c] sm:$0xf]  ;;  %v5243_v57 = vor.u32 %v6407_v61, %v5240_v8 }
 0x21f   :  { %3799 = vmatpush.bf16.msra.mxu3 %v6107_v27  ;;  %v5528_v9 = vld [vmem:[#allocation8 + $0x738] sm:$0xf0]  ;;  %3762 = vmatpush.bf16.msra.mxu0 %v5275_v59  ;;  %v3547_v27 = vpop.f32.mrf.mxu3 }
 0x220   :  { %v6607_v0 = vld [vmem:[#allocation8 + $0xb1c] sm:$0xf]  ;;  %v5531_v7 = vor.u32 %v6479_v5, %v5528_v9  ;;  %v3548_v31 = vadd.f32 %v3547_v27, %v3535_v37  ;;  %v3934_v27 = vld [vmem:[%s7528_s5 + $0x160] sm:$0xff] }
 0x221   :  { %v6040_v11 = vld [vmem:[#allocation8 + $0xb38] sm:$0xf0]  ;;  %3774 = vmatpush.bf16.msra.mxu1 %v5563_v60  ;;  %3789 = vmatpush.bf16.msra.mxu2 %v5755_v3 }
 0x222   :  { %v6527_v13 = vld [vmem:[#allocation8 + $0x89c] sm:$0xf]  ;;  %v6043_v17 = vor.u32 %v6607_v0, %v6040_v11 }
 0x223   :  { %v5720_v56 = vld [vmem:[#allocation8 + $0x8b8] sm:$0xf0]  ;;  %3800 = vmatpush.bf16.msra.mxu3 %v6075_v2  ;;  %3763 = vmatpush.bf16.msra.mxu0 %v5243_v57  ;;  %v7086_v57 = vld [vmem:[#allocation10] sm:$0xff] }
 0x224   :  { %v6399_v62 = vld [vmem:[#allocation8 + $0x49c] sm:$0xf]  ;;  %v5723_v19 = vor.u32 %v6527_v13, %v5720_v56  ;;  %v3560_v0 = vpop.f32.mrf.mxu0 }
 0x225   :  { %v5208_v16 = vld [vmem:[#allocation8 + $0x4b8] sm:$0xf0]  ;;  %3775 = vmatpush.bf16.msra.mxu1 %v5531_v7  ;;  %v3561_v10 = vadd.f32 %v3560_v0, %v3548_v31 }
 0x226   :  { %v6471_v20 = vld [vmem:[#allocation8 + $0x6dc] sm:$0xf]  ;;  %v5211_v44 = vor.u32 %v6399_v62, %v5208_v16  ;;  %3790 = vmatpush.bf16.msra.mxu2 %v5723_v19 }
 0x227   :  { %v5496_v18 = vld [vmem:[#allocation8 + $0x6f8] sm:$0xf0]  ;;  %3801 = vmatpush.bf16.msra.mxu3 %v6043_v17  ;;  %v3549_v9 = vpop.f32.mrf.mxu3 }
 0x228   :  { %v6599_v21 = vld [vmem:[#allocation8 + $0xadc] sm:$0xf]  ;;  %v5499_v28 = vor.u32 %v6471_v20, %v5496_v18  ;;  %3764 = vmatpush.bf16.msra.mxu0 %v5211_v44 }
 0x229   :  { %v6008_v22 = vld [vmem:[#allocation8 + $0xaf8] sm:$0xf0]  ;;  %v3586_v13 = vpop.f32.mrf.mxu2 }
 0x22a   :  { %v6519_v23 = vld [vmem:[#allocation8 + $0x85c] sm:$0xf]  ;;  %v6011_v32 = vor.u32 %v6599_v21, %v6008_v22  ;;  %3776 = vmatpush.bf16.msra.mxu1 %v5499_v28  ;;  %v3573_v11 = vpop.f32.mrf.mxu1 }
 0x22b   :  { %v5688_v24 = vld [vmem:[#allocation8 + $0x878] sm:$0xf0]  ;;  %v3574_v56 = vadd.f32 %v3573_v11, %v3561_v10  ;;  %v3898_v10 = vld [vmem:[%s7528_s5 + $0x40] sm:$0xff] }
 0x22c   :  { %v6391_v30 = vld [vmem:[#allocation8 + $0x45c] sm:$0xf]  ;;  %v5691_v33 = vor.u32 %v6519_v23, %v5688_v24  ;;  %3802 = vmatpush.bf16.msra.mxu3 %v6011_v32  ;;  %v3562_v62 = vpop.f32.mrf.mxu0  ;;  %v3914_v11 = vld [vmem:[%s7528_s5 + $0xc0] sm:$0xff] }
 0x22d   :  { %v5176_v1 = vld [vmem:[#allocation8 + $0x478] sm:$0xf0]  ;;  %v3816_v7 = vmul.f32 2.0, %v3574_v56  ;;  %v3913_v62 = vld [vmem:[%s7528_s5 + $0xb8] sm:$0xff] }
 0x22e   :  { %v6463_v34 = vld [vmem:[#allocation8 + $0x69c] sm:$0xf]  ;;  %v5179_v45 = vor.u32 %v6391_v30, %v5176_v1  ;;  %3791 = vmatpush.bf16.msra.mxu2 %v5691_v33  ;;  %v3826_v30 = vperm.slane %v7086_v57, 5 }
 0x22f   :  { %v5464_v35 = vld [vmem:[#allocation8 + $0x6b8] sm:$0xf0] }
 0x230   :  { %v6591_v36 = vld [vmem:[#allocation8 + $0xa9c] sm:$0xf]  ;;  %v5467_v46 = vor.u32 %v6463_v34, %v5464_v35  ;;  %3765 = vmatpush.bf16.msra.mxu0 %v5179_v45  ;;  %v3921_v34 = vld [vmem:[%s7528_s5 + $0xf8] sm:$0xff] }
 0x231   :  { %v5976_v40 = vld [vmem:[#allocation8 + $0xab8] sm:$0xf0]  ;;  %v3937_v35 = vld [vmem:[%s7528_s5 + $0x178] sm:$0xff] }
 0x232   :  { %v6511_v41 = vld [vmem:[#allocation8 + $0x81c] sm:$0xf]  ;;  %v5979_v6 = vor.u32 %v6591_v36, %v5976_v40  ;;  %3777 = vmatpush.bf16.msra.mxu1 %v5467_v46  ;;  %v3575_v19 = vpop.f32.mrf.mxu1  ;;  %v3953_v36 = vld [vmem:[%s7528_s5 + $0x1f8] sm:$0xff] }
 0x233   :  { %v5656_v42 = vld [vmem:[#allocation8 + $0x838] sm:$0xf0] }
 0x234   :  { %v6383_v47 = vld [vmem:[#allocation8 + $0x41c] sm:$0xf]  ;;  %v5659_v48 = vor.u32 %v6511_v41, %v5656_v42  ;;  %3803 = vmatpush.bf16.msra.mxu3 %v5979_v6 }
 0x235   :  { %v5144_v4 = vld [vmem:[#allocation8 + $0x438] sm:$0xf0] }
 0x236   :  { %v6455_v51 = vld [vmem:[#allocation8 + $0x65c] sm:$0xf]  ;;  %v5147_v43 = vor.u32 %v6383_v47, %v5144_v4  ;;  %3792 = vmatpush.bf16.msra.mxu2 %v5659_v48 }
 0x237   :  { %v5432_v15 = vld [vmem:[#allocation8 + $0x678] sm:$0xf0] }
 0x238   :  { %v6583_v52 = vld [vmem:[#allocation8 + $0xa5c] sm:$0xf]  ;;  %v5435_v55 = vor.u32 %v6455_v51, %v5432_v15  ;;  %3766 = vmatpush.bf16.msra.mxu0 %v5147_v43  ;;  %v3902_v51 = vld [vmem:[%s7528_s5 + $0x60] sm:$0xff]  ;;  %v3949_v43 = vld [vmem:[%s7528_s5 + $0x1d8] sm:$0xff] }
 0x239   :  { %v5944_v53 = vld [vmem:[#allocation8 + $0xa78] sm:$0xf0]  ;;  %3793 = vmatmul.bf16.vlgmr.msra.gmra.mxu2 %v6971_v63  ;;  %v3825_v63 = vperm.slane %v7086_v57, 4  ;;  %v3918_v15 = vld [vmem:[%s7528_s5 + $0xe0] sm:$0xff] }
 0x23a   :  { %v5947_v59 = vor.u32 %v6583_v52, %v5944_v53  ;;  %v6447_v60 = vld [vmem:[#allocation8 + $0x61c] sm:$0xf]  ;;  %3778 = vmatpush.bf16.msra.mxu1 %v5435_v55  ;;  %4062 = vmatpush.msrb.mxu2 %v3937_v35  ;;  %v3950_v52 = vld [vmem:[%s7528_s5 + $0x1e0] sm:$0xff]  ;;  %v3901_v53 = vld [vmem:[%s7528_s5 + $0x58] sm:$0xff] }
 0x23b   :  { %v5400_v61 = vld [vmem:[#allocation8 + $0x638] sm:$0xf0]  ;;  %3767 = vmatmul.bf16.vlgmr.msra.gmra.mxu0 %v6961_v50  ;;  %v3841_v16 = vsub.f32 %v3825_v63, %v3816_v7  ;;  %v3599_v50 = vpop.f32.mrf.mxu3  ;;  %v3946_v63 = vld [vmem:[%s7528_s5 + $0x1c0] sm:$0xff]  ;;  %v3897_v7 = vld [vmem:[%s7528_s5 + $0x38] sm:$0xff] }
 0x23c   :  { %v6575_v8 = vld [vmem:[#allocation8 + $0xa1c] sm:$0xf]  ;;  %v5403_v3 = vor.u32 %v6447_v60, %v5400_v61  ;;  %3804 = vmatpush.bf16.msra.mxu3 %v5947_v59 }
 0x23d   :  { %v5912_v2 = vld [vmem:[#allocation8 + $0xa38] sm:$0xf0]  ;;  %vm3854_vm3 = vcmp.lt.f32.partialorder %v3841_v16, %v7078_v49 }
 0x23e   :  { %v5915_v5 = vor.u32 %v6575_v8, %v5912_v2  ;;  %3779 = vmatpush.bf16.msra.mxu1 %v5403_v3  ;;  %v3856_v17 = vsel %vm3854_vm3, 4, %v7072_v38  ;;  %v3855_v20 = vsel %vm3854_vm3, %v3841_v16, %v7078_v49  ;;  %v3905_v49 = vld [vmem:[%s7528_s5 + $0x78] sm:$0xff]  ;;  %v3904_v37 = vld [vmem:[%s7528_s5 + $0x70] sm:$0xff]  ;;  %v3903_v47 = vld [vmem:[%s7528_s5 + $0x68] sm:$0xff] }
 0x23f   :  { %4022 = vmatpush.msrb.mxu0 %v3905_v49  ;;  %v3920_v39 = vld [vmem:[%s7528_s5 + $0xf0] sm:$0xff]  ;;  %v3919_v4 = vld [vmem:[%s7528_s5 + $0xe8] sm:$0xff]  ;;  %v3929_v16 = vld [vmem:[%s7528_s5 + $0x138] sm:$0xff] }
 0x240   :  { %3805 = vmatpush.bf16.msra.mxu3 %v5915_v5  ;;  %v3936_v40 = vld [vmem:[%s7528_s5 + $0x170] sm:$0xff]  ;;  %v3935_v6 = vld [vmem:[%s7528_s5 + $0x168] sm:$0xff] }
 0x241   :  { %3780 = vmatmul.bf16.vlgmr.msra.gmra.mxu1 %v6964_v12  ;;  %v3600_v12 = vadd.f32 %v3599_v50, %v3586_v13  ;;  %v3952_v41 = vld [vmem:[%s7528_s5 + $0x1f0] sm:$0xff]  ;;  %4023 = vmatpush.msrb.mxu0 %v3904_v37  ;;  %v3951_v48 = vld [vmem:[%s7528_s5 + $0x1e8] sm:$0xff]  ;;  %v3930_v13 = vld [vmem:[%s7528_s5 + $0x140] sm:$0xff] }
 0x242   :  { %4042 = vmatpush.msrb.mxu1 %v3921_v34  ;;  %4063 = vmatpush.msrb.mxu2 %v3936_v40  ;;  %v3900_v55 = vld [vmem:[%s7528_s5 + $0x50] sm:$0xff]  ;;  %v3899_v3 = vld [vmem:[%s7528_s5 + $0x48] sm:$0xff]  ;;  %v3945_v50 = vld [vmem:[%s7528_s5 + $0x1b8] sm:$0xff] }
 0x243   :  { %3806 = vmatmul.bf16.vlgmr.msra.gmra.mxu3 %v6975_v29  ;;  %v3588_v29 = vpop.f32.mrf.mxu2  ;;  %v3601_v18 = vpop.f32.mrf.mxu3  ;;  %4024 = vmatpush.msrb.mxu0 %v3903_v47  ;;  %v3916_v59 = vld [vmem:[%s7528_s5 + $0xd0] sm:$0xff]  ;;  %v3915_v5 = vld [vmem:[%s7528_s5 + $0xc8] sm:$0xff]  ;;  %v3906_v47 = vld [vmem:[%s7528_s5 + $0x80] sm:$0xff] }
 0x244   :  { %4082 = vmatpush.msrb.mxu3 %v3953_v36  ;;  %4043 = vmatpush.msrb.mxu1 %v3920_v39  ;;  %v3932_v60 = vld [vmem:[%s7528_s5 + $0x150] sm:$0xff]  ;;  %v3931_v9 = vld [vmem:[%s7528_s5 + $0x148] sm:$0xff] }
 0x245   :  { %4064 = vmatpush.msrb.mxu2 %v3935_v6  ;;  %4025 = vmatpush.msrb.mxu0 %v3902_v51  ;;  %v3948_v61 = vld [vmem:[%s7528_s5 + $0x1d0] sm:$0xff]  ;;  %v3947_v0 = vld [vmem:[%s7528_s5 + $0x1c8] sm:$0xff]  ;;  %v3938_v6 = vld [vmem:[%s7528_s5 + $0x180] sm:$0xff] }
 0x246   :  { %4083 = vmatpush.msrb.mxu3 %v3952_v41  ;;  %4044 = vmatpush.msrb.mxu1 %v3919_v4  ;;  %v3928_v19 = vld [vmem:[%s7528_s5 + $0x130] sm:$0xff]  ;;  %v3891_v36 = vld [vmem:[%s7528_s5 + $0x8] sm:$0xff]  ;;  %v3922_v4 = vld [vmem:[%s7528_s5 + $0x100] sm:$0xff] }
 0x247   :  { %4065 = vmatpush.msrb.mxu2 %v3934_v27  ;;  %4026 = vmatpush.msrb.mxu0 %v3901_v53  ;;  %v3944_v29 = vld [vmem:[%s7528_s5 + $0x1b0] sm:$0xff]  ;;  %v3907_v39 = vld [vmem:[%s7528_s5 + $0x88] sm:$0xff]  ;;  %v3985_v51 = vld [vmem:[%s7528_s5 + $0x2f8] sm:$0xff] }
 0x248   :  { %4084 = vmatpush.msrb.mxu3 %v3951_v48  ;;  %4045 = vmatpush.msrb.mxu1 %v3918_v15  ;;  %v3908_v49 = vld [vmem:[%s7528_s5 + $0x90] sm:$0xff]  ;;  %v3923_v40 = vld [vmem:[%s7528_s5 + $0x108] sm:$0xff]  ;;  %v3969_v48 = vld [vmem:[%s7528_s5 + $0x278] sm:$0xff] }
 0x249   :  { %4066 = vmatpush.msrb.mxu2 %v3933_v14  ;;  %4027 = vmatpush.msrb.mxu0 %v3900_v55  ;;  %v3924_v34 = vld [vmem:[%s7528_s5 + $0x110] sm:$0xff]  ;;  %v3939_v41 = vld [vmem:[%s7528_s5 + $0x188] sm:$0xff]  ;;  %v4001_v15 = vld [vmem:[%s7528_s5 + $0x378] sm:$0xff] }
 0x24a   :  { %4085 = vmatpush.msrb.mxu3 %v3950_v52  ;;  %4046 = vmatpush.msrb.mxu1 %v3917_v54  ;;  %v3940_v35 = vld [vmem:[%s7528_s5 + $0x190] sm:$0xff]  ;;  %v4017_v27 = vld [vmem:[%s7528_s5 + $0x3f8] sm:$0xff]  ;;  %v3983_v55 = vld [vmem:[%s7528_s5 + $0x2e8] sm:$0xff] }
 0x24b   :  { %4067 = vmatpush.msrb.mxu2 %v3932_v60  ;;  %4028 = vmatpush.msrb.mxu0 %v3899_v3  ;;  %v3968_v53 = vld [vmem:[%s7528_s5 + $0x270] sm:$0xff]  ;;  %v4015_v60 = vld [vmem:[%s7528_s5 + $0x3e8] sm:$0xff]  ;;  %v3966_v3 = vld [vmem:[%s7528_s5 + $0x260] sm:$0xff] }
 0x24c   :  { %4086 = vmatpush.msrb.mxu3 %v3949_v43  ;;  %4047 = vmatpush.msrb.mxu1 %v3916_v59  ;;  %v3984_v54 = vld [vmem:[%s7528_s5 + $0x2f0] sm:$0xff]  ;;  %v3967_v43 = vld [vmem:[%s7528_s5 + $0x268] sm:$0xff] }
 0x24d   :  { %4068 = vmatpush.msrb.mxu2 %v3931_v9  ;;  %4029 = vmatpush.msrb.mxu0 %v3898_v10  ;;  %v4000_v14 = vld [vmem:[%s7528_s5 + $0x370] sm:$0xff]  ;;  %v3999_v59 = vld [vmem:[%s7528_s5 + $0x368] sm:$0xff]  ;;  %v3998_v9 = vld [vmem:[%s7528_s5 + $0x360] sm:$0xff] }
 0x24e   :  { %4087 = vmatpush.msrb.mxu3 %v3948_v61  ;;  %4048 = vmatpush.msrb.mxu1 %v3915_v5  ;;  %v3982_v5 = vld [vmem:[%s7528_s5 + $0x2e0] sm:$0xff]  ;;  %v3965_v10 = vld [vmem:[%s7528_s5 + $0x258] sm:$0xff] }
 0x24f   :  { %v3612_v21 = vpop.f32.mrf.mxu0  ;;  %4069 = vmatpush.msrb.mxu2 %v3930_v13  ;;  %4030 = vmatpush.msrb.mxu0 %v3897_v7  ;;  %v3997_v13 = vld [vmem:[%s7528_s5 + $0x358] sm:$0xff] }
 0x250   :  { %v3613_v22 = vadd.f32 %v3612_v21, %v3600_v12  ;;  %4088 = vmatpush.msrb.mxu3 %v3947_v0  ;;  %4049 = vmatpush.msrb.mxu1 %v3914_v11  ;;  %v3912_v12 = vld [vmem:[%s7528_s5 + $0xb0] sm:$0xff]  ;;  %v3911_v21 = vld [vmem:[%s7528_s5 + $0xa8] sm:$0xff]  ;;  %v3981_v11 = vld [vmem:[%s7528_s5 + $0x2d8] sm:$0xff] }
 0x251   :  { %4070 = vmatpush.msrb.mxu2 %v3929_v16  ;;  %v3964_v16 = vld [vmem:[%s7528_s5 + $0x250] sm:$0xff] }
 0x252   :  { %4089 = vmatpush.msrb.mxu3 %v3946_v63  ;;  %4050 = vmatpush.msrb.mxu1 %v3913_v62  ;;  %v4013_v63 = vld [vmem:[%s7528_s5 + $0x3d8] sm:$0xff] }
 0x253   :  { %v3638_v24 = vpop.f32.mrf.mxu2  ;;  %4071 = vmatpush.msrb.mxu2 %v3928_v19  ;;  %v3827_v19 = vperm.slane %v7086_v57, 6 }
 0x254   :  { %4090 = vmatpush.msrb.mxu3 %v3945_v50  ;;  %4051 = vmatpush.msrb.mxu1 %v3912_v12  ;;  %v3980_v50 = vld [vmem:[%s7528_s5 + $0x2d0] sm:$0xff] }
 0x255   :  { %v3625_v23 = vpop.f32.mrf.mxu1 }
 0x256   :  { %v3626_v58 = vadd.f32 %v3625_v23, %v3613_v22  ;;  %v3927_v22 = vld [vmem:[%s7528_s5 + $0x128] sm:$0xff]  ;;  %4091 = vmatpush.msrb.mxu3 %v3944_v29  ;;  %4052 = vmatpush.msrb.mxu1 %v3911_v21  ;;  %v4012_v29 = vld [vmem:[%s7528_s5 + $0x3d0] sm:$0xff] }
 0x257   :  { %v3614_v44 = vpop.f32.mrf.mxu0  ;;  %v3943_v23 = vld [vmem:[%s7528_s5 + $0x1a8] sm:$0xff]  ;;  %4072 = vmatpush.msrb.mxu2 %v3927_v22 }
 0x258   :  { %v3639_v25 = vadd.f32 %v3638_v24, %v3626_v58  ;;  %v3910_v44 = vld [vmem:[%s7528_s5 + $0xa0] sm:$0xff]  ;;  %4092 = vmatpush.msrb.mxu3 %v3943_v23  ;;  %v3995_v21 = vld [vmem:[%s7528_s5 + $0x348] sm:$0xff] }
 0x259   :  { %4053 = vmatpush.msrb.mxu1 %v3910_v44  ;;  %v4011_v22 = vld [vmem:[%s7528_s5 + $0x3c8] sm:$0xff]  ;;  %v3994_v44 = vld [vmem:[%s7528_s5 + $0x340] sm:$0xff] }
 0x25b   :  { %v3640_v32 = vpop.f32.mrf.mxu2 }
 0x25c   :  { %v3925_v32 = vld [vmem:[%s7528_s5 + $0x118] sm:$0xff] }
 0x25d   :  { %v3651_v26 = vpop.f32.mrf.mxu3  ;;  %v3627_v1 = vpop.f32.mrf.mxu1 }
 0x25e   :  { %v3652_v28 = vadd.f32 %v3651_v26, %v3639_v25  ;;  %v3894_v25 = vld [vmem:[%s7528_s5 + $0x20] sm:$0xff]  ;;  %v3909_v1 = vld [vmem:[%s7528_s5 + $0x98] sm:$0xff] }
 0x25f   :  { %v3926_v26 = vld [vmem:[%s7528_s5 + $0x120] sm:$0xff]  ;;  %4054 = vmatpush.msrb.mxu1 %v3909_v1  ;;  %v3977_v1 = vld [vmem:[%s7528_s5 + $0x2b8] sm:$0xff] }
 0x260   :  { %v3817_v38 = vmul.f32 2.0, %v3652_v28  ;;  %v3942_v28 = vld [vmem:[%s7528_s5 + $0x1a0] sm:$0xff]  ;;  %4073 = vmatpush.msrb.mxu2 %v3926_v26 }
 0x261   :  { %4093 = vmatpush.msrb.mxu3 %v3942_v28  ;;  %4055 = vmatpush.msrb.mxu1 %v3908_v49  ;;  %v4010_v28 = vld [vmem:[%s7528_s5 + $0x3c0] sm:$0xff] }
 0x262   :  { %v3842_v33 = vsub.f32 %v3826_v30, %v3817_v38  ;;  %v3893_v30 = vld [vmem:[%s7528_s5 + $0x18] sm:$0xff]  ;;  %4074 = vmatpush.msrb.mxu2 %v3925_v32 }
 0x263   :  { %v3941_v38 = vld [vmem:[%s7528_s5 + $0x198] sm:$0xff]  ;;  %4056 = vmatpush.msrb.mxu1 %v3907_v39  ;;  %v3992_v39 = vld [vmem:[%s7528_s5 + $0x330] sm:$0xff] }
 0x264   :  { %vm3857_vm4 = vcmp.lt.f32.partialorder %v3842_v33, %v3855_v20  ;;  %4094 = vmatpush.msrb.mxu3 %v3941_v38  ;;  %4075 = vmatpush.msrb.mxu2 %v3924_v34  ;;  %v3993_v32 = vld [vmem:[%s7528_s5 + $0x338] sm:$0xff] }
 0x265   :  { %v7117_v42 = vsel %vm3857_vm4, 5, %v3856_v17  ;;  %v3653_v45 = vpop.f32.mrf.mxu3  ;;  %v7119_v46 = vsel %vm3857_vm4, %v3842_v33, %v3855_v20  ;;  %v3896_v17 = vld [vmem:[%s7528_s5 + $0x30] sm:$0xff]  ;;  %v3895_v20 = vld [vmem:[%s7528_s5 + $0x28] sm:$0xff]  ;;  %4057 = vmatpush.msrb.mxu1 %v3906_v47 }
 0x266   :  { %4031 = vmatpush.msrb.mxu0 %v3896_v17  ;;  %v3892_v33 = vld [vmem:[%s7528_s5 + $0x10] sm:$0xff]  ;;  %4095 = vmatpush.msrb.mxu3 %v3940_v35  ;;  %v3890_v45 = vld [vmem:[%s7528_s5] sm:$0xff]  ;;  %v4007_v47 = vld [vmem:[%s7528_s5 + $0x3a8] sm:$0xff] }
 0x267   :  { %4076 = vmatpush.msrb.mxu2 %v3923_v40  ;;  %4122 = vmatpush.msra.mxu1 %v3985_v51  ;;  %v3996_v17 = vld [vmem:[%s7528_s5 + $0x350] sm:$0xff]  ;;  %v3959_v40 = vld [vmem:[%s7528_s5 + $0x228] sm:$0xff]  ;;  %v4006_v51 = vld [vmem:[%s7528_s5 + $0x3a0] sm:$0xff] }
 0x268   :  { %4032 = vmatpush.msrb.mxu0 %v3895_v20  ;;  %4096 = vmatpush.msrb.mxu3 %v3939_v41  ;;  %v3963_v20 = vld [vmem:[%s7528_s5 + $0x248] sm:$0xff] }
 0x269   :  { %4077 = vmatpush.msrb.mxu2 %v3922_v4  ;;  %4123 = vmatpush.msra.mxu1 %v3984_v54  ;;  %v3975_v41 = vld [vmem:[%s7528_s5 + $0x2a8] sm:$0xff]  ;;  %v3958_v4 = vld [vmem:[%s7528_s5 + $0x220] sm:$0xff]  ;;  %v4005_v54 = vld [vmem:[%s7528_s5 + $0x398] sm:$0xff] }
 0x26a   :  { %4033 = vmatpush.msrb.mxu0 %v3894_v25  ;;  %4097 = vmatpush.msrb.mxu3 %v3938_v6  ;;  %v3978_v25 = vld [vmem:[%s7528_s5 + $0x2c0] sm:$0xff] }
 0x26b   :  { %4142 = vmatpush.msra.mxu2 %v4001_v15  ;;  %4124 = vmatpush.msra.mxu1 %v3983_v55  ;;  %v3974_v6 = vld [vmem:[%s7528_s5 + $0x2a0] sm:$0xff]  ;;  %v4004_v55 = vld [vmem:[%s7528_s5 + $0x390] sm:$0xff] }
 0x26c   :  { %4034 = vmatpush.msrb.mxu0 %v3893_v30  ;;  %4162 = vmatpush.msra.mxu3 %v4017_v27  ;;  %v3961_v30 = vld [vmem:[%s7528_s5 + $0x238] sm:$0xff] }
 0x26d   :  { %4143 = vmatpush.msra.mxu2 %v4000_v14  ;;  %4125 = vmatpush.msra.mxu1 %v3982_v5  ;;  %v3957_v27 = vld [vmem:[%s7528_s5 + $0x218] sm:$0xff]  ;;  %v3956_v14 = vld [vmem:[%s7528_s5 + $0x210] sm:$0xff]  ;;  %v3970_v5 = vld [vmem:[%s7528_s5 + $0x280] sm:$0xff] }
 0x26e   :  { %4035 = vmatpush.msrb.mxu0 %v3892_v33  ;;  %v4009_v33 = vld [vmem:[%s7528_s5 + $0x3b8] sm:$0xff] }
 0x26f   :  { %v7148_v31 = vpop.f32.mrf.mxu0  ;;  %4144 = vmatpush.msra.mxu2 %v3999_v59  ;;  %4126 = vmatpush.msra.mxu1 %v3981_v11  ;;  %v3955_v59 = vld [vmem:[%s7528_s5 + $0x208] sm:$0xff] }
 0x270   :  { %4036 = vmatpush.msrb.mxu0 %v3891_v36  ;;  %v3960_v36 = vld [vmem:[%s7528_s5 + $0x230] sm:$0xff] }
 0x271   :  { %4145 = vmatpush.msra.mxu2 %v3998_v9  ;;  %4127 = vmatpush.msra.mxu1 %v3980_v50  ;;  %v3986_v9 = vld [vmem:[%s7528_s5 + $0x300] sm:$0xff] }
 0x272   :  { %4037 = vmatpush.msrb.mxu0 %v3890_v45  ;;  %v3991_v45 = vld [vmem:[%s7528_s5 + $0x328] sm:$0xff] }
 0x273   :  { %v7173_v2 = vpop.f32.mrf.mxu2  ;;  %4146 = vmatpush.msra.mxu2 %v3997_v13 }
 0x274   :  { %4102 = vmatpush.msra.mxu0 %v3969_v48  ;;  %v3990_v48 = vld [vmem:[%s7528_s5 + $0x320] sm:$0xff] }
 0x275   :  { %v7171_v8 = vpop.f32.mrf.mxu1  ;;  %4147 = vmatpush.msra.mxu2 %v3996_v17 }
 0x276   :  { %v3678_v52 = vadd.f32 %v7171_v8, %v7148_v31  ;;  %v4016_v31 = vld [vmem:[%s7528_s5 + $0x3f0] sm:$0xff]  ;;  %4103 = vmatpush.msra.mxu0 %v3968_v53  ;;  %v3989_v53 = vld [vmem:[%s7528_s5 + $0x318] sm:$0xff] }
 0x277   :  { %v3666_v56 = vpop.f32.mrf.mxu0  ;;  %4163 = vmatpush.msra.mxu3 %v4016_v31  ;;  %4148 = vmatpush.msra.mxu2 %v3995_v21  ;;  %v3972_v31 = vld [vmem:[%s7528_s5 + $0x290] sm:$0xff] }
 0x278   :  { %v3691_v61 = vadd.f32 %v7173_v2, %v3678_v52  ;;  %4104 = vmatpush.msra.mxu0 %v3967_v43  ;;  %v4014_v2 = vld [vmem:[%s7528_s5 + $0x3e0] sm:$0xff]  ;;  %v3973_v52 = vld [vmem:[%s7528_s5 + $0x298] sm:$0xff]  ;;  %v3988_v43 = vld [vmem:[%s7528_s5 + $0x310] sm:$0xff] }
 0x279   :  { %4164 = vmatpush.msra.mxu3 %v4015_v60  ;;  %4149 = vmatpush.msra.mxu2 %v3994_v44  ;;  %v3971_v60 = vld [vmem:[%s7528_s5 + $0x288] sm:$0xff] }
 0x27a   :  { %4105 = vmatpush.msra.mxu0 %v3966_v3  ;;  %v3954_v3 = vld [vmem:[%s7528_s5 + $0x200] sm:$0xff] }
 0x27b   :  { %v3692_v58 = vpop.f32.mrf.mxu2  ;;  %4165 = vmatpush.msra.mxu3 %v4014_v2  ;;  %4150 = vmatpush.msra.mxu2 %v3993_v32  ;;  %v4002_v2 = vld [vmem:[%s7528_s5 + $0x380] sm:$0xff] }
 0x27c   :  { %4106 = vmatpush.msra.mxu0 %v3965_v10  ;;  %v3962_v58 = vld [vmem:[%s7528_s5 + $0x240] sm:$0xff] }
 0x27d   :  { %v7226_v18 = vpop.f32.mrf.mxu3  ;;  %v3679_v24 = vpop.f32.mrf.mxu1  ;;  %4166 = vmatpush.msra.mxu3 %v4013_v63  ;;  %4151 = vmatpush.msra.mxu2 %v3992_v39 }
 0x27e   :  { %v3704_v0 = vadd.f32 %v7226_v18, %v3691_v61  ;;  %v3979_v18 = vld [vmem:[%s7528_s5 + $0x2c8] sm:$0xff]  ;;  %4107 = vmatpush.msra.mxu0 %v3964_v16 }
 0x27f   :  { %4167 = vmatpush.msra.mxu3 %v4012_v29  ;;  %4128 = vmatpush.msra.mxu1 %v3979_v18  ;;  %v3987_v61 = vld [vmem:[%s7528_s5 + $0x308] sm:$0xff] }
 0x280   :  { %4108 = vmatpush.msra.mxu0 %v3963_v20  ;;  %4152 = vmatpush.msra.mxu2 %v3991_v45 }
 0x281   :  { %4168 = vmatpush.msra.mxu3 %v4011_v22  ;;  %4129 = vmatpush.msra.mxu1 %v3978_v25 }
 0x282   :  { %4109 = vmatpush.msra.mxu0 %v3962_v58  ;;  %4153 = vmatpush.msra.mxu2 %v3990_v48 }
 0x283   :  { %4169 = vmatpush.msra.mxu3 %v4010_v28  ;;  %4130 = vmatpush.msra.mxu1 %v3977_v1 }
 0x284   :  { %4110 = vmatpush.msra.mxu0 %v3961_v30  ;;  %4154 = vmatpush.msra.mxu2 %v3989_v53 }
 0x285   :  { %v3705_v37 = vpop.f32.mrf.mxu3  ;;  %4170 = vmatpush.msra.mxu3 %v4009_v33 }
 0x286   :  { %v3976_v37 = vld [vmem:[%s7528_s5 + $0x2b0] sm:$0xff]  ;;  %4111 = vmatpush.msra.mxu0 %v3960_v36  ;;  %4155 = vmatpush.msra.mxu2 %v3988_v43 }
 0x287   :  { %4131 = vmatpush.msra.mxu1 %v3976_v37 }
 0x288   :  { %4112 = vmatpush.msra.mxu0 %v3959_v40  ;;  %4156 = vmatpush.msra.mxu2 %v3987_v61 }
 0x289   :  { %4132 = vmatpush.msra.mxu1 %v3975_v41 }
 0x28a   :  { %4113 = vmatpush.msra.mxu0 %v3958_v4  ;;  %4157 = vmatpush.msra.mxu2 %v3986_v9 }
 0x28b   :  { %4133 = vmatpush.msra.mxu1 %v3974_v6 }
 0x28c   :  { %4114 = vmatpush.msra.mxu0 %v3957_v27 }
 0x28d   :  { %4134 = vmatpush.msra.mxu1 %v3973_v52 }
 0x28e   :  { %4115 = vmatpush.msra.mxu0 %v3956_v14 }
 0x28f   :  { %v3716_v8 = vpop.f32.mrf.mxu0  ;;  %4135 = vmatpush.msra.mxu1 %v3972_v31 }
 0x290   :  { %v3717_v56 = vadd.f32 %v3716_v8, %v3704_v0  ;;  %v4003_v8 = vld [vmem:[%s7528_s5 + $0x388] sm:$0xff]  ;;  %4116 = vmatpush.msra.mxu0 %v3955_v59 }
 0x291   :  { %4136 = vmatpush.msra.mxu1 %v3971_v60 }
 0x292   :  { %4117 = vmatpush.msra.mxu0 %v3954_v3 }
 0x293   :  { %v7361_v62 = vpop.f32.mrf.mxu2  ;;  %4137 = vmatpush.msra.mxu1 %v3970_v5 }
 0x295   :  { %v3729_v7 = vpop.f32.mrf.mxu1 }
 0x296   :  { %v3730_v12 = vadd.f32 %v3729_v7, %v3717_v56 }
 0x297   :  { %v3718_v24 = vpop.f32.mrf.mxu0 }
 0x298   :  { %v3818_v23 = vmul.f32 2.0, %v3730_v12 }
 0x29a   :  { %v7397_v26 = vsub.f32 %v3827_v19, %v3818_v23  ;;  %v3828_v19 = vperm.slane %v7086_v57, 7  ;;  %v6867_v23 = vmov 1.0   ;;  %v6650_v57 = vld [vmem:[#allocation11] ss:$0 sm:$0xff] }
 0x29b   :  { %v3744_v35 = vpop.f32.mrf.mxu2 }
 0x29c   :  { %vm3860_vm5 = vcmp.lt.f32.partialorder %v7397_v26, %v7119_v46 }
 0x29d   :  { %v7413_v38 = vpop.f32.mrf.mxu3  ;;  %v7422_v49 = vsel %vm3860_vm5, 6, %v7117_v42  ;;  %v3731_v34 = vpop.f32.mrf.mxu1  ;;  %v4008_v42 = vld [vmem:[%s7528_s5 + $0x3b0] sm:$0xff]  ;;  %s6868_s5 = smov [#allocation14]  }
 0x29e   :  { %4171 = vmatpush.msra.mxu3 %v4008_v42  ;;  %v3756_v10 = vadd.f32 %v7413_v38, %v7361_v62  ;;  %v3861_v62 = vsel %vm3860_vm5, %v7397_v26, %v7119_v46  ;;  %s4200_s15 = sshll.u32 %s6868_s5, 4  ;;  %s4201_s15 = int_to_ptr.vmem [resolvable:$true] %s4200_s15 }
 0x2a0   :  { %4172 = vmatpush.msra.mxu3 %v4007_v47 }
 0x2a2   :  { %4173 = vmatpush.msra.mxu3 %v4006_v51 }
 0x2a4   :  { %4174 = vmatpush.msra.mxu3 %v4005_v54 }
 0x2a5   :  { %v3757_v15 = vpop.f32.mrf.mxu3 }
 0x2a6   :  { %4175 = vmatpush.msra.mxu3 %v4004_v55 }
 0x2a8   :  { %4176 = vmatpush.msra.mxu3 %v4003_v8 }
 0x2aa   :  { %4177 = vmatpush.msra.mxu3 %v4002_v2 }
 0x2b8   :  { %v3768_v0 = vpop.f32.mrf.mxu0 }
 0x2b9   :  { %v3769_v13 = vadd.f32 %v3768_v0, %v3756_v10 }
 0x2bc   :  { %v3794_v11 = vpop.f32.mrf.mxu2 }
 0x2be   :  { %v3781_v56 = vpop.f32.mrf.mxu1 }
 0x2bf   :  { %v3782_v63 = vadd.f32 %v3781_v56, %v3769_v13 }
 0x2c0   :  { %v3770_v7 = vpop.f32.mrf.mxu0 }
 0x2c1   :  { %v3795_v16 = vadd.f32 %v3794_v11, %v3782_v63 }
 0x2c4   :  { %v3796_v17 = vpop.f32.mrf.mxu2 }
 0x2c6   :  { %v3807_v50 = vpop.f32.mrf.mxu3  ;;  %v3783_v29 = vpop.f32.mrf.mxu1 }
 0x2c7   :  { %v3808_v12 = vadd.f32 %v3807_v50, %v3795_v16 }
 0x2c9   :  { %v3819_v20 = vmul.f32 2.0, %v3808_v12 }
 0x2cb   :  { %v3844_v18 = vsub.f32 %v3828_v19, %v3819_v20 }
 0x2cd   :  { %vm3863_vm6 = vcmp.lt.f32.partialorder %v3844_v18, %v3861_v62 }
 0x2ce   :  { %v3864_v21 = vsel %vm3863_vm6, 7, %v7422_v49  ;;  %v3809_v22 = vpop.f32.mrf.mxu3 }
 0x2cf   :  { %3865 = vst [vmem:[#allocation14] sm:$0x3] %v3864_v21  ;;  %vm3866_vm7 = vcmp.eq.s32.totalorder %v3864_v21, 0  ;;  %vm3869_vm8 = vcmp.eq.s32.totalorder %v3864_v21, 1  ;;  %vm3872_vm9 = vcmp.eq.s32.totalorder %v3864_v21, 2  ;;  %vm3875_vm10 = vcmp.eq.s32.totalorder %v3864_v21, 3 }
 0x2d0   :  { %6148 = vmatmul.msk.f32.vlgmr.msrb.gmra.mxu0 %vm3866_vm7, %v6867_v23  ;;  %6149 = vmatmul.msk.f32.vlgmr.msrb.gmra.mxu1 %vm3869_vm8, %v6867_v23  ;;  %vm3878_vm11 = vcmp.eq.s32.totalorder %v3864_v21, 4  ;;  %vm3881_vm12 = vcmp.eq.s32.totalorder %v3864_v21, 5  ;;  %vm3884_vm13 = vcmp.eq.s32.totalorder %v3864_v21, 6  ;;  %vm3887_vm14 = vcmp.eq.s32.totalorder %v3864_v21, 7  ;;  %4205 = dma.vmem_to_hbm [thread:$0]  %s4201_s15, 32, %s4203_s18, [#allocation15]  }
 0x2d1   :  { %6150 = vmatmul.msk.f32.vlgmr.msrb.gmra.mxu2 %vm3872_vm9, %v6867_v23  ;;  %6151 = vmatmul.msk.f32.vlgmr.msrb.gmra.mxu3 %vm3875_vm10, %v6867_v23 }
 0x2d8   :  { %6152 = vmatmul.msk.f32.vlgmr.msra.gmra.mxu0 %vm3878_vm11, %v6867_v23  ;;  %6153 = vmatmul.msk.f32.vlgmr.msra.gmra.mxu1 %vm3881_vm12, %v6867_v23 }
 0x2d9   :  { %6154 = vmatmul.msk.f32.vlgmr.msra.gmra.mxu2 %vm3884_vm13, %v6867_v23  ;;  %6155 = vmatmul.msk.f32.vlgmr.msra.gmra.mxu3 %vm3887_vm14, %v6867_v23 }
 0x34d   :  { %v4039_v46 = vpop.f32.mrf.mxu0  ;;  %v4059_v58 = vpop.f32.mrf.mxu1 }
 0x34e   :  { %v4040_v24 = vadd.f32 %v6650_v57, %v4039_v46 }
 0x350   :  { %v4060_v25 = vadd.f32 %v4059_v58, %v4040_v24 }
 0x354   :  { %v4079_v44 = vpop.f32.mrf.mxu2  ;;  %v4099_v26 = vpop.f32.mrf.mxu3 }
 0x355   :  { %v4080_v28 = vadd.f32 %v4079_v44, %v4060_v25  ;;  %v4119_v1 = vpop.f32.mrf.mxu0  ;;  %v4139_v38 = vpop.f32.mrf.mxu1 }
 0x357   :  { %v4100_v30 = vadd.f32 %v4099_v26, %v4080_v28 }
 0x359   :  { %v4120_v32 = vadd.f32 %v4119_v1, %v4100_v30 }
 0x35b   :  { %v4140_v33 = vadd.f32 %v4139_v38, %v4120_v32 }
 0x35c   :  { %v4159_v49 = vpop.f32.mrf.mxu2  ;;  %v4179_v35 = vpop.f32.mrf.mxu3 }
 0x35d   :  { %v4160_v34 = vadd.f32 %v4159_v49, %v4140_v33 }
 0x35f   :  { %v4180_v36 = vadd.f32 %v4179_v35, %v4160_v34 }
 0x361   :  { %4183 = vst.msk [vmem:[#allocation13] sm:$0x3] %vm4182_vm15, %v4180_v36 }
 0x362   :  { %4194 = dma.vmem_to_hbm [thread:$0]  %s4190_s19, 32, %s4192_s21, [#allocation4]  }
 0x363   :  { %6852 = dma.done.wait [#allocation4], 32  }
 0x364   :  { %6853 = vsyncadd [#allocation4], 4294967264 }
 0x365   :  { %6854 = dma.done.wait [#allocation15], 32  }
 0x366   :  { %6855 = vsyncadd [#allocation15], 4294967264 }
 0x367   :  { %4214 = vsyncpa [#allocation3], 1 }
 0x368   :  { %4215 = vsyncpa [#allocation6], 1 }
 0x369   :  { %4216 = vsyncpa [#allocation9], 1 }
 0x36a   :  { %4217 = vsyncpa [#allocation12], 1 }
 0x36b   :  { %4218 = vsyncpa [#allocation4], 1 }
 0x36c   :  { %4219 = vsyncpa [#allocation15], 1 }

</bundles_post_ra>
